<compile_context>
chip_gen: v5e
topology: v5e:2x2
jax: 0.10.0
libtpu: 0.0.40
codegen_flags: <defaults>
</compile_context>

<pallas_src>
import jax
import jax.numpy as jnp
from jax.experimental import pallas as pl
from jax.experimental.pallas import tpu as pltpu


# --------------------------------------------------------------------------- fused kernel
def _fused_forward_kernel(x_ref, stem_w_ref, stem_s_ref, stem_b_ref,
                          rw1_ref, rw2_ref, rbn_ref,
                          head_w_ref, head_b_ref,
                          vfc1_wt_ref, vfc1_b_ref, vfc2_w_ref, vfc2_b_ref,
                          piw0_ref, piw1_ref, pib_ref,
                          pi_ref, v_ref,
                          pad_scr, col_scr):
    NB, H, W, C = x_ref.shape
    HW = H * W
    M = NB * HW
    depth = rw1_ref.shape[0]
    mm_dtype = stem_w_ref.dtype          # matmul operand dtype (bf16), f32 accumulate

    # Zero the padded scratch ONCE — only the interior is rewritten below, so the halo
    # stays zero across the stem conv and every residual conv.
    pad_scr[...] = jnp.zeros(pad_scr.shape, pad_scr.dtype)

    def conv3x3(act, w):
        """act: [M, C] f32 rows ordered (n, h, w). w: [9*C, Cout]. -> [M, Cout] f32."""
        pad_scr[:, 1:H + 1, 1:W + 1, :] = act.reshape(NB, H, W, C)
        # im2col: pack the 9 shifted taps lane-wise -> one K = 9*C MXU matmul.
        for k in range(9):
            dy, dx = divmod(k, 3)
            col_scr[:, k * C:(k + 1) * C] = (
                pad_scr[:, dy:dy + H, dx:dx + W, :].reshape(M, C))
        return jnp.dot(col_scr[...].astype(mm_dtype), w,
                       preferred_element_type=jnp.float32)

    # ---- stem: relu(bn1(conv1(x))) ----  (input planes are zero-padded to C channels)
    s = conv3x3(x_ref[...].reshape(M, C), stem_w_ref[...])
    s = jnp.maximum(s * stem_s_ref[...] + stem_b_ref[...], 0.0)

    # ---- residual tower: pre-activation blocks, fori_loop over stacked weights ----
    def block(d, s):
        bn = rbn_ref[d]                                        # [4, C]: s1, b1, s2, b2
        t = jnp.maximum(s * bn[0:1, :] + bn[1:2, :], 0.0)
        t = conv3x3(t, rw1_ref[d])
        t = jnp.maximum(t * bn[2:3, :] + bn[3:4, :], 0.0)
        t = conv3x3(t, rw2_ref[d])
        return s + t                                           # no final ReLU (per spec)

    s = jax.lax.fori_loop(0, depth, block, s)

    # ---- heads: fused value/policy 1x1 convs (BN folded) -> one [C, 3] matmul ----
    hp = jnp.dot(s, head_w_ref[...], preferred_element_type=jnp.float32) + head_b_ref[...]

    # Per-sample row selector: sel[n, m] = 1 iff row m belongs to sample n.
    row = jax.lax.broadcasted_iota(jnp.int32, (NB, M), 0) * HW
    col = jax.lax.broadcasted_iota(jnp.int32, (NB, M), 1)
    sel = ((col >= row) & (col < row + HW)).astype(jnp.float32)

    # Value head: flatten + v_fc1 fused into one selector matmul, then v_fc2 + tanh.
    v1 = jnp.dot(sel, hp[:, 0:1] * vfc1_wt_ref[...],
                 preferred_element_type=jnp.float32) + vfc1_b_ref[...]
    v2 = jnp.dot(v1, vfc2_w_ref[...],
                 preferred_element_type=jnp.float32) + vfc2_b_ref[...]
    v_ref[...] = jnp.tanh(v2)

    # Policy head: the channel-major flatten is folded into the pre-split, tiled weights.
    pmix = hp[:, 1:2] * piw0_ref[...] + hp[:, 2:3] * piw1_ref[...]       # [M, A]
    logits = jnp.dot(sel, pmix, preferred_element_type=jnp.float32) + pib_ref[...]
    zmax = jnp.max(logits, axis=1, keepdims=True)
    z = logits - zmax
    pi_ref[...] = z - jnp.log(jnp.sum(jnp.exp(z), axis=1, keepdims=True))


# --------------------------------------------------------------------------------- wrapper
def nnet_forward(x_nchw, prepared, batch_block=None):
    N, Cin, H, W = x_nchw.shape
    C = prepared["stem_scale"].shape[-1]
    A = prepared["pi_fc_b"].shape[-1]
    HW = H * W
    NB = N if batch_block is None else batch_block
    assert N % NB == 0 and C >= Cin
    assert prepared["v_fc1_wt"].shape[0] == NB * HW  # params must be prepared for this NB

    # NCHW -> NHWC once at the boundary; zero-pad the input planes to C channels so the
    # stem shares the residual im2col path (the matching stem weight rows are zero).
    x = jnp.transpose(x_nchw, (0, 2, 3, 1)).astype(jnp.float32)
    x = jnp.pad(x, ((0, 0), (0, 0), (0, 0), (0, C - Cin)))

    args = (x,
            prepared["stem_w"], prepared["stem_scale"], prepared["stem_bias"],
            prepared["res_w1"], prepared["res_w2"], prepared["res_bn"],
            prepared["head_w"], prepared["head_b"],
            prepared["v_fc1_wt"], prepared["v_fc1_b"],
            prepared["v_fc2_w"], prepared["v_fc2_b"],
            prepared["pi_fc_w0t"], prepared["pi_fc_w1t"], prepared["pi_fc_b"])

    def bcast_spec(a):
        nd = a.ndim
        return pl.BlockSpec(a.shape, lambda g, _nd=nd: (0,) * _nd)

    in_specs = [pl.BlockSpec((NB, H, W, C), lambda g: (g, 0, 0, 0))]
    in_specs += [bcast_spec(a) for a in args[1:]]

    grid_spec = pltpu.PrefetchScalarGridSpec(
        num_scalar_prefetch=0,
        grid=(N // NB,),
        in_specs=in_specs,
        out_specs=[pl.BlockSpec((NB, A), lambda g: (g, 0)),
                   pl.BlockSpec((NB, 1), lambda g: (g, 0))],
        scratch_shapes=[
            pltpu.VMEM((NB, H + 2, W + 2, C), jnp.float32),   # zero-haloed activation
            pltpu.VMEM((NB * HW, 9 * C), jnp.float32),        # im2col operand
        ],
    )
    return pl.pallas_call(
        _fused_forward_kernel,
        out_shape=(jax.ShapeDtypeStruct((N, A), jnp.float32),
                   jax.ShapeDtypeStruct((N, 1), jnp.float32)),
        grid_spec=grid_spec,
        compiler_params=pltpu.CompilerParams(dimension_semantics=("parallel",)),
    )(*args)


# -------------------------------------------------------------------- parameter generation
def init_torch_like_params(key, num_channels, depth, H, W, action_size):
    """Synthetic params in PyTorch-like layouts (conv: [Cout,Cin,3,3], linear: [out,in])."""
    c, HW = num_channels, H * W
    counter = [0]

    def nk():
        counter[0] += 1
        return jax.random.fold_in(key, counter[0])

    def w(shape):
        return (0.1 * jax.random.normal(nk(), shape)).astype(jnp.float32)

    def bn(ch):
        return dict(gamma=(1.0 + 0.1 * jax.random.normal(nk(), (ch,))).astype(jnp.float32),
                    beta=(0.1 * jax.random.normal(nk(), (ch,))).astype(jnp.float32),
                    mean=(0.1 * jax.random.normal(nk(), (ch,))).astype(jnp.float32),
                    var=jax.random.uniform(nk(), (ch,), minval=0.5, maxval=1.5).astype(jnp.float32))

    return dict(
        conv1_w=w((c, 4, 3, 3)), bn1=bn(c),
        res=[dict(bn1=bn(c), conv1_w=w((c, c, 3, 3)), bn2=bn(c), conv2_w=w((c, c, 3, 3)))
             for _ in range(depth)],
        v_conv_w=w((1, c, 1, 1)), v_bn=bn(1),
        v_fc1_w=w((HW // 2, HW)), v_fc1_b=w((HW // 2,)),
        v_fc2_w=w((1, HW // 2)), v_fc2_b=w((1,)),
        pi_conv_w=w((2, c, 1, 1)), pi_bn=bn(2),
        pi_fc1_w=w((action_size, 2 * HW)), pi_fc1_b=w((action_size,)),
    )


def _fold_bn(bn, eps=1e-5):
    scale = bn["gamma"] / jnp.sqrt(bn["var"] + eps)
    bias = bn["beta"] - bn["mean"] * scale
    return scale.astype(jnp.float32), bias.astype(jnp.float32)


def _im2col_w(w_oihw):
    """[Cout, Cin, 3, 3] -> [9*Cin, Cout]; row k*Cin + cin for tap k = ky*3 + kx."""
    co, ci, kh, kw = w_oihw.shape
    return jnp.transpose(w_oihw, (2, 3, 1, 0)).reshape(kh * kw * ci, co)


def prepare_params(p, num_channels, H, W, action_size, batch_block, mm_dtype=jnp.bfloat16):
    """Host-side prep: fold BNs, im2col conv weights, fuse head convs, pre-split/tile FC
    weights so the PyTorch channel-major flatten needs no in-kernel transpose."""
    C, HW, NB = num_channels, H * W, batch_block
    out = {}

    # Stem: pad Cin 4 -> C with zero rows so it shares the residual im2col path.
    s, b = _fold_bn(p["bn1"])
    w = jnp.transpose(p["conv1_w"], (2, 3, 1, 0))               # [3,3,4,C]
    w = jnp.pad(w, ((0, 0), (0, 0), (0, C - w.shape[2]), (0, 0)))
    out["stem_w"] = w.reshape(9 * C, C).astype(mm_dtype)
    out["stem_scale"], out["stem_bias"] = s.reshape(1, C), b.reshape(1, C)

    # Residual tower, stacked over depth.
    w1s, w2s, bns = [], [], []
    for blk in p["res"]:
        s1, b1 = _fold_bn(blk["bn1"])
        s2, b2 = _fold_bn(blk["bn2"])
        w1s.append(_im2col_w(blk["conv1_w"]))
        w2s.append(_im2col_w(blk["conv2_w"]))
        bns.append(jnp.stack([s1, b1, s2, b2], axis=0))         # [4, C]
    out["res_w1"] = jnp.stack(w1s, 0).astype(mm_dtype)          # [depth, 9C, C]
    out["res_w2"] = jnp.stack(w2s, 0).astype(mm_dtype)
    out["res_bn"] = jnp.stack(bns, 0)                           # [depth, 4, C]

    # Heads: fold BN into the 1x1 convs and fuse them into one [C, 3] matmul.
    vs, vb = _fold_bn(p["v_bn"])
    ps, pb = _fold_bn(p["pi_bn"])
    wv = p["v_conv_w"].reshape(1, C).T * vs                     # [C, 1]
    wp = p["pi_conv_w"].reshape(2, C).T * ps                    # [C, 2]
    out["head_w"] = jnp.concatenate([wv, wp], axis=1)           # [C, 3]
    out["head_b"] = jnp.concatenate([vb, pb]).reshape(1, 3)

    # Value FCs ([out,in] -> [in,out]); fc1 tiled over the batch block (flatten fused).
    out["v_fc1_wt"] = jnp.tile(p["v_fc1_w"].T, (NB, 1))         # [NB*HW, HW//2]
    out["v_fc1_b"] = p["v_fc1_b"].reshape(1, HW // 2)
    out["v_fc2_w"] = p["v_fc2_w"].T                             # [HW//2, 1]
    out["v_fc2_b"] = p["v_fc2_b"].reshape(1, 1)

    # Policy FC: split torch's channel-major flatten into per-channel row blocks, tile over
    # the batch block -> bit-identical logits with no in-kernel transpose.
    wpiT = p["pi_fc1_w"].T                                      # [2*HW, A]
    out["pi_fc_w0t"] = jnp.tile(wpiT[:HW], (NB, 1))             # [NB*HW, A]
    out["pi_fc_w1t"] = jnp.tile(wpiT[HW:], (NB, 1))
    out["pi_fc_b"] = p["pi_fc1_b"].reshape(1, action_size)
    return out


# ------------------------------------------------------------------------------------ main
if __name__ == "__main__":
    key = jax.random.PRNGKey(0)
    N, H, W = 2, 8, 8                 # Othello board 8x8, 4 input planes
    num_channels = 32
    depth = 2
    action_size = H * W + 1           # 65

    kp, kx = jax.random.split(key)
    torch_params = init_torch_like_params(kp, num_channels, depth, H, W, action_size)
    # batch_block=N -> grid=(1,) and M = N*H*W = 128 rows per matmul.
    # On v7x, use batch_block=N//2 to split the batch across the two TensorCores.
    prepared = prepare_params(torch_params, num_channels, H, W, action_size, batch_block=N)

    x = jax.random.normal(kx, (N, 4, H, W), dtype=jnp.float32)  # NCHW, like PyTorch

    fwd = jax.jit(nnet_forward)
    log_pi, v = fwd(x, prepared)
    jax.block_until_ready((log_pi, v))

    assert log_pi.shape == (N, action_size) and v.shape == (N, 1)
    assert bool(jnp.all(jnp.isfinite(log_pi))) and bool(jnp.all(jnp.isfinite(v)))
    assert bool(jnp.allclose(jnp.sum(jnp.exp(log_pi), axis=1), 1.0, atol=1e-3))
    assert bool(jnp.all(jnp.abs(v) <= 1.0))
    print("KERNEL_OK")
</pallas_src>

<mosaic_0001>
module attributes {stable_mosaic.version = 11 : i64} {
  func.func @_fused_forward_kernel(%arg0: i32, %arg1: memref<2x8x8x32xf32, #tpu.memory_space<vmem>>, %arg2: memref<288x32xbf16, #tpu.memory_space<vmem>>, %arg3: memref<1x32xf32, #tpu.memory_space<vmem>>, %arg4: memref<1x32xf32, #tpu.memory_space<vmem>>, %arg5: memref<2x288x32xbf16, #tpu.memory_space<vmem>>, %arg6: memref<2x288x32xbf16, #tpu.memory_space<vmem>>, %arg7: memref<2x4x32xf32, #tpu.memory_space<vmem>>, %arg8: memref<32x3xf32, #tpu.memory_space<vmem>>, %arg9: memref<1x3xf32, #tpu.memory_space<vmem>>, %arg10: memref<128x32xf32, #tpu.memory_space<vmem>>, %arg11: memref<1x32xf32, #tpu.memory_space<vmem>>, %arg12: memref<32x1xf32, #tpu.memory_space<vmem>>, %arg13: memref<1x1xf32, #tpu.memory_space<vmem>>, %arg14: memref<128x65xf32, #tpu.memory_space<vmem>>, %arg15: memref<128x65xf32, #tpu.memory_space<vmem>>, %arg16: memref<1x65xf32, #tpu.memory_space<vmem>>, %arg17: memref<2x65xf32, #tpu.memory_space<vmem>>, %arg18: memref<2x1xf32, #tpu.memory_space<vmem>>, %arg19: memref<2x10x10x32xf32, #tpu.memory_space<vmem>>, %arg20: memref<128x288xf32, #tpu.memory_space<vmem>>) attributes {dimension_semantics = [#tpu.dimension_semantics<parallel>], iteration_bounds = array<i64: 1>, scalar_prefetch = 0 : i64, scratch_operands = 2 : i64, tpu.core_type = #tpu.core_type<tc>, window_params = [{transform_indices = @transform_0, window_bounds = array<i64: 2, 8, 8, 32>}, {pipeline_mode = #tpu.pipeline_mode<synchronous>, transform_indices = @transform_1, window_bounds = array<i64: 288, 32>}, {pipeline_mode = #tpu.pipeline_mode<synchronous>, transform_indices = @transform_2, window_bounds = array<i64: 1, 32>}, {pipeline_mode = #tpu.pipeline_mode<synchronous>, transform_indices = @transform_3, window_bounds = array<i64: 1, 32>}, {pipeline_mode = #tpu.pipeline_mode<synchronous>, transform_indices = @transform_4, window_bounds = array<i64: 2, 288, 32>}, {pipeline_mode = #tpu.pipeline_mode<synchronous>, transform_indices = @transform_5, window_bounds = array<i64: 2, 288, 32>}, {pipeline_mode = #tpu.pipeline_mode<synchronous>, transform_indices = @transform_6, window_bounds = array<i64: 2, 4, 32>}, {pipeline_mode = #tpu.pipeline_mode<synchronous>, transform_indices = @transform_7, window_bounds = array<i64: 32, 3>}, {pipeline_mode = #tpu.pipeline_mode<synchronous>, transform_indices = @transform_8, window_bounds = array<i64: 1, 3>}, {pipeline_mode = #tpu.pipeline_mode<synchronous>, transform_indices = @transform_9, window_bounds = array<i64: 128, 32>}, {pipeline_mode = #tpu.pipeline_mode<synchronous>, transform_indices = @transform_10, window_bounds = array<i64: 1, 32>}, {pipeline_mode = #tpu.pipeline_mode<synchronous>, transform_indices = @transform_11, window_bounds = array<i64: 32, 1>}, {pipeline_mode = #tpu.pipeline_mode<synchronous>, transform_indices = @transform_12, window_bounds = array<i64: 1, 1>}, {pipeline_mode = #tpu.pipeline_mode<synchronous>, transform_indices = @transform_13, window_bounds = array<i64: 128, 65>}, {pipeline_mode = #tpu.pipeline_mode<synchronous>, transform_indices = @transform_14, window_bounds = array<i64: 128, 65>}, {pipeline_mode = #tpu.pipeline_mode<synchronous>, transform_indices = @transform_15, window_bounds = array<i64: 1, 65>}, {transform_indices = @transform_16, window_bounds = array<i64: 2, 65>}, {transform_indices = @transform_17, window_bounds = array<i64: 2, 1>}]} {
    %cst = arith.constant 0.000000e+00 : f32
    %0 = vector.broadcast %cst : f32 to vector<2x10x10x32xf32>
    %c0 = arith.constant 0 : index
    %c0_0 = arith.constant 0 : index
    %c0_1 = arith.constant 0 : index
    %c0_2 = arith.constant 0 : index
    %1 = vector.load %arg19[%c0, %c0_0, %c0_1, %c0_2] : memref<2x10x10x32xf32, #tpu.memory_space<vmem>>, vector<2x10x10x32xf32>
    tpu.vector_store %arg19[%c0, %c0_0, %c0_1, %c0_2], %0 {strides = array<i32>} : memref<2x10x10x32xf32, #tpu.memory_space<vmem>>, vector<2x10x10x32xf32>,
    %c0_3 = arith.constant 0 : index
    %c0_4 = arith.constant 0 : index
    %c0_5 = arith.constant 0 : index
    %c0_6 = arith.constant 0 : index
    %2 = vector.load %arg1[%c0_3, %c0_4, %c0_5, %c0_6] : memref<2x8x8x32xf32, #tpu.memory_space<vmem>>, vector<2x8x8x32xf32>
    %3 = vector.shape_cast %2 : vector<2x8x8x32xf32> to vector<128x32xf32>
    %c0_7 = arith.constant 0 : index
    %c0_8 = arith.constant 0 : index
    %4 = vector.load %arg2[%c0_7, %c0_8] : memref<288x32xbf16, #tpu.memory_space<vmem>>, vector<288x32xbf16>
    %5 = vector.shape_cast %3 : vector<128x32xf32> to vector<2x8x8x32xf32>
    %c0_9 = arith.constant 0 : index
    %c1 = arith.constant 1 : index
    %c1_10 = arith.constant 1 : index
    %c0_11 = arith.constant 0 : index
    %6 = vector.load %arg19[%c0_9, %c1, %c1_10, %c0_11] : memref<2x10x10x32xf32, #tpu.memory_space<vmem>>, vector<2x8x8x32xf32>
    tpu.vector_store %arg19[%c0_9, %c1, %c1_10, %c0_11], %5 {strides = array<i32>} : memref<2x10x10x32xf32, #tpu.memory_space<vmem>>, vector<2x8x8x32xf32>,
    %c0_12 = arith.constant 0 : index
    %c0_13 = arith.constant 0 : index
    %c0_14 = arith.constant 0 : index
    %c0_15 = arith.constant 0 : index
    %7 = vector.load %arg19[%c0_12, %c0_13, %c0_14, %c0_15] : memref<2x10x10x32xf32, #tpu.memory_space<vmem>>, vector<2x8x8x32xf32>
    %8 = vector.shape_cast %7 : vector<2x8x8x32xf32> to vector<128x32xf32>
    %c0_16 = arith.constant 0 : index
    %c0_17 = arith.constant 0 : index
    %9 = vector.load %arg20[%c0_16, %c0_17] : memref<128x288xf32, #tpu.memory_space<vmem>>, vector<128x32xf32>
    tpu.vector_store %arg20[%c0_16, %c0_17], %8 {strides = array<i32>} : memref<128x288xf32, #tpu.memory_space<vmem>>, vector<128x32xf32>,
    %c0_18 = arith.constant 0 : index
    %c0_19 = arith.constant 0 : index
    %c1_20 = arith.constant 1 : index
    %c0_21 = arith.constant 0 : index
    %10 = vector.load %arg19[%c0_18, %c0_19, %c1_20, %c0_21] : memref<2x10x10x32xf32, #tpu.memory_space<vmem>>, vector<2x8x8x32xf32>
    %11 = vector.shape_cast %10 : vector<2x8x8x32xf32> to vector<128x32xf32>
    %c0_22 = arith.constant 0 : index
    %c32 = arith.constant 32 : index
    %12 = vector.load %arg20[%c0_22, %c32] : memref<128x288xf32, #tpu.memory_space<vmem>>, vector<128x32xf32>
    tpu.vector_store %arg20[%c0_22, %c32], %11 {strides = array<i32>} : memref<128x288xf32, #tpu.memory_space<vmem>>, vector<128x32xf32>,
    %c0_23 = arith.constant 0 : index
    %c0_24 = arith.constant 0 : index
    %c2 = arith.constant 2 : index
    %c0_25 = arith.constant 0 : index
    %13 = vector.load %arg19[%c0_23, %c0_24, %c2, %c0_25] : memref<2x10x10x32xf32, #tpu.memory_space<vmem>>, vector<2x8x8x32xf32>
    %14 = vector.shape_cast %13 : vector<2x8x8x32xf32> to vector<128x32xf32>
    %c0_26 = arith.constant 0 : index
    %c64 = arith.constant 64 : index
    %15 = vector.load %arg20[%c0_26, %c64] : memref<128x288xf32, #tpu.memory_space<vmem>>, vector<128x32xf32>
    tpu.vector_store %arg20[%c0_26, %c64], %14 {strides = array<i32>} : memref<128x288xf32, #tpu.memory_space<vmem>>, vector<128x32xf32>,
    %c0_27 = arith.constant 0 : index
    %c1_28 = arith.constant 1 : index
    %c0_29 = arith.constant 0 : index
    %c0_30 = arith.constant 0 : index
    %16 = vector.load %arg19[%c0_27, %c1_28, %c0_29, %c0_30] : memref<2x10x10x32xf32, #tpu.memory_space<vmem>>, vector<2x8x8x32xf32>
    %17 = vector.shape_cast %16 : vector<2x8x8x32xf32> to vector<128x32xf32>
    %c0_31 = arith.constant 0 : index
    %c96 = arith.constant 96 : index
    %18 = vector.load %arg20[%c0_31, %c96] : memref<128x288xf32, #tpu.memory_space<vmem>>, vector<128x32xf32>
    tpu.vector_store %arg20[%c0_31, %c96], %17 {strides = array<i32>} : memref<128x288xf32, #tpu.memory_space<vmem>>, vector<128x32xf32>,
    %c0_32 = arith.constant 0 : index
    %c1_33 = arith.constant 1 : index
    %c1_34 = arith.constant 1 : index
    %c0_35 = arith.constant 0 : index
    %19 = vector.load %arg19[%c0_32, %c1_33, %c1_34, %c0_35] : memref<2x10x10x32xf32, #tpu.memory_space<vmem>>, vector<2x8x8x32xf32>
    %20 = vector.shape_cast %19 : vector<2x8x8x32xf32> to vector<128x32xf32>
    %c0_36 = arith.constant 0 : index
    %c128 = arith.constant 128 : index
    %21 = vector.load %arg20[%c0_36, %c128] : memref<128x288xf32, #tpu.memory_space<vmem>>, vector<128x32xf32>
    tpu.vector_store %arg20[%c0_36, %c128], %20 {strides = array<i32>} : memref<128x288xf32, #tpu.memory_space<vmem>>, vector<128x32xf32>,
    %c0_37 = arith.constant 0 : index
    %c1_38 = arith.constant 1 : index
    %c2_39 = arith.constant 2 : index
    %c0_40 = arith.constant 0 : index
    %22 = vector.load %arg19[%c0_37, %c1_38, %c2_39, %c0_40] : memref<2x10x10x32xf32, #tpu.memory_space<vmem>>, vector<2x8x8x32xf32>
    %23 = vector.shape_cast %22 : vector<2x8x8x32xf32> to vector<128x32xf32>
    %c0_41 = arith.constant 0 : index
    %c160 = arith.constant 160 : index
    %24 = vector.load %arg20[%c0_41, %c160] : memref<128x288xf32, #tpu.memory_space<vmem>>, vector<128x32xf32>
    tpu.vector_store %arg20[%c0_41, %c160], %23 {strides = array<i32>} : memref<128x288xf32, #tpu.memory_space<vmem>>, vector<128x32xf32>,
    %c0_42 = arith.constant 0 : index
    %c2_43 = arith.constant 2 : index
    %c0_44 = arith.constant 0 : index
    %c0_45 = arith.constant 0 : index
    %25 = vector.load %arg19[%c0_42, %c2_43, %c0_44, %c0_45] : memref<2x10x10x32xf32, #tpu.memory_space<vmem>>, vector<2x8x8x32xf32>
    %26 = vector.shape_cast %25 : vector<2x8x8x32xf32> to vector<128x32xf32>
    %c0_46 = arith.constant 0 : index
    %c192 = arith.constant 192 : index
    %27 = vector.load %arg20[%c0_46, %c192] : memref<128x288xf32, #tpu.memory_space<vmem>>, vector<128x32xf32>
    tpu.vector_store %arg20[%c0_46, %c192], %26 {strides = array<i32>} : memref<128x288xf32, #tpu.memory_space<vmem>>, vector<128x32xf32>,
    %c0_47 = arith.constant 0 : index
    %c2_48 = arith.constant 2 : index
    %c1_49 = arith.constant 1 : index
    %c0_50 = arith.constant 0 : index
    %28 = vector.load %arg19[%c0_47, %c2_48, %c1_49, %c0_50] : memref<2x10x10x32xf32, #tpu.memory_space<vmem>>, vector<2x8x8x32xf32>
    %29 = vector.shape_cast %28 : vector<2x8x8x32xf32> to vector<128x32xf32>
    %c0_51 = arith.constant 0 : index
    %c224 = arith.constant 224 : index
    %30 = vector.load %arg20[%c0_51, %c224] : memref<128x288xf32, #tpu.memory_space<vmem>>, vector<128x32xf32>
    tpu.vector_store %arg20[%c0_51, %c224], %29 {strides = array<i32>} : memref<128x288xf32, #tpu.memory_space<vmem>>, vector<128x32xf32>,
    %c0_52 = arith.constant 0 : index
    %c2_53 = arith.constant 2 : index
    %c2_54 = arith.constant 2 : index
    %c0_55 = arith.constant 0 : index
    %31 = vector.load %arg19[%c0_52, %c2_53, %c2_54, %c0_55] : memref<2x10x10x32xf32, #tpu.memory_space<vmem>>, vector<2x8x8x32xf32>
    %32 = vector.shape_cast %31 : vector<2x8x8x32xf32> to vector<128x32xf32>
    %c0_56 = arith.constant 0 : index
    %c256 = arith.constant 256 : index
    %33 = vector.load %arg20[%c0_56, %c256] : memref<128x288xf32, #tpu.memory_space<vmem>>, vector<128x32xf32>
    tpu.vector_store %arg20[%c0_56, %c256], %32 {strides = array<i32>} : memref<128x288xf32, #tpu.memory_space<vmem>>, vector<128x32xf32>,
    %c0_57 = arith.constant 0 : index
    %c0_58 = arith.constant 0 : index
    %34 = vector.load %arg20[%c0_57, %c0_58] : memref<128x288xf32, #tpu.memory_space<vmem>>, vector<128x288xf32>
    %35 = arith.truncf %34 : vector<128x288xf32> to vector<128x288xbf16>
    %cst_59 = arith.constant dense<0.000000e+00> : vector<128x32xf32>
    %36 = tpu.matmul %35, %4, %cst_59 {dimension_numbers = #tpu.dot_dimension_numbers<[1], [0], [0], [1], [0, 0, 1, 1], [], []>} : vector<128x288xbf16>, vector<288x32xbf16>, vector<128x32xf32> -> vector<128x32xf32>
    %c0_60 = arith.constant 0 : index
    %c0_61 = arith.constant 0 : index
    %37 = vector.load %arg3[%c0_60, %c0_61] : memref<1x32xf32, #tpu.memory_space<vmem>>, vector<1x32xf32>
    %38 = vector.broadcast %37 : vector<1x32xf32> to vector<128x32xf32>
    %39 = arith.mulf %36, %38 : vector<128x32xf32>
    %c0_62 = arith.constant 0 : index
    %c0_63 = arith.constant 0 : index
    %40 = vector.load %arg4[%c0_62, %c0_63] : memref<1x32xf32, #tpu.memory_space<vmem>>, vector<1x32xf32>
    %41 = vector.broadcast %40 : vector<1x32xf32> to vector<128x32xf32>
    %42 = arith.addf %39, %41 : vector<128x32xf32>
    %cst_64 = arith.constant 0.000000e+00 : f32
    %43 = vector.broadcast %cst_64 : f32 to vector<128x32xf32>
    %44 = arith.maximumf %42, %43 : vector<128x32xf32>
    %c0_i32 = arith.constant 0 : i32
    %c2_i32 = arith.constant 2 : i32
    %45 = arith.addi %c0_i32, %c2_i32 : i32
    %c1_i32 = arith.constant 1 : i32
    %46 = scf.for %arg21 = %c0_i32 to %45 step %c1_i32 iter_args(%arg22 = %44) -> (vector<128x32xf32>)  : i32 {
      %102 = arith.index_cast %arg21 : i32 to index
      %c0_95 = arith.constant 0 : index
      %c0_96 = arith.constant 0 : index
      %103 = vector.load %arg7[%102, %c0_95, %c0_96] : memref<2x4x32xf32, #tpu.memory_space<vmem>>, vector<1x4x32xf32>
      %104 = vector.shape_cast %103 : vector<1x4x32xf32> to vector<4x32xf32>
      %105 = vector.extract_strided_slice %104 {offsets = [0, 0], sizes = [1, 32], strides = [1, 1]} : vector<4x32xf32> to vector<1x32xf32>
      %106 = vector.broadcast %105 : vector<1x32xf32> to vector<128x32xf32>
      %107 = arith.mulf %arg22, %106 : vector<128x32xf32>
      %108 = vector.extract_strided_slice %104 {offsets = [1, 0], sizes = [1, 32], strides = [1, 1]} : vector<4x32xf32> to vector<1x32xf32>
      %109 = vector.broadcast %108 : vector<1x32xf32> to vector<128x32xf32>
      %110 = arith.addf %107, %109 : vector<128x32xf32>
      %cst_97 = arith.constant 0.000000e+00 : f32
      %111 = vector.broadcast %cst_97 : f32 to vector<128x32xf32>
      %112 = arith.maximumf %110, %111 : vector<128x32xf32>
      %113 = arith.index_cast %arg21 : i32 to index
      %c0_98 = arith.constant 0 : index
      %c0_99 = arith.constant 0 : index
      %114 = vector.load %arg5[%113, %c0_98, %c0_99] : memref<2x288x32xbf16, #tpu.memory_space<vmem>>, vector<1x288x32xbf16>
      %115 = vector.shape_cast %114 : vector<1x288x32xbf16> to vector<288x32xbf16>
      %116 = vector.shape_cast %112 : vector<128x32xf32> to vector<2x8x8x32xf32>
      %c0_100 = arith.constant 0 : index
      %c1_101 = arith.constant 1 : index
      %c1_102 = arith.constant 1 : index
      %c0_103 = arith.constant 0 : index
      %117 = vector.load %arg19[%c0_100, %c1_101, %c1_102, %c0_103] : memref<2x10x10x32xf32, #tpu.memory_space<vmem>>, vector<2x8x8x32xf32>
      tpu.vector_store %arg19[%c0_100, %c1_101, %c1_102, %c0_103], %116 {strides = array<i32>} : memref<2x10x10x32xf32, #tpu.memory_space<vmem>>, vector<2x8x8x32xf32>,
      %c0_104 = arith.constant 0 : index
      %c0_105 = arith.constant 0 : index
      %c0_106 = arith.constant 0 : index
      %c0_107 = arith.constant 0 : index
      %118 = vector.load %arg19[%c0_104, %c0_105, %c0_106, %c0_107] : memref<2x10x10x32xf32, #tpu.memory_space<vmem>>, vector<2x8x8x32xf32>
      %119 = vector.shape_cast %118 : vector<2x8x8x32xf32> to vector<128x32xf32>
      %c0_108 = arith.constant 0 : index
      %c0_109 = arith.constant 0 : index
      %120 = vector.load %arg20[%c0_108, %c0_109] : memref<128x288xf32, #tpu.memory_space<vmem>>, vector<128x32xf32>
      tpu.vector_store %arg20[%c0_108, %c0_109], %119 {strides = array<i32>} : memref<128x288xf32, #tpu.memory_space<vmem>>, vector<128x32xf32>,
      %c0_110 = arith.constant 0 : index
      %c0_111 = arith.constant 0 : index
      %c1_112 = arith.constant 1 : index
      %c0_113 = arith.constant 0 : index
      %121 = vector.load %arg19[%c0_110, %c0_111, %c1_112, %c0_113] : memref<2x10x10x32xf32, #tpu.memory_space<vmem>>, vector<2x8x8x32xf32>
      %122 = vector.shape_cast %121 : vector<2x8x8x32xf32> to vector<128x32xf32>
      %c0_114 = arith.constant 0 : index
      %c32_115 = arith.constant 32 : index
      %123 = vector.load %arg20[%c0_114, %c32_115] : memref<128x288xf32, #tpu.memory_space<vmem>>, vector<128x32xf32>
      tpu.vector_store %arg20[%c0_114, %c32_115], %122 {strides = array<i32>} : memref<128x288xf32, #tpu.memory_space<vmem>>, vector<128x32xf32>,
      %c0_116 = arith.constant 0 : index
      %c0_117 = arith.constant 0 : index
      %c2_118 = arith.constant 2 : index
      %c0_119 = arith.constant 0 : index
      %124 = vector.load %arg19[%c0_116, %c0_117, %c2_118, %c0_119] : memref<2x10x10x32xf32, #tpu.memory_space<vmem>>, vector<2x8x8x32xf32>
      %125 = vector.shape_cast %124 : vector<2x8x8x32xf32> to vector<128x32xf32>
      %c0_120 = arith.constant 0 : index
      %c64_121 = arith.constant 64 : index
      %126 = vector.load %arg20[%c0_120, %c64_121] : memref<128x288xf32, #tpu.memory_space<vmem>>, vector<128x32xf32>
      tpu.vector_store %arg20[%c0_120, %c64_121], %125 {strides = array<i32>} : memref<128x288xf32, #tpu.memory_space<vmem>>, vector<128x32xf32>,
      %c0_122 = arith.constant 0 : index
      %c1_123 = arith.constant 1 : index
      %c0_124 = arith.constant 0 : index
      %c0_125 = arith.constant 0 : index
      %127 = vector.load %arg19[%c0_122, %c1_123, %c0_124, %c0_125] : memref<2x10x10x32xf32, #tpu.memory_space<vmem>>, vector<2x8x8x32xf32>
      %128 = vector.shape_cast %127 : vector<2x8x8x32xf32> to vector<128x32xf32>
      %c0_126 = arith.constant 0 : index
      %c96_127 = arith.constant 96 : index
      %129 = vector.load %arg20[%c0_126, %c96_127] : memref<128x288xf32, #tpu.memory_space<vmem>>, vector<128x32xf32>
      tpu.vector_store %arg20[%c0_126, %c96_127], %128 {strides = array<i32>} : memref<128x288xf32, #tpu.memory_space<vmem>>, vector<128x32xf32>,
      %c0_128 = arith.constant 0 : index
      %c1_129 = arith.constant 1 : index
      %c1_130 = arith.constant 1 : index
      %c0_131 = arith.constant 0 : index
      %130 = vector.load %arg19[%c0_128, %c1_129, %c1_130, %c0_131] : memref<2x10x10x32xf32, #tpu.memory_space<vmem>>, vector<2x8x8x32xf32>
      %131 = vector.shape_cast %130 : vector<2x8x8x32xf32> to vector<128x32xf32>
      %c0_132 = arith.constant 0 : index
      %c128_133 = arith.constant 128 : index
      %132 = vector.load %arg20[%c0_132, %c128_133] : memref<128x288xf32, #tpu.memory_space<vmem>>, vector<128x32xf32>
      tpu.vector_store %arg20[%c0_132, %c128_133], %131 {strides = array<i32>} : memref<128x288xf32, #tpu.memory_space<vmem>>, vector<128x32xf32>,
      %c0_134 = arith.constant 0 : index
      %c1_135 = arith.constant 1 : index
      %c2_136 = arith.constant 2 : index
      %c0_137 = arith.constant 0 : index
      %133 = vector.load %arg19[%c0_134, %c1_135, %c2_136, %c0_137] : memref<2x10x10x32xf32, #tpu.memory_space<vmem>>, vector<2x8x8x32xf32>
      %134 = vector.shape_cast %133 : vector<2x8x8x32xf32> to vector<128x32xf32>
      %c0_138 = arith.constant 0 : index
      %c160_139 = arith.constant 160 : index
      %135 = vector.load %arg20[%c0_138, %c160_139] : memref<128x288xf32, #tpu.memory_space<vmem>>, vector<128x32xf32>
      tpu.vector_store %arg20[%c0_138, %c160_139], %134 {strides = array<i32>} : memref<128x288xf32, #tpu.memory_space<vmem>>, vector<128x32xf32>,
      %c0_140 = arith.constant 0 : index
      %c2_141 = arith.constant 2 : index
      %c0_142 = arith.constant 0 : index
      %c0_143 = arith.constant 0 : index
      %136 = vector.load %arg19[%c0_140, %c2_141, %c0_142, %c0_143] : memref<2x10x10x32xf32, #tpu.memory_space<vmem>>, vector<2x8x8x32xf32>
      %137 = vector.shape_cast %136 : vector<2x8x8x32xf32> to vector<128x32xf32>
      %c0_144 = arith.constant 0 : index
      %c192_145 = arith.constant 192 : index
      %138 = vector.load %arg20[%c0_144, %c192_145] : memref<128x288xf32, #tpu.memory_space<vmem>>, vector<128x32xf32>
      tpu.vector_store %arg20[%c0_144, %c192_145], %137 {strides = array<i32>} : memref<128x288xf32, #tpu.memory_space<vmem>>, vector<128x32xf32>,
      %c0_146 = arith.constant 0 : index
      %c2_147 = arith.constant 2 : index
      %c1_148 = arith.constant 1 : index
      %c0_149 = arith.constant 0 : index
      %139 = vector.load %arg19[%c0_146, %c2_147, %c1_148, %c0_149] : memref<2x10x10x32xf32, #tpu.memory_space<vmem>>, vector<2x8x8x32xf32>
      %140 = vector.shape_cast %139 : vector<2x8x8x32xf32> to vector<128x32xf32>
      %c0_150 = arith.constant 0 : index
      %c224_151 = arith.constant 224 : index
      %141 = vector.load %arg20[%c0_150, %c224_151] : memref<128x288xf32, #tpu.memory_space<vmem>>, vector<128x32xf32>
      tpu.vector_store %arg20[%c0_150, %c224_151], %140 {strides = array<i32>} : memref<128x288xf32, #tpu.memory_space<vmem>>, vector<128x32xf32>,
      %c0_152 = arith.constant 0 : index
      %c2_153 = arith.constant 2 : index
      %c2_154 = arith.constant 2 : index
      %c0_155 = arith.constant 0 : index
      %142 = vector.load %arg19[%c0_152, %c2_153, %c2_154, %c0_155] : memref<2x10x10x32xf32, #tpu.memory_space<vmem>>, vector<2x8x8x32xf32>
      %143 = vector.shape_cast %142 : vector<2x8x8x32xf32> to vector<128x32xf32>
      %c0_156 = arith.constant 0 : index
      %c256_157 = arith.constant 256 : index
      %144 = vector.load %arg20[%c0_156, %c256_157] : memref<128x288xf32, #tpu.memory_space<vmem>>, vector<128x32xf32>
      tpu.vector_store %arg20[%c0_156, %c256_157], %143 {strides = array<i32>} : memref<128x288xf32, #tpu.memory_space<vmem>>, vector<128x32xf32>,
      %c0_158 = arith.constant 0 : index
      %c0_159 = arith.constant 0 : index
      %145 = vector.load %arg20[%c0_158, %c0_159] : memref<128x288xf32, #tpu.memory_space<vmem>>, vector<128x288xf32>
      %146 = arith.truncf %145 : vector<128x288xf32> to vector<128x288xbf16>
      %cst_160 = arith.constant dense<0.000000e+00> : vector<128x32xf32>
      %147 = tpu.matmul %146, %115, %cst_160 {dimension_numbers = #tpu.dot_dimension_numbers<[1], [0], [0], [1], [0, 0, 1, 1], [], []>} : vector<128x288xbf16>, vector<288x32xbf16>, vector<128x32xf32> -> vector<128x32xf32>
      %148 = vector.extract_strided_slice %104 {offsets = [2, 0], sizes = [1, 32], strides = [1, 1]} : vector<4x32xf32> to vector<1x32xf32>
      %149 = vector.broadcast %148 : vector<1x32xf32> to vector<128x32xf32>
      %150 = arith.mulf %147, %149 : vector<128x32xf32>
      %151 = vector.extract_strided_slice %104 {offsets = [3, 0], sizes = [1, 32], strides = [1, 1]} : vector<4x32xf32> to vector<1x32xf32>
      %152 = vector.broadcast %151 : vector<1x32xf32> to vector<128x32xf32>
      %153 = arith.addf %150, %152 : vector<128x32xf32>
      %cst_161 = arith.constant 0.000000e+00 : f32
      %154 = vector.broadcast %cst_161 : f32 to vector<128x32xf32>
      %155 = arith.maximumf %153, %154 : vector<128x32xf32>
      %156 = arith.index_cast %arg21 : i32 to index
      %c0_162 = arith.constant 0 : index
      %c0_163 = arith.constant 0 : index
      %157 = vector.load %arg6[%156, %c0_162, %c0_163] : memref<2x288x32xbf16, #tpu.memory_space<vmem>>, vector<1x288x32xbf16>
      %158 = vector.shape_cast %157 : vector<1x288x32xbf16> to vector<288x32xbf16>
      %159 = vector.shape_cast %155 : vector<128x32xf32> to vector<2x8x8x32xf32>
      %c0_164 = arith.constant 0 : index
      %c1_165 = arith.constant 1 : index
      %c1_166 = arith.constant 1 : index
      %c0_167 = arith.constant 0 : index
      %160 = vector.load %arg19[%c0_164, %c1_165, %c1_166, %c0_167] : memref<2x10x10x32xf32, #tpu.memory_space<vmem>>, vector<2x8x8x32xf32>
      tpu.vector_store %arg19[%c0_164, %c1_165, %c1_166, %c0_167], %159 {strides = array<i32>} : memref<2x10x10x32xf32, #tpu.memory_space<vmem>>, vector<2x8x8x32xf32>,
      %c0_168 = arith.constant 0 : index
      %c0_169 = arith.constant 0 : index
      %c0_170 = arith.constant 0 : index
      %c0_171 = arith.constant 0 : index
      %161 = vector.load %arg19[%c0_168, %c0_169, %c0_170, %c0_171] : memref<2x10x10x32xf32, #tpu.memory_space<vmem>>, vector<2x8x8x32xf32>
      %162 = vector.shape_cast %161 : vector<2x8x8x32xf32> to vector<128x32xf32>
      %c0_172 = arith.constant 0 : index
      %c0_173 = arith.constant 0 : index
      %163 = vector.load %arg20[%c0_172, %c0_173] : memref<128x288xf32, #tpu.memory_space<vmem>>, vector<128x32xf32>
      tpu.vector_store %arg20[%c0_172, %c0_173], %162 {strides = array<i32>} : memref<128x288xf32, #tpu.memory_space<vmem>>, vector<128x32xf32>,
      %c0_174 = arith.constant 0 : index
      %c0_175 = arith.constant 0 : index
      %c1_176 = arith.constant 1 : index
      %c0_177 = arith.constant 0 : index
      %164 = vector.load %arg19[%c0_174, %c0_175, %c1_176, %c0_177] : memref<2x10x10x32xf32, #tpu.memory_space<vmem>>, vector<2x8x8x32xf32>
      %165 = vector.shape_cast %164 : vector<2x8x8x32xf32> to vector<128x32xf32>
      %c0_178 = arith.constant 0 : index
      %c32_179 = arith.constant 32 : index
      %166 = vector.load %arg20[%c0_178, %c32_179] : memref<128x288xf32, #tpu.memory_space<vmem>>, vector<128x32xf32>
      tpu.vector_store %arg20[%c0_178, %c32_179], %165 {strides = array<i32>} : memref<128x288xf32, #tpu.memory_space<vmem>>, vector<128x32xf32>,
      %c0_180 = arith.constant 0 : index
      %c0_181 = arith.constant 0 : index
      %c2_182 = arith.constant 2 : index
      %c0_183 = arith.constant 0 : index
      %167 = vector.load %arg19[%c0_180, %c0_181, %c2_182, %c0_183] : memref<2x10x10x32xf32, #tpu.memory_space<vmem>>, vector<2x8x8x32xf32>
      %168 = vector.shape_cast %167 : vector<2x8x8x32xf32> to vector<128x32xf32>
      %c0_184 = arith.constant 0 : index
      %c64_185 = arith.constant 64 : index
      %169 = vector.load %arg20[%c0_184, %c64_185] : memref<128x288xf32, #tpu.memory_space<vmem>>, vector<128x32xf32>
      tpu.vector_store %arg20[%c0_184, %c64_185], %168 {strides = array<i32>} : memref<128x288xf32, #tpu.memory_space<vmem>>, vector<128x32xf32>,
      %c0_186 = arith.constant 0 : index
      %c1_187 = arith.constant 1 : index
      %c0_188 = arith.constant 0 : index
      %c0_189 = arith.constant 0 : index
      %170 = vector.load %arg19[%c0_186, %c1_187, %c0_188, %c0_189] : memref<2x10x10x32xf32, #tpu.memory_space<vmem>>, vector<2x8x8x32xf32>
      %171 = vector.shape_cast %170 : vector<2x8x8x32xf32> to vector<128x32xf32>
      %c0_190 = arith.constant 0 : index
      %c96_191 = arith.constant 96 : index
      %172 = vector.load %arg20[%c0_190, %c96_191] : memref<128x288xf32, #tpu.memory_space<vmem>>, vector<128x32xf32>
      tpu.vector_store %arg20[%c0_190, %c96_191], %171 {strides = array<i32>} : memref<128x288xf32, #tpu.memory_space<vmem>>, vector<128x32xf32>,
      %c0_192 = arith.constant 0 : index
      %c1_193 = arith.constant 1 : index
      %c1_194 = arith.constant 1 : index
      %c0_195 = arith.constant 0 : index
      %173 = vector.load %arg19[%c0_192, %c1_193, %c1_194, %c0_195] : memref<2x10x10x32xf32, #tpu.memory_space<vmem>>, vector<2x8x8x32xf32>
      %174 = vector.shape_cast %173 : vector<2x8x8x32xf32> to vector<128x32xf32>
      %c0_196 = arith.constant 0 : index
      %c128_197 = arith.constant 128 : index
      %175 = vector.load %arg20[%c0_196, %c128_197] : memref<128x288xf32, #tpu.memory_space<vmem>>, vector<128x32xf32>
      tpu.vector_store %arg20[%c0_196, %c128_197], %174 {strides = array<i32>} : memref<128x288xf32, #tpu.memory_space<vmem>>, vector<128x32xf32>,
      %c0_198 = arith.constant 0 : index
      %c1_199 = arith.constant 1 : index
      %c2_200 = arith.constant 2 : index
      %c0_201 = arith.constant 0 : index
      %176 = vector.load %arg19[%c0_198, %c1_199, %c2_200, %c0_201] : memref<2x10x10x32xf32, #tpu.memory_space<vmem>>, vector<2x8x8x32xf32>
      %177 = vector.shape_cast %176 : vector<2x8x8x32xf32> to vector<128x32xf32>
      %c0_202 = arith.constant 0 : index
      %c160_203 = arith.constant 160 : index
      %178 = vector.load %arg20[%c0_202, %c160_203] : memref<128x288xf32, #tpu.memory_space<vmem>>, vector<128x32xf32>
      tpu.vector_store %arg20[%c0_202, %c160_203], %177 {strides = array<i32>} : memref<128x288xf32, #tpu.memory_space<vmem>>, vector<128x32xf32>,
      %c0_204 = arith.constant 0 : index
      %c2_205 = arith.constant 2 : index
      %c0_206 = arith.constant 0 : index
      %c0_207 = arith.constant 0 : index
      %179 = vector.load %arg19[%c0_204, %c2_205, %c0_206, %c0_207] : memref<2x10x10x32xf32, #tpu.memory_space<vmem>>, vector<2x8x8x32xf32>
      %180 = vector.shape_cast %179 : vector<2x8x8x32xf32> to vector<128x32xf32>
      %c0_208 = arith.constant 0 : index
      %c192_209 = arith.constant 192 : index
      %181 = vector.load %arg20[%c0_208, %c192_209] : memref<128x288xf32, #tpu.memory_space<vmem>>, vector<128x32xf32>
      tpu.vector_store %arg20[%c0_208, %c192_209], %180 {strides = array<i32>} : memref<128x288xf32, #tpu.memory_space<vmem>>, vector<128x32xf32>,
      %c0_210 = arith.constant 0 : index
      %c2_211 = arith.constant 2 : index
      %c1_212 = arith.constant 1 : index
      %c0_213 = arith.constant 0 : index
      %182 = vector.load %arg19[%c0_210, %c2_211, %c1_212, %c0_213] : memref<2x10x10x32xf32, #tpu.memory_space<vmem>>, vector<2x8x8x32xf32>
      %183 = vector.shape_cast %182 : vector<2x8x8x32xf32> to vector<128x32xf32>
      %c0_214 = arith.constant 0 : index
      %c224_215 = arith.constant 224 : index
      %184 = vector.load %arg20[%c0_214, %c224_215] : memref<128x288xf32, #tpu.memory_space<vmem>>, vector<128x32xf32>
      tpu.vector_store %arg20[%c0_214, %c224_215], %183 {strides = array<i32>} : memref<128x288xf32, #tpu.memory_space<vmem>>, vector<128x32xf32>,
      %c0_216 = arith.constant 0 : index
      %c2_217 = arith.constant 2 : index
      %c2_218 = arith.constant 2 : index
      %c0_219 = arith.constant 0 : index
      %185 = vector.load %arg19[%c0_216, %c2_217, %c2_218, %c0_219] : memref<2x10x10x32xf32, #tpu.memory_space<vmem>>, vector<2x8x8x32xf32>
      %186 = vector.shape_cast %185 : vector<2x8x8x32xf32> to vector<128x32xf32>
      %c0_220 = arith.constant 0 : index
      %c256_221 = arith.constant 256 : index
      %187 = vector.load %arg20[%c0_220, %c256_221] : memref<128x288xf32, #tpu.memory_space<vmem>>, vector<128x32xf32>
      tpu.vector_store %arg20[%c0_220, %c256_221], %186 {strides = array<i32>} : memref<128x288xf32, #tpu.memory_space<vmem>>, vector<128x32xf32>,
      %c0_222 = arith.constant 0 : index
      %c0_223 = arith.constant 0 : index
      %188 = vector.load %arg20[%c0_222, %c0_223] : memref<128x288xf32, #tpu.memory_space<vmem>>, vector<128x288xf32>
      %189 = arith.truncf %188 : vector<128x288xf32> to vector<128x288xbf16>
      %cst_224 = arith.constant dense<0.000000e+00> : vector<128x32xf32>
      %190 = tpu.matmul %189, %158, %cst_224 {dimension_numbers = #tpu.dot_dimension_numbers<[1], [0], [0], [1], [0, 0, 1, 1], [], []>} : vector<128x288xbf16>, vector<288x32xbf16>, vector<128x32xf32> -> vector<128x32xf32>
      %191 = arith.addf %arg22, %190 : vector<128x32xf32>
      scf.yield %191 : vector<128x32xf32>
    }
    %c2_i32_65 = arith.constant 2 : i32
    %c0_66 = arith.constant 0 : index
    %c0_67 = arith.constant 0 : index
    %47 = vector.load %arg8[%c0_66, %c0_67] : memref<32x3xf32, #tpu.memory_space<vmem>>, vector<32x3xf32>
    %cst_68 = arith.constant dense<0.000000e+00> : vector<128x3xf32>
    %48 = tpu.matmul %46, %47, %cst_68 {dimension_numbers = #tpu.dot_dimension_numbers<[1], [0], [0], [1], [0, 0, 1, 1], [], []>} : vector<128x32xf32>, vector<32x3xf32>, vector<128x3xf32> -> vector<128x3xf32>
    %c0_69 = arith.constant 0 : index
    %c0_70 = arith.constant 0 : index
    %49 = vector.load %arg9[%c0_69, %c0_70] : memref<1x3xf32, #tpu.memory_space<vmem>>, vector<1x3xf32>
    %50 = vector.broadcast %49 : vector<1x3xf32> to vector<128x3xf32>
    %51 = arith.addf %48, %50 : vector<128x3xf32>
    %52 = tpu.iota {dimensions = array<i32: 0>} : vector<2x128xi32>
    %c64_i32 = arith.constant 64 : i32
    %53 = vector.broadcast %c64_i32 : i32 to vector<2x128xi32>
    %54 = arith.muli %52, %53 : vector<2x128xi32>
    %55 = tpu.iota {dimensions = array<i32: 1>} : vector<2x128xi32>
    %56 = arith.cmpi sge, %55, %54 : vector<2x128xi32>
    %c64_i32_71 = arith.constant 64 : i32
    %57 = vector.broadcast %c64_i32_71 : i32 to vector<2x128xi32>
    %58 = arith.addi %54, %57 : vector<2x128xi32>
    %59 = arith.cmpi slt, %55, %58 : vector<2x128xi32>
    %60 = arith.andi %56, %59 : vector<2x128xi1>
    %61 = arith.extui %60 : vector<2x128xi1> to vector<2x128xi32>
    %62 = arith.sitofp %61 : vector<2x128xi32> to vector<2x128xf32>
    %63 = vector.extract_strided_slice %51 {offsets = [0, 0], sizes = [128, 1], strides = [1, 1]} : vector<128x3xf32> to vector<128x1xf32>
    %c0_72 = arith.constant 0 : index
    %c0_73 = arith.constant 0 : index
    %64 = vector.load %arg10[%c0_72, %c0_73] : memref<128x32xf32, #tpu.memory_space<vmem>>, vector<128x32xf32>
    %65 = vector.broadcast %63 : vector<128x1xf32> to vector<128x32xf32>
    %66 = arith.mulf %65, %64 : vector<128x32xf32>
    %cst_74 = arith.constant dense<0.000000e+00> : vector<2x32xf32>
    %67 = tpu.matmul %62, %66, %cst_74 {dimension_numbers = #tpu.dot_dimension_numbers<[1], [0], [0], [1], [0, 0, 1, 1], [], []>} : vector<2x128xf32>, vector<128x32xf32>, vector<2x32xf32> -> vector<2x32xf32>
    %c0_75 = arith.constant 0 : index
    %c0_76 = arith.constant 0 : index
    %68 = vector.load %arg11[%c0_75, %c0_76] : memref<1x32xf32, #tpu.memory_space<vmem>>, vector<1x32xf32>
    %69 = vector.broadcast %68 : vector<1x32xf32> to vector<2x32xf32>
    %70 = arith.addf %67, %69 : vector<2x32xf32>
    %c0_77 = arith.constant 0 : index
    %c0_78 = arith.constant 0 : index
    %71 = vector.load %arg12[%c0_77, %c0_78] : memref<32x1xf32, #tpu.memory_space<vmem>>, vector<32x1xf32>
    %cst_79 = arith.constant dense<0.000000e+00> : vector<2x1xf32>
    %72 = tpu.matmul %70, %71, %cst_79 {dimension_numbers = #tpu.dot_dimension_numbers<[1], [0], [0], [1], [0, 0, 1, 1], [], []>} : vector<2x32xf32>, vector<32x1xf32>, vector<2x1xf32> -> vector<2x1xf32>
    %c0_80 = arith.constant 0 : index
    %c0_81 = arith.constant 0 : index
    %73 = vector.load %arg13[%c0_80, %c0_81] : memref<1x1xf32, #tpu.memory_space<vmem>>, vector<1x1xf32>
    %74 = vector.broadcast %73 : vector<1x1xf32> to vector<2x1xf32>
    %75 = arith.addf %72, %74 : vector<2x1xf32>
    %76 = math.tanh %75 : vector<2x1xf32>
    %c0_82 = arith.constant 0 : index
    %c0_83 = arith.constant 0 : index
    %77 = vector.load %arg18[%c0_82, %c0_83] : memref<2x1xf32, #tpu.memory_space<vmem>>, vector<2x1xf32>
    tpu.vector_store %arg18[%c0_82, %c0_83], %76 {strides = array<i32>} : memref<2x1xf32, #tpu.memory_space<vmem>>, vector<2x1xf32>,
    %78 = vector.extract_strided_slice %51 {offsets = [0, 1], sizes = [128, 1], strides = [1, 1]} : vector<128x3xf32> to vector<128x1xf32>
    %c0_84 = arith.constant 0 : index
    %c0_85 = arith.constant 0 : index
    %79 = vector.load %arg14[%c0_84, %c0_85] : memref<128x65xf32, #tpu.memory_space<vmem>>, vector<128x65xf32>
    %80 = vector.broadcast %78 : vector<128x1xf32> to vector<128x65xf32>
    %81 = arith.mulf %80, %79 : vector<128x65xf32>
    %82 = vector.extract_strided_slice %51 {offsets = [0, 2], sizes = [128, 1], strides = [1, 1]} : vector<128x3xf32> to vector<128x1xf32>
    %c0_86 = arith.constant 0 : index
    %c0_87 = arith.constant 0 : index
    %83 = vector.load %arg15[%c0_86, %c0_87] : memref<128x65xf32, #tpu.memory_space<vmem>>, vector<128x65xf32>
    %84 = vector.broadcast %82 : vector<128x1xf32> to vector<128x65xf32>
    %85 = arith.mulf %84, %83 : vector<128x65xf32>
    %86 = arith.addf %81, %85 : vector<128x65xf32>
    %cst_88 = arith.constant dense<0.000000e+00> : vector<2x65xf32>
    %87 = tpu.matmul %62, %86, %cst_88 {dimension_numbers = #tpu.dot_dimension_numbers<[1], [0], [0], [1], [0, 0, 1, 1], [], []>} : vector<2x128xf32>, vector<128x65xf32>, vector<2x65xf32> -> vector<2x65xf32>
    %c0_89 = arith.constant 0 : index
    %c0_90 = arith.constant 0 : index
    %88 = vector.load %arg16[%c0_89, %c0_90] : memref<1x65xf32, #tpu.memory_space<vmem>>, vector<1x65xf32>
    %89 = vector.broadcast %88 : vector<1x65xf32> to vector<2x65xf32>
    %90 = arith.addf %87, %89 : vector<2x65xf32>
    %cst_91 = arith.constant dense<0xFF800000> : vector<2xf32>
    %91 = vector.multi_reduction <maximumf>, %90, %cst_91 [1] : vector<2x65xf32> to vector<2xf32>
    %92 = vector.shape_cast %91 : vector<2xf32> to vector<2x1xf32>
    %93 = vector.broadcast %92 : vector<2x1xf32> to vector<2x65xf32>
    %94 = arith.subf %90, %93 : vector<2x65xf32>
    %95 = math.exp %94 : vector<2x65xf32>
    %cst_92 = arith.constant dense<0.000000e+00> : vector<2xf32>
    %96 = vector.multi_reduction <add>, %95, %cst_92 [1] : vector<2x65xf32> to vector<2xf32>
    %97 = vector.shape_cast %96 : vector<2xf32> to vector<2x1xf32>
    %98 = math.log %97 : vector<2x1xf32>
    %99 = vector.broadcast %98 : vector<2x1xf32> to vector<2x65xf32>
    %100 = arith.subf %94, %99 : vector<2x65xf32>
    %c0_93 = arith.constant 0 : index
    %c0_94 = arith.constant 0 : index
    %101 = vector.load %arg17[%c0_93, %c0_94] : memref<2x65xf32, #tpu.memory_space<vmem>>, vector<2x65xf32>
    tpu.vector_store %arg17[%c0_93, %c0_94], %100 {strides = array<i32>} : memref<2x65xf32, #tpu.memory_space<vmem>>, vector<2x65xf32>,
    return
  }
  func.func @transform_0(%arg0: i32) -> (i32, i32, i32, i32) {
    %c0_i32 = arith.constant 0 : i32
    %c0_i32_0 = arith.constant 0 : i32
    %c0_i32_1 = arith.constant 0 : i32
    %c0_i32_2 = arith.constant 0 : i32
    return %arg0, %c0_i32, %c0_i32_0, %c0_i32_1 : i32, i32, i32, i32
  }
  func.func @transform_1(%arg0: i32) -> (i32, i32) {
    %c0_i32 = arith.constant 0 : i32
    %c0_i32_0 = arith.constant 0 : i32
    %c0_i32_1 = arith.constant 0 : i32
    return %c0_i32, %c0_i32_0 : i32, i32
  }
  func.func @transform_2(%arg0: i32) -> (i32, i32) {
    %c0_i32 = arith.constant 0 : i32
    %c0_i32_0 = arith.constant 0 : i32
    %c0_i32_1 = arith.constant 0 : i32
    return %c0_i32, %c0_i32_0 : i32, i32
  }
  func.func @transform_3(%arg0: i32) -> (i32, i32) {
    %c0_i32 = arith.constant 0 : i32
    %c0_i32_0 = arith.constant 0 : i32
    %c0_i32_1 = arith.constant 0 : i32
    return %c0_i32, %c0_i32_0 : i32, i32
  }
  func.func @transform_4(%arg0: i32) -> (i32, i32, i32) {
    %c0_i32 = arith.constant 0 : i32
    %c0_i32_0 = arith.constant 0 : i32
    %c0_i32_1 = arith.constant 0 : i32
    %c0_i32_2 = arith.constant 0 : i32
    return %c0_i32, %c0_i32_0, %c0_i32_1 : i32, i32, i32
  }
  func.func @transform_5(%arg0: i32) -> (i32, i32, i32) {
    %c0_i32 = arith.constant 0 : i32
    %c0_i32_0 = arith.constant 0 : i32
    %c0_i32_1 = arith.constant 0 : i32
    %c0_i32_2 = arith.constant 0 : i32
    return %c0_i32, %c0_i32_0, %c0_i32_1 : i32, i32, i32
  }
  func.func @transform_6(%arg0: i32) -> (i32, i32, i32) {
    %c0_i32 = arith.constant 0 : i32
    %c0_i32_0 = arith.constant 0 : i32
    %c0_i32_1 = arith.constant 0 : i32
    %c0_i32_2 = arith.constant 0 : i32
    return %c0_i32, %c0_i32_0, %c0_i32_1 : i32, i32, i32
  }
  func.func @transform_7(%arg0: i32) -> (i32, i32) {
    %c0_i32 = arith.constant 0 : i32
    %c0_i32_0 = arith.constant 0 : i32
    %c0_i32_1 = arith.constant 0 : i32
    return %c0_i32, %c0_i32_0 : i32, i32
  }
  func.func @transform_8(%arg0: i32) -> (i32, i32) {
    %c0_i32 = arith.constant 0 : i32
    %c0_i32_0 = arith.constant 0 : i32
    %c0_i32_1 = arith.constant 0 : i32
    return %c0_i32, %c0_i32_0 : i32, i32
  }
  func.func @transform_9(%arg0: i32) -> (i32, i32) {
    %c0_i32 = arith.constant 0 : i32
    %c0_i32_0 = arith.constant 0 : i32
    %c0_i32_1 = arith.constant 0 : i32
    return %c0_i32, %c0_i32_0 : i32, i32
  }
  func.func @transform_10(%arg0: i32) -> (i32, i32) {
    %c0_i32 = arith.constant 0 : i32
    %c0_i32_0 = arith.constant 0 : i32
    %c0_i32_1 = arith.constant 0 : i32
    return %c0_i32, %c0_i32_0 : i32, i32
  }
  func.func @transform_11(%arg0: i32) -> (i32, i32) {
    %c0_i32 = arith.constant 0 : i32
    %c0_i32_0 = arith.constant 0 : i32
    %c0_i32_1 = arith.constant 0 : i32
    return %c0_i32, %c0_i32_0 : i32, i32
  }
  func.func @transform_12(%arg0: i32) -> (i32, i32) {
    %c0_i32 = arith.constant 0 : i32
    %c0_i32_0 = arith.constant 0 : i32
    %c0_i32_1 = arith.constant 0 : i32
    return %c0_i32, %c0_i32_0 : i32, i32
  }
  func.func @transform_13(%arg0: i32) -> (i32, i32) {
    %c0_i32 = arith.constant 0 : i32
    %c0_i32_0 = arith.constant 0 : i32
    %c0_i32_1 = arith.constant 0 : i32
    return %c0_i32, %c0_i32_0 : i32, i32
  }
  func.func @transform_14(%arg0: i32) -> (i32, i32) {
    %c0_i32 = arith.constant 0 : i32
    %c0_i32_0 = arith.constant 0 : i32
    %c0_i32_1 = arith.constant 0 : i32
    return %c0_i32, %c0_i32_0 : i32, i32
  }
  func.func @transform_15(%arg0: i32) -> (i32, i32) {
    %c0_i32 = arith.constant 0 : i32
    %c0_i32_0 = arith.constant 0 : i32
    %c0_i32_1 = arith.constant 0 : i32
    return %c0_i32, %c0_i32_0 : i32, i32
  }
  func.func @transform_16(%arg0: i32) -> (i32, i32) {
    %c0_i32 = arith.constant 0 : i32
    %c0_i32_0 = arith.constant 0 : i32
    return %arg0, %c0_i32 : i32, i32
  }
  func.func @transform_17(%arg0: i32) -> (i32, i32) {
    %c0_i32 = arith.constant 0 : i32
    %c0_i32_0 = arith.constant 0 : i32
    return %arg0, %c0_i32 : i32, i32
  }
}

</mosaic_0001>

<bundles_post_ra>
// kernel: nnet_forward.1
= control target key start
LH: loop header
LB: loop body
LE: loop exit
PB: predicated region body
PF: predicated region fallthrough
CT: control target
= control target key end

     0   :  { %s7130_s0 = inlined_call_operand.vmem [shape: f32[2,8,8,32], index: 0, kind: input, shape index: {}]   ;;  %s7131_s1 = inlined_call_operand.vmem [shape: bf16[288,32], index: 1, kind: input, shape index: {}]   ;;  %s7132_s2 = inlined_call_operand.vmem [shape: f32[1,32], index: 2, kind: input, shape index: {}]   ;;  %s7133_s3 = inlined_call_operand.vmem [shape: f32[1,32], index: 3, kind: input, shape index: {}]   ;;  %s7134_s4 = inlined_call_operand.vmem [shape: bf16[2,288,32], index: 4, kind: input, shape index: {}]   ;;  %s7135_s5 = inlined_call_operand.vmem [shape: bf16[2,288,32], index: 5, kind: input, shape index: {}]   ;;  %s7136_s6 = inlined_call_operand.vmem [shape: f32[2,4,32], index: 6, kind: input, shape index: {}]   ;;  %s7137_s7 = inlined_call_operand.vmem [shape: f32[32,3], index: 7, kind: input, shape index: {}]   ;;  %s7138_s8 = inlined_call_operand.vmem [shape: f32[1,3], index: 8, kind: input, shape index: {}]   ;;  %s7139_s9 = inlined_call_operand.vmem [shape: f32[128,32], index: 9, kind: input, shape index: {}]   ;;  %s7140_s10 = inlined_call_operand.vmem [shape: f32[1,32], index: 10, kind: input, shape index: {}]   ;;  %s7141_s11 = inlined_call_operand.vmem [shape: f32[32,1], index: 11, kind: input, shape index: {}]   ;;  %s7142_s12 = inlined_call_operand.<no memory space> [shape: f32[1,1], index: 12, kind: input, shape index: {}]   ;;  %s7143_s13 = inlined_call_operand.vmem [shape: f32[128,65], index: 13, kind: input, shape index: {}]   ;;  %s7144_s14 = inlined_call_operand.vmem [shape: f32[128,65], index: 14, kind: input, shape index: {}]   ;;  %s7145_s15 = inlined_call_operand.vmem [shape: f32[1,65], index: 15, kind: input, shape index: {}]   ;;  %s7146_s16 = inlined_call_operand.hbm [shape: f32[2,65], index: 16, kind: output, shape index: {0}]   ;;  %s7147_s17 = inlined_call_operand.vmem [shape: f32[2,1], index: 17, kind: output, shape index: {1}]  }
   0x1   :  { %7150 = sst [smem:[#allocation8_spill]] %s7130_s0  ;;  %v23_v0 = vstv %s7142_s12 }
   0x2   :  { %7151 = sst [smem:[#allocation9_spill]] %s7131_s1  ;;  %24 = vst [vmem:[#allocation4] sm:$0x1] %v23_v0 }
   0x3   :  { %vm59_vm0 = vcmask 261120   ;;  %vm61_vm1 = vcmask 254976   ;;  %v4885_v1 = vmov 0.0  }
   0x4   :  { %60 = vst.msk [vmem:[#allocation2] sm:$0xff] %vm59_vm0, %v4885_v1 }
   0x5   :  { %25 = vsyncpa [#allocation6], 0  ;;  %62 = vst.msk [vmem:[#allocation2 + $0x8] sm:$0x3] %vm61_vm1, %v4885_v1  ;;  %s4886_s12 = smov 32   ;;  %s7152_s28 = sld [smem:[#allocation8_spill]] }
   0x6   :  { %63 = vst.msk [vmem:[#allocation2 + $0x10] sm:$0xff] %vm59_vm0, %v4885_v1  ;;  %s4887_s20 = smov 64   ;;  %s4888_s25 = smov 96   ;;  %vm282_vm2 = vcmask 523520   ;;  %vm379_vm3 = vcmask 785920   ;;  %vm476_vm4 = vcmask 1048320  }
   0x7   :  { %64 = vst.msk [vmem:[#allocation2 + $0x18] sm:$0x3] %vm61_vm1, %v4885_v1  ;;  %s7153_s26 = sld [smem:[#allocation9_spill]] }
   0x8   :  { %65 = vst.msk [vmem:[#allocation2 + $0x20] sm:$0xff] %vm59_vm0, %v4885_v1 }
   0x9   :  { %66 = vst.msk [vmem:[#allocation2 + $0x28] sm:$0x3] %vm61_vm1, %v4885_v1 }
   0xa   :  { %67 = vst.msk [vmem:[#allocation2 + $0x30] sm:$0xff] %vm59_vm0, %v4885_v1 }
   0xb   :  { %68 = vst.msk [vmem:[#allocation2 + $0x38] sm:$0x3] %vm61_vm1, %v4885_v1  ;;  %v102_v3 = vld [vmem:[%s7152_s28 + $0x8] sm:$0xff]  ;;  %v101_v4 = vld [vmem:[%s7152_s28] sm:$0xff]  ;;  %v103_v5 = vld [vmem:[%s7152_s28 + $0x10] sm:$0xff] }
   0xc   :  { %v202_v2 = vld [vmem:[#allocation2 + $0x1] sm:$0xff]  ;;  %69 = vst.msk [vmem:[#allocation2 + $0x40] sm:$0xff] %vm59_vm0, %v4885_v1  ;;  %v104_v6 = vld [vmem:[%s7152_s28 + $0x18] sm:$0xff]  ;;  %v107_v32 = vld [vmem:[%s7152_s28 + $0x30] sm:$0xff] }
   0xd   :  { %234 = vrot.lane.b32.xlu0 %v202_v2, %s4886_s12  ;;  %70 = vst.msk [vmem:[#allocation2 + $0x48] sm:$0x3] %vm61_vm1, %v4885_v1  ;;  %v299_v19 = vld [vmem:[#allocation2 + $0x2] sm:$0xff]  ;;  %v112_v21 = vld [vmem:[%s7152_s28 + $0x58] sm:$0xff]  ;;  %v115_v39 = vld [vmem:[%s7152_s28 + $0x70] sm:$0xff] }
   0xe   :  { %71 = vst.msk [vmem:[#allocation2 + $0x50] sm:$0xff] %vm59_vm0, %v4885_v1  ;;  %v105_v20 = vld [vmem:[%s7152_s28 + $0x20] sm:$0xff]  ;;  %v114_v26 = vld [vmem:[%s7152_s28 + $0x68] sm:$0xff]  ;;  %v4446_v45 = vld [vmem:[%s7153_s26 + $0x38] sm:$0xff] }
   0xf   :  { %72 = vst.msk [vmem:[#allocation2 + $0x58] sm:$0x3] %vm61_vm1, %v4885_v1  ;;  %v113_v23 = vld [vmem:[%s7152_s28 + $0x60] sm:$0xff]  ;;  %v106_v28 = vld [vmem:[%s7152_s28 + $0x28] sm:$0xff]  ;;  %v5201_v46 = vld [vmem:[%s7153_s26 + $0x78] sm:$0xff]  ;;  %1050 = vmatpush.bf16.msra.mxu0 %v4446_v45  ;;  %4495 = vmatpush.bf16.msra.mxu3 %v4446_v45 }
  0x10   :  { %73 = vst.msk [vmem:[#allocation2 + $0x60] sm:$0xff] %vm59_vm0, %v4885_v1  ;;  %v170_v42 = vld [vmem:[#allocation2] sm:$0xff]  ;;  %1099 = vmatpush.bf16.msra.mxu1 %v5201_v46  ;;  %v108_v49 = vld [vmem:[%s7152_s28 + $0x38] sm:$0xff]  ;;  %v4445_v50 = vld [vmem:[%s7153_s26 + $0x30] sm:$0xff] }
  0x11   :  { %74 = vst.msk [vmem:[#allocation2 + $0x68] sm:$0x3] %vm61_vm1, %v4885_v1  ;;  %v5221_v51 = vld [vmem:[%s7153_s26 + $0x70] sm:$0xff]  ;;  %v4444_v52 = vld [vmem:[%s7153_s26 + $0x28] sm:$0xff]  ;;  %v4443_v57 = vld [vmem:[%s7153_s26 + $0x20] sm:$0xff] }
  0x12   :  { %75 = vst.msk [vmem:[#allocation2 + $0x70] sm:$0xff] %vm59_vm0, %v4885_v1  ;;  %v5233_v53 = vld [vmem:[%s7153_s26 + $0x68] sm:$0xff]  ;;  %v116_v58 = vld [vmem:[%s7152_s28 + $0x78] sm:$0xff]  ;;  %v5256_v59 = vld [vmem:[%s7153_s26 + $0x60] sm:$0xff] }
  0x13   :  { %76 = vst.msk [vmem:[#allocation2 + $0x78] sm:$0x3] %vm61_vm1, %v4885_v1  ;;  %1051 = vmatpush.bf16.msra.mxu0 %v4445_v50  ;;  %4496 = vmatpush.bf16.msra.mxu3 %v4445_v50  ;;  %v4442_v60 = vld [vmem:[%s7153_s26 + $0x18] sm:$0xff]  ;;  %v4441_v0 = vld [vmem:[%s7153_s26 + $0x10] sm:$0xff]  ;;  %v4456_v2 = vld [vmem:[%s7153_s26 + $0x88] sm:$0xff] }
  0x14   :  { %77 = vst.msk [vmem:[#allocation2 + $0x80] sm:$0xff] %vm59_vm0, %v4885_v1  ;;  %1100 = vmatpush.bf16.msra.mxu1 %v5221_v51  ;;  %v5270_v61 = vld [vmem:[%s7153_s26 + $0x58] sm:$0xff]  ;;  %1154 = vmatpush.bf16.msra.mxu2 %v4456_v2 }
  0x15   :  { %78 = vst.msk [vmem:[#allocation2 + $0x88] sm:$0x3] %vm61_vm1, %v4885_v1 }
  0x16   :  { %79 = vst.msk [vmem:[#allocation2 + $0x90] sm:$0xff] %vm59_vm0, %v4885_v1 }
  0x17   :  { %80 = vst.msk [vmem:[#allocation2 + $0x98] sm:$0x3] %vm61_vm1, %v4885_v1  ;;  %1052 = vmatpush.bf16.msra.mxu0 %v4444_v52  ;;  %4497 = vmatpush.bf16.msra.mxu3 %v4444_v52  ;;  %v111_v52 = vld [vmem:[%s7152_s28 + $0x50] sm:$0xff] }
  0x18   :  { %81 = vst.msk [vmem:[#allocation2 + $0xa0] sm:$0xff] %vm59_vm0, %v4885_v1  ;;  %1101 = vmatpush.bf16.msra.mxu1 %v5233_v53 }
  0x19   :  { %82 = vst.msk [vmem:[#allocation2 + $0xa8] sm:$0x3] %vm61_vm1, %v4885_v1 }
  0x1a   :  { %83 = vst.msk [vmem:[#allocation2 + $0xb0] sm:$0xff] %vm59_vm0, %v4885_v1 }
  0x1b   :  { %84 = vst.msk [vmem:[#allocation2 + $0xb8] sm:$0x3] %vm61_vm1, %v4885_v1  ;;  %1053 = vmatpush.bf16.msra.mxu0 %v4443_v57  ;;  %4498 = vmatpush.bf16.msra.mxu3 %v4443_v57 }
  0x1c   :  { %85 = vst.msk [vmem:[#allocation2 + $0xc0] sm:$0xff] %vm59_vm0, %v4885_v1  ;;  %1102 = vmatpush.bf16.msra.mxu1 %v5256_v59 }
  0x1d   :  { %86 = vst.msk [vmem:[#allocation2 + $0xc8] sm:$0x3] %vm61_vm1, %v4885_v1 }
  0x1e   :  { %87 = vst.msk [vmem:[#allocation2 + $0xd0] sm:$0xff] %vm59_vm0, %v4885_v1 }
  0x1f   :  { %88 = vst.msk [vmem:[#allocation2 + $0xd8] sm:$0x3] %vm61_vm1, %v4885_v1  ;;  %1054 = vmatpush.bf16.msra.mxu0 %v4442_v60  ;;  %4499 = vmatpush.bf16.msra.mxu3 %v4442_v60 }
  0x20   :  { %89 = vst.msk [vmem:[#allocation2 + $0xe0] sm:$0xff] %vm59_vm0, %v4885_v1  ;;  %1103 = vmatpush.bf16.msra.mxu1 %v5270_v61 }
  0x21   :  { %90 = vst.msk [vmem:[#allocation2 + $0xe8] sm:$0x3] %vm61_vm1, %v4885_v1 }
  0x22   :  { %91 = vst.msk [vmem:[#allocation2 + $0xf0] sm:$0xff] %vm59_vm0, %v4885_v1 }
  0x23   :  { %92 = vst.msk [vmem:[#allocation2 + $0xf8] sm:$0x3] %vm61_vm1, %v4885_v1  ;;  %1055 = vmatpush.bf16.msra.mxu0 %v4441_v0  ;;  %4500 = vmatpush.bf16.msra.mxu3 %v4441_v0 }
  0x24   :  { %93 = vst.msk [vmem:[#allocation2 + $0x100] sm:$0xff] %vm59_vm0, %v4885_v1 }
  0x25   :  { %94 = vst.msk [vmem:[#allocation2 + $0x108] sm:$0x3] %vm61_vm1, %v4885_v1 }
  0x26   :  { %95 = vst.msk [vmem:[#allocation2 + $0x110] sm:$0xff] %vm59_vm0, %v4885_v1 }
  0x27   :  { %96 = vst.msk [vmem:[#allocation2 + $0x118] sm:$0x3] %vm61_vm1, %v4885_v1 }
  0x28   :  { %97 = vst.msk [vmem:[#allocation2 + $0x120] sm:$0xff] %vm59_vm0, %v4885_v1 }
  0x29   :  { %98 = vst.msk [vmem:[#allocation2 + $0x128] sm:$0x3] %vm61_vm1, %v4885_v1 }
  0x2a   :  { %99 = vst.msk [vmem:[#allocation2 + $0x130] sm:$0xff] %vm59_vm0, %v4885_v1 }
  0x2b   :  { %100 = vst.msk [vmem:[#allocation2 + $0x138] sm:$0x3] %vm61_vm1, %v4885_v1  ;;  %v5283_v1 = vld [vmem:[%s7153_s26 + $0x50] sm:$0xff] }
  0x2c   :  { %155 = vst.msk [vmem:[#allocation2 + $0x21] sm:$0xff] %vm59_vm0, %v102_v3  ;;  %1104 = vmatpush.bf16.msra.mxu1 %v5283_v1 }
  0x2d   :  { %154 = vst.msk [vmem:[#allocation2 + $0x11] sm:$0xff] %vm59_vm0, %v101_v4 }
  0x2e   :  { %156 = vst.msk [vmem:[#allocation2 + $0x31] sm:$0xff] %vm59_vm0, %v103_v5  ;;  %v4440_v5 = vld [vmem:[%s7153_s26 + $0x8] sm:$0xff] }
  0x2f   :  { %157 = vst.msk [vmem:[#allocation2 + $0x41] sm:$0xff] %vm59_vm0, %v104_v6  ;;  %v5300_v6 = vld [vmem:[%s7153_s26 + $0x48] sm:$0xff]  ;;  %1056 = vmatpush.bf16.msra.mxu0 %v4440_v5  ;;  %4501 = vmatpush.bf16.msra.mxu3 %v4440_v5 }
  0x30   :  { %158 = vst.msk [vmem:[#allocation2 + $0x51] sm:$0xff] %vm59_vm0, %v105_v20  ;;  %1105 = vmatpush.bf16.msra.mxu1 %v5300_v6 }
  0x31   :  { %165 = vst.msk [vmem:[#allocation2 + $0xe1] sm:$0xff] %vm59_vm0, %v112_v21 }
  0x32   :  { %166 = vst.msk [vmem:[#allocation2 + $0xf1] sm:$0xff] %vm59_vm0, %v113_v23 }
  0x33   :  { %v204_v7 = vld [vmem:[#allocation2 + $0x21] sm:$0xff]  ;;  %167 = vst.msk [vmem:[#allocation2 + $0x101] sm:$0xff] %vm59_vm0, %v114_v26 }
  0x34   :  { %v622_v8 = vld [vmem:[#allocation2 + $0x20] sm:$0xff]  ;;  %238 = vrot.lane.b32.xlu1 %v204_v7, %s4886_s12  ;;  %v203_v9 = vld [vmem:[#allocation2 + $0x11] sm:$0xff]  ;;  %510 = vst.msk [vmem:[#allocation3 + $0x20] sm:$0xff] %vm59_vm0, %v204_v7 }
  0x35   :  { %188 = vst.msk [vmem:[#allocation3 + $0x30] sm:$0xff] %vm59_vm0, %v622_v8  ;;  %236 = vrot.lane.b32.xlu0 %v203_v9, %s4886_s12  ;;  %v623_v10 = vld [vmem:[#allocation2 + $0x30] sm:$0xff]  ;;  %v526_v12 = vld [vmem:[#allocation2 + $0x22] sm:$0xff] }
  0x36   :  { %509 = vst.msk [vmem:[#allocation3 + $0x8] sm:$0xff] %vm59_vm0, %v203_v9  ;;  %v5051_v11 = vld [vmem:[#allocation2 + $0x41] sm:$0xff]  ;;  %v527_v13 = vld [vmem:[#allocation2 + $0x32] sm:$0xff] }
  0x37   :  { %189 = vst.msk [vmem:[#allocation3 + $0x48] sm:$0xff] %vm59_vm0, %v623_v10  ;;  %242 = vrot.lane.b32.xlu2 %v5051_v11, %s4886_s12  ;;  %v205_v14 = vld [vmem:[#allocation2 + $0x31] sm:$0xff]  ;;  %v5060_v15 = vld [vmem:[#allocation2 + $0x42] sm:$0xff] }
  0x38   :  { %830 = vst.msk [vmem:[#allocation3 + $0x10] sm:$0xff] %vm59_vm0, %v526_v12  ;;  %v525_v16 = vld [vmem:[#allocation2 + $0x12] sm:$0xff]  ;;  %v624_v17 = vld [vmem:[#allocation2 + $0x40] sm:$0xff] }
  0x39   :  { %831 = vst.msk [vmem:[#allocation3 + $0x28] sm:$0xff] %vm59_vm0, %v527_v13  ;;  %v396_v18 = vld [vmem:[#allocation2 + $0x10] sm:$0xff]  ;;  %v5090_v24 = vld [vmem:[#allocation2 + $0xe2] sm:$0xff] }
  0x3a   :  { %511 = vst.msk [vmem:[#allocation3 + $0x38] sm:$0xff] %vm59_vm0, %v205_v14  ;;  %v721_v22 = vld [vmem:[#allocation2 + $0x51] sm:$0xff]  ;;  %v5116_v29 = vld [vmem:[#allocation2 + $0x100] sm:$0xff] }
  0x3b   :  { %512 = vst.msk [vmem:[#allocation3 + $0x50] sm:$0xff] %vm59_vm0, %v5051_v11  ;;  %v5094_v25 = vld [vmem:[#allocation2 + $0x50] sm:$0xff]  ;;  %v5146_v35 = vld [vmem:[#allocation2 + $0xe1] sm:$0xff] }
  0x3c   :  { %240 = vrot.lane.b32.xlu1 %v205_v14, %s4886_s12  ;;  %832 = vst.msk [vmem:[#allocation3 + $0x40] sm:$0xff] %vm59_vm0, %v5060_v15  ;;  %v5104_v27 = vld [vmem:[#allocation2 + $0xf2] sm:$0xff]  ;;  %v5168_v40 = vld [vmem:[#allocation2 + $0x101] sm:$0xff] }
  0x3d   :  { %559 = vrot.lane.b32.xlu0 %v526_v12, %s4886_s12  ;;  %190 = vst.msk [vmem:[#allocation3 + $0x60] sm:$0xff] %vm59_vm0, %v624_v17  ;;  %v5123_v30 = vld [vmem:[#allocation2 + $0xf1] sm:$0xff]  ;;  %v5235_v54 = vld [vmem:[#allocation2 + $0x102] sm:$0xff] }
  0x3e   :  { %187 = vst.msk [vmem:[#allocation3 + $0x18] sm:$0xff] %vm59_vm0, %v396_v18  ;;  %v5139_v34 = vld [vmem:[#allocation2 + $0xf0] sm:$0xff] }
  0x3f   :  { %557 = vrot.lane.b32.xlu2 %v525_v16, %s4886_s12  ;;  %513 = vst.msk [vmem:[#allocation3 + $0x68] sm:$0xff] %vm59_vm0, %v721_v22  ;;  %v529_v37 = vld [vmem:[#allocation2 + $0x52] sm:$0xff] }
  0x40   :  { %840 = vst.msk [vmem:[#allocation3 + $0x100] sm:$0xff] %vm59_vm0, %v5090_v24 }
  0x41   :  { %191 = vst.msk [vmem:[#allocation3 + $0x78] sm:$0xff] %vm59_vm0, %v5094_v25 }
  0x42   :  { %841 = vst.msk [vmem:[#allocation3 + $0x118] sm:$0xff] %vm59_vm0, %v5104_v27 }
  0x43   :  { %159 = vst.msk [vmem:[#allocation2 + $0x61] sm:$0xff] %vm59_vm0, %v106_v28 }
  0x44   :  { %331 = vrot.lane.b32.xlu1 %v299_v19, %s4887_s20  ;;  %200 = vst.msk [vmem:[#allocation3 + $0x150] sm:$0xff] %vm59_vm0, %v5116_v29 }
  0x45   :  { %654 = vrot.lane.b32.xlu0 %v622_v8, %s4887_s20  ;;  %521 = vst.msk [vmem:[#allocation3 + $0x128] sm:$0xff] %vm59_vm0, %v5123_v30 }
  0x46   :  { %160 = vst.msk [vmem:[#allocation2 + $0x71] sm:$0xff] %vm59_vm0, %v107_v32  ;;  %v629_v32 = vld [vmem:[#allocation2 + $0x90] sm:$0xff] }
  0x47   :  { %333 = vrot.lane.b32.xlu2 %v525_v16, %s4887_s20  ;;  %199 = vst.msk [vmem:[#allocation3 + $0x138] sm:$0xff] %vm59_vm0, %v5139_v34  ;;  %v5323_v16 = vld [vmem:[%s7153_s26 + $0x40] sm:$0xff] }
  0x48   :  { %833 = vst.msk [vmem:[#allocation3 + $0x58] sm:$0xff] %vm59_vm0, %v529_v37  ;;  %1106 = vmatpush.bf16.msra.mxu1 %v5323_v16 }
  0x49   :  { %168 = vst.msk [vmem:[#allocation2 + $0x111] sm:$0xff] %vm59_vm0, %v115_v39 }
  0x4a   :  { %v5129_v31 = vld [vmem:[#allocation2 + $0x62] sm:$0xff]  ;;  %522 = vst.msk [vmem:[#allocation3 + $0x140] sm:$0xff] %vm59_vm0, %v5168_v40 }
  0x4b   :  { %834 = vst.msk [vmem:[#allocation3 + $0x70] sm:$0xff] %vm59_vm0, %v5129_v31  ;;  %v626_v33 = vld [vmem:[#allocation2 + $0x60] sm:$0xff] }
  0x4c   :  { %656 = vrot.lane.b32.xlu1 %v623_v10, %s4887_s20  ;;  %192 = vst.msk [vmem:[#allocation3 + $0x90] sm:$0xff] %vm59_vm0, %v626_v33  ;;  %v5156_v38 = vld [vmem:[#allocation2 + $0x61] sm:$0xff] }
  0x4d   :  { %430 = vrot.lane.b32.xlu0 %v622_v8, %s4888_s25  ;;  %v5148_v36 = vld [vmem:[#allocation2 + $0x70] sm:$0xff]  ;;  %514 = vst.msk [vmem:[#allocation3 + $0x80] sm:$0xff] %vm59_vm0, %v5156_v38 }
  0x4e   :  { %193 = vst.msk [vmem:[#allocation3 + $0xa8] sm:$0xff] %vm59_vm0, %v5148_v36  ;;  %v5203_v47 = vld [vmem:[#allocation2 + $0x71] sm:$0xff] }
  0x4f   :  { %428 = vrot.lane.b32.xlu2 %v396_v18, %s4888_s25  ;;  %186 = vst.msk [vmem:[#allocation3] sm:$0xff] %vm59_vm0, %v170_v42  ;;  %v531_v9 = vld [vmem:[#allocation2 + $0x72] sm:$0xff] }
  0x50   :  { %v5183_v43 = vld [vmem:[#allocation2 + $0x110] sm:$0xff]  ;;  %515 = vst.msk [vmem:[#allocation3 + $0x98] sm:$0xff] %vm59_vm0, %v5203_v47 }
  0x51   :  { %v5185_v44 = vld [vmem:[#allocation2 + $0x112] sm:$0xff]  ;;  %201 = vst.msk [vmem:[#allocation3 + $0x168] sm:$0xff] %vm59_vm0, %v5183_v43 }
  0x52   :  { %843 = vst.msk [vmem:[#allocation3 + $0x148] sm:$0xff] %vm59_vm0, %v5185_v44  ;;  %v5272_v62 = vld [vmem:[#allocation2 + $0x111] sm:$0xff] }
  0x53   :  { %161 = vst.msk [vmem:[#allocation2 + $0x81] sm:$0xff] %vm59_vm0, %v108_v49  ;;  %v857_v49 = vld [vmem:[#allocation3 + $0x58] sm:$0xff] }
  0x54   :  { %750 = vrot.lane.b32.xlu1 %v204_v7, %s4888_s25  ;;  %842 = vst.msk [vmem:[#allocation3 + $0x130] sm:$0xff] %vm59_vm0, %v5235_v54  ;;  %v4455_v7 = vld [vmem:[%s7153_s26 + $0x80] sm:$0xff] }
  0x55   :  { %561 = vrot.lane.b32.xlu0 %v527_v13, %s4886_s12  ;;  %169 = vst.msk [vmem:[#allocation2 + $0x121] sm:$0xff] %vm59_vm0, %v116_v58  ;;  %1155 = vmatpush.bf16.msra.mxu2 %v4455_v7 }
  0x56   :  { %835 = vst.msk [vmem:[#allocation3 + $0x88] sm:$0xff] %vm59_vm0, %v531_v9 }
  0x57   :  { %752 = vrot.lane.b32.xlu2 %v205_v14, %s4888_s25  ;;  %164 = vst.msk [vmem:[#allocation2 + $0xd1] sm:$0xff] %vm59_vm0, %v111_v52  ;;  %v733_v52 = vld [vmem:[#allocation2 + $0x131] sm:$0xff] }
  0x5a   :  { %v5241_v56 = vld [vmem:[#allocation2 + $0x82] sm:$0xff] }
  0x5b   :  { %836 = vst.msk [vmem:[#allocation3 + $0xa0] sm:$0xff] %vm59_vm0, %v5241_v56  ;;  %v628_v23 = vld [vmem:[#allocation2 + $0x80] sm:$0xff] }
  0x5c   :  { %563 = vrot.lane.b32.xlu1 %v5060_v15, %s4886_s12  ;;  %v5425_v2 = vld [vmem:[#allocation2 + $0x122] sm:$0xff] }
  0x5d   :  { %337 = vrot.lane.b32.xlu0 %v527_v13, %s4887_s20  ;;  %v4439_v13 = vld [vmem:[%s7153_s26] sm:$0xff]  ;;  %844 = vst.msk [vmem:[#allocation3 + $0x160] sm:$0xff] %vm59_vm0, %v5425_v2 }
  0x5e   :  { %1057 = vmatpush.bf16.msra.mxu0 %v4439_v13  ;;  %4502 = vmatpush.bf16.msra.mxu3 %v4439_v13 }
  0x5f   :  { %335 = vrot.lane.b32.xlu2 %v526_v12, %s4887_s20  ;;  %v851_v12 = vld [vmem:[#allocation3 + $0x28] sm:$0xff] }
  0x62   :  { %4503 = vmatpush.bf16.msrb.mxu3 %v5201_v46 }
  0x64   :  { %658 = vrot.lane.b32.xlu1 %v624_v17, %s4887_s20 }
  0x65   :  { %432 = vrot.lane.b32.xlu0 %v623_v10, %s4888_s25  ;;  %v5308_v10 = vld [vmem:[#allocation2 + $0x81] sm:$0xff] }
  0x66   :  { %516 = vst.msk [vmem:[#allocation3 + $0xb0] sm:$0xff] %vm59_vm0, %v5308_v10  ;;  %4504 = vmatpush.bf16.msrb.mxu3 %v5221_v51 }
  0x67   :  { %660 = vrot.lane.b32.xlu2 %v5094_v25, %s4887_s20 }
  0x6a   :  { %4505 = vmatpush.bf16.msrb.mxu3 %v5233_v53  ;;  %v725_v53 = vld [vmem:[#allocation2 + $0x91] sm:$0xff] }
  0x6c   :  { %434 = vrot.lane.b32.xlu1 %v624_v17, %s4888_s25 }
  0x6d   :  { %756 = vrot.lane.b32.xlu0 %v721_v22, %s4888_s25 }
  0x6e   :  { %4506 = vmatpush.bf16.msrb.mxu3 %v5256_v59 }
  0x6f   :  { %754 = vrot.lane.b32.xlu2 %v5051_v11, %s4888_s25  ;;  %v848_v11 = vld [vmem:[#allocation3 + $0x10] sm:$0xff] }
  0x70   :  { %v896_v14 = vpack.c.bf16 %v851_v12, %v848_v11  ;;  %v307_v11 = vld [vmem:[#allocation2 + $0xa2] sm:$0xff] }
  0x72   :  { %4248 = vmatmul.msk.bf16.vlgmr.msra.gmra.mxu2 %vm59_vm0, %v896_v14  ;;  %4507 = vmatpush.bf16.msrb.mxu3 %v5270_v61  ;;  %v732_v14 = vld [vmem:[#allocation2 + $0x121] sm:$0xff] }
  0x73   :  { %524 = vst.msk [vmem:[#allocation3 + $0x170] sm:$0xff] %vm59_vm0, %v732_v14 }
  0x74   :  { %258 = vrot.lane.b32.xlu1 %v5146_v35, %s4886_s12 }
  0x75   :  { %355 = vrot.lane.b32.xlu0 %v5090_v24, %s4887_s20 }
  0x76   :  { %4508 = vmatpush.bf16.msrb.mxu3 %v5283_v1 }
  0x77   :  { %260 = vrot.lane.b32.xlu2 %v5123_v30, %s4886_s12 }
  0x7a   :  { %4509 = vmatpush.bf16.msrb.mxu3 %v5300_v6 }
  0x7c   :  { %357 = vrot.lane.b32.xlu1 %v5104_v27, %s4887_s20 }
  0x7d   :  { %454 = vrot.lane.b32.xlu0 %v5116_v29, %s4888_s25 }
  0x7e   :  { %4510 = vmatpush.bf16.msrb.mxu3 %v5323_v16 }
  0x7f   :  { %452 = vrot.lane.b32.xlu2 %v5139_v34, %s4888_s25  ;;  %v235_v41 = vpop.permute.xlu0 %234 }
  0x80   :  { %283 = vst.msk [vmem:[#allocation3] sm:$0xff] %vm282_vm2, %v235_v41 }
  0x84   :  { %244 = vrot.lane.b32.xlu1 %v721_v22, %s4886_s12 }
  0x85   :  { %567 = vrot.lane.b32.xlu0 %v5129_v31, %s4886_s12 }
  0x87   :  { %565 = vrot.lane.b32.xlu2 %v529_v37, %s4886_s12 }
  0x8c   :  { %339 = vrot.lane.b32.xlu1 %v5060_v15, %s4887_s20  ;;  %v5318_v15 = vld [vmem:[#allocation2 + $0x120] sm:$0xff] }
  0x8d   :  { %662 = vrot.lane.b32.xlu0 %v626_v33, %s4887_s20 }
  0x8f   :  { %341 = vrot.lane.b32.xlu2 %v529_v37, %s4887_s20 }
  0x91   :  { %v243_v48 = vpop.permute.xlu2 %242 }
  0x92   :  { %287 = vst.msk [vmem:[#allocation3 + $0x60] sm:$0xff] %vm282_vm2, %v243_v48  ;;  %v854_v48 = vld [vmem:[#allocation3 + $0x40] sm:$0xff] }
  0x93   :  { %v899_v51 = vpack.c.bf16 %v857_v49, %v854_v48  ;;  %v535_v49 = vld [vmem:[#allocation2 + $0xd2] sm:$0xff] }
  0x94   :  { %664 = vrot.lane.b32.xlu1 %v5148_v36, %s4887_s20  ;;  %839 = vst.msk [vmem:[#allocation3 + $0xe8] sm:$0xff] %vm59_vm0, %v535_v49 }
  0x95   :  { %438 = vrot.lane.b32.xlu0 %v626_v33, %s4888_s25  ;;  %v110_v33 = vld [vmem:[%s7152_s28 + $0x48] sm:$0xff]  ;;  %4249 = vmatmul.msk.bf16.gmra.mxu2 %vm59_vm0, %v899_v51 }
  0x96   :  { %163 = vst.msk [vmem:[#allocation2 + $0xc1] sm:$0xff] %vm59_vm0, %v110_v33 }
  0x97   :  { %436 = vrot.lane.b32.xlu2 %v5094_v25, %s4888_s25  ;;  %v109_v25 = vld [vmem:[%s7152_s28 + $0x40] sm:$0xff] }
  0x98   :  { %162 = vst.msk [vmem:[#allocation2 + $0xb1] sm:$0xff] %vm59_vm0, %v109_v25 }
  0x99   :  { %v558_v55 = vpop.permute.xlu2 %557 }
  0x9a   :  { %605 = vst.msk [vmem:[#allocation3 + $0x8] sm:$0xff] %vm282_vm2, %v558_v55 }
  0x9c   :  { %758 = vrot.lane.b32.xlu1 %v5156_v38, %s4888_s25 }
  0x9d   :  { %262 = vrot.lane.b32.xlu0 %v5168_v40, %s4886_s12  ;;  %v5378_v50 = vld [vmem:[#allocation2 + $0xc2] sm:$0xff] }
  0x9e   :  { %838 = vst.msk [vmem:[#allocation3 + $0xd0] sm:$0xff] %vm59_vm0, %v5378_v50  ;;  %v5397_v60 = vld [vmem:[#allocation2 + $0xc0] sm:$0xff] }
  0x9f   :  { %760 = vrot.lane.b32.xlu2 %v5203_v47, %s4888_s25  ;;  %v5361_v37 = vld [vmem:[#allocation2 + $0xb1] sm:$0xff]  ;;  %196 = vst.msk [vmem:[#allocation3 + $0xf0] sm:$0xff] %vm59_vm0, %v5397_v60  ;;  %v5414_v1 = vld [vmem:[#allocation2 + $0xc1] sm:$0xff] }
  0xa0   :  { %517 = vst.msk [vmem:[#allocation3 + $0xc8] sm:$0xff] %vm59_vm0, %v5361_v37  ;;  %v404_v13 = vld [vmem:[#allocation2 + $0xb0] sm:$0xff] }
  0xa1   :  { %v334_v63 = vpop.permute.xlu2 %333  ;;  %518 = vst.msk [vmem:[#allocation3 + $0xe0] sm:$0xff] %vm59_vm0, %v5414_v1 }
  0xa2   :  { %195 = vst.msk [vmem:[#allocation3 + $0xd8] sm:$0xff] %vm59_vm0, %v404_v13 }
  0xa4   :  { %264 = vrot.lane.b32.xlu1 %v5272_v62, %s4886_s12 }
  0xa5   :  { %361 = vrot.lane.b32.xlu0 %v5185_v44, %s4887_s20 }
  0xa6   :  { %v239_v3 = vpop.permute.xlu1 %238 }
  0xa7   :  { %285 = vst.msk [vmem:[#allocation3 + $0x30] sm:$0xff] %vm282_vm2, %v239_v3  ;;  %v237_v4 = vpop.permute.xlu0 %236  ;;  %359 = vrot.lane.b32.xlu2 %v5235_v54, %s4887_s20 }
  0xa8   :  { %284 = vst.msk [vmem:[#allocation3 + $0x18] sm:$0xff] %vm282_vm2, %v237_v4  ;;  %v533_v4 = vld [vmem:[#allocation2 + $0xb2] sm:$0xff] }
  0xa9   :  { %381 = vst.msk [vmem:[#allocation3 + $0x18] sm:$0xff] %vm379_vm3, %v334_v63  ;;  %v429_v8 = vpop.permute.xlu2 %428 }
  0xac   :  { %456 = vrot.lane.b32.xlu1 %v5183_v43, %s4888_s25 }
  0xad   :  { %246 = vrot.lane.b32.xlu0 %v5156_v38, %s4886_s12  ;;  %v5365_v38 = vld [vmem:[#allocation2 + $0xe0] sm:$0xff] }
  0xae   :  { %v241_v17 = vpop.permute.xlu1 %240  ;;  %198 = vst.msk [vmem:[#allocation3 + $0x120] sm:$0xff] %vm59_vm0, %v5365_v38 }
  0xaf   :  { %286 = vst.msk [vmem:[#allocation3 + $0x48] sm:$0xff] %vm282_vm2, %v241_v17  ;;  %v560_v18 = vpop.permute.xlu0 %559  ;;  %458 = vrot.lane.b32.xlu2 %v5318_v15, %s4888_s25 }
  0xb0   :  { %606 = vst.msk [vmem:[#allocation3 + $0x20] sm:$0xff] %vm282_vm2, %v560_v18  ;;  %v727_v18 = vld [vmem:[#allocation2 + $0xd1] sm:$0xff] }
  0xb1   :  { %v753_v19 = vpop.permute.xlu2 %752  ;;  %519 = vst.msk [vmem:[#allocation3 + $0xf8] sm:$0xff] %vm59_vm0, %v727_v18 }
  0xb4   :  { %248 = vrot.lane.b32.xlu1 %v5203_v47, %s4886_s12 }
  0xb5   :  { %571 = vrot.lane.b32.xlu0 %v5241_v56, %s4886_s12 }
  0xb6   :  { %v332_v20 = vpop.permute.xlu1 %331 }
  0xb7   :  { %380 = vst.msk [vmem:[#allocation3] sm:$0xff] %vm379_vm3, %v332_v20  ;;  %v655_v21 = vpop.permute.xlu0 %654  ;;  %569 = vrot.lane.b32.xlu2 %v531_v9, %s4886_s12  ;;  %v860_v20 = vld [vmem:[#allocation3 + $0x70] sm:$0xff] }
  0xb8   :  { %702 = vst.msk [vmem:[#allocation3 + $0x8] sm:$0xff] %vm379_vm3, %v655_v21  ;;  %v863_v21 = vld [vmem:[#allocation3 + $0x88] sm:$0xff] }
  0xb9   :  { %477 = vst.msk [vmem:[#allocation3] sm:$0xff] %vm476_vm4, %v429_v8  ;;  %v336_v22 = vpop.permute.xlu2 %335 }
  0xba   :  { %382 = vst.msk [vmem:[#allocation3 + $0x30] sm:$0xff] %vm379_vm3, %v336_v22  ;;  %v902_v22 = vpack.c.bf16 %v863_v21, %v860_v20 }
  0xbc   :  { %343 = vrot.lane.b32.xlu1 %v5129_v31, %s4887_s20  ;;  %4250 = vmatmul.msk.bf16.gmra.mxu2 %vm59_vm0, %v902_v22 }
  0xbd   :  { %666 = vrot.lane.b32.xlu0 %v628_v23, %s4887_s20 }
  0xbe   :  { %v657_v26 = vpop.permute.xlu1 %656 }
  0xbf   :  { %703 = vst.msk [vmem:[#allocation3 + $0x20] sm:$0xff] %vm379_vm3, %v657_v26  ;;  %v431_v28 = vpop.permute.xlu0 %430  ;;  %345 = vrot.lane.b32.xlu2 %v531_v9, %s4887_s20 }
  0xc0   :  { %478 = vst.msk [vmem:[#allocation3 + $0x18] sm:$0xff] %vm476_vm4, %v431_v28  ;;  %v846_v42 = vld [vmem:[#allocation3] sm:$0xff] }
  0xc1   :  { %799 = vst.msk [vmem:[#allocation3 + $0x20] sm:$0xff] %vm476_vm4, %v753_v19  ;;  %v661_v31 = vpop.permute.xlu2 %660 }
  0xc4   :  { %668 = vrot.lane.b32.xlu1 %v629_v32, %s4887_s20 }
  0xc5   :  { %442 = vrot.lane.b32.xlu0 %v628_v23, %s4888_s25 }
  0xc6   :  { %v751_v39 = vpop.permute.xlu1 %750 }
  0xc7   :  { %798 = vst.msk [vmem:[#allocation3 + $0x8] sm:$0xff] %vm476_vm4, %v751_v39  ;;  %v562_v41 = vpop.permute.xlu0 %561  ;;  %v849_v45 = vld [vmem:[#allocation3 + $0x18] sm:$0xff]  ;;  %440 = vrot.lane.b32.xlu2 %v5148_v36, %s4888_s25 }
  0xc8   :  { %607 = vst.msk [vmem:[#allocation3 + $0x38] sm:$0xff] %vm282_vm2, %v562_v41  ;;  %v894_v46 = vpack.c.bf16 %v849_v45, %v846_v42  ;;  %v850_v36 = vld [vmem:[#allocation3 + $0x20] sm:$0xff]  ;;  %v821_v39 = vld [vmem:[#allocation2 + $0x92] sm:$0xff] }
  0xc9   :  { %v755_v47 = vpop.permute.xlu2 %754  ;;  %v637_v42 = vld [vmem:[#allocation2 + $0x130] sm:$0xff]  ;;  %837 = vst.msk [vmem:[#allocation3 + $0xb8] sm:$0xff] %vm59_vm0, %v821_v39 }
  0xca   :  { %1058 = vmatmul.bf16.vlgmr.msra.gmra.mxu0 %v894_v46  ;;  %v866_v46 = vld [vmem:[#allocation3 + $0xa0] sm:$0xff] }
  0xcc   :  { %762 = vrot.lane.b32.xlu1 %v5308_v10, %s4888_s25 }
  0xcd   :  { %581 = vrot.lane.b32.xlu0 %v5104_v27, %s4886_s12  ;;  %v5399_v27 = vld [vmem:[#allocation2 + $0xd0] sm:$0xff] }
  0xce   :  { %v564_v55 = vpop.permute.xlu1 %563  ;;  %v847_v56 = vld [vmem:[#allocation3 + $0x8] sm:$0xff]  ;;  %197 = vst.msk [vmem:[#allocation3 + $0x108] sm:$0xff] %vm59_vm0, %v5399_v27 }
  0xcf   :  { %608 = vst.msk [vmem:[#allocation3 + $0x50] sm:$0xff] %vm282_vm2, %v564_v55  ;;  %v895_v57 = vpack.c.bf16 %v850_v36, %v847_v56  ;;  %v338_v58 = vpop.permute.xlu0 %337  ;;  %764 = vrot.lane.b32.xlu2 %v725_v53, %s4888_s25 }
  0xd0   :  { %383 = vst.msk [vmem:[#allocation3 + $0x48] sm:$0xff] %vm379_vm3, %v338_v58  ;;  %v869_v48 = vld [vmem:[#allocation3 + $0xb8] sm:$0xff] }
  0xd1   :  { %1107 = vmatmul.bf16.vlgmr.msra.gmra.mxu1 %v895_v57  ;;  %705 = vst.msk [vmem:[#allocation3 + $0x50] sm:$0xff] %vm379_vm3, %v661_v31  ;;  %v261_v59 = vpop.permute.xlu2 %260  ;;  %v905_v51 = vpack.c.bf16 %v869_v48, %v866_v46  ;;  %v5537_v46 = vld [vmem:[%s7133_s3] ss:$0 sm:$0xff] }
  0xd2   :  { %296 = vst.msk [vmem:[#allocation3 + $0x138] sm:$0xff] %vm282_vm2, %v261_v59 }
  0xd3   :  { %4251 = vmatmul.msk.bf16.gmra.mxu2 %vm59_vm0, %v905_v51 }
  0xd4   :  { %583 = vrot.lane.b32.xlu1 %v5235_v54, %s4886_s12  ;;  %v210_v54 = vld [vmem:[#allocation2 + $0xa1] sm:$0xff] }
  0xd5   :  { %680 = vrot.lane.b32.xlu0 %v5183_v43, %s4887_s20 }
  0xd6   :  { %v659_v61 = vpop.permute.xlu1 %658 }
  0xd7   :  { %704 = vst.msk [vmem:[#allocation3 + $0x38] sm:$0xff] %vm379_vm3, %v659_v61  ;;  %v433_v63 = vpop.permute.xlu0 %432  ;;  %678 = vrot.lane.b32.xlu2 %v5116_v29, %s4887_s20 }
  0xd8   :  { %479 = vst.msk [vmem:[#allocation3 + $0x30] sm:$0xff] %vm476_vm4, %v433_v63 }
  0xd9   :  { %800 = vst.msk [vmem:[#allocation3 + $0x38] sm:$0xff] %vm476_vm4, %v755_v47  ;;  %v453_v0 = vpop.permute.xlu2 %452 }
  0xdc   :  { %774 = vrot.lane.b32.xlu1 %v5168_v40, %s4888_s25 }
  0xdd   :  { %250 = vrot.lane.b32.xlu0 %v210_v54, %s4886_s12 }
  0xde   :  { %v435_v43 = vpop.permute.xlu1 %434 }
  0xdf   :  { %480 = vst.msk [vmem:[#allocation3 + $0x48] sm:$0xff] %vm476_vm4, %v435_v43  ;;  %v757_v29 = vpop.permute.xlu0 %756  ;;  %776 = vrot.lane.b32.xlu2 %v5272_v62, %s4888_s25  ;;  %v852_v40 = vld [vmem:[#allocation3 + $0x30] sm:$0xff] }
  0xe0   :  { %801 = vst.msk [vmem:[#allocation3 + $0x50] sm:$0xff] %vm476_vm4, %v757_v29  ;;  %v853_v8 = vld [vmem:[#allocation3 + $0x38] sm:$0xff] }
  0xe1   :  { %v566_v3 = vpop.permute.xlu2 %565 }
  0xe2   :  { %609 = vst.msk [vmem:[#allocation3 + $0x68] sm:$0xff] %vm282_vm2, %v566_v3 }
  0xe4   :  { %252 = vrot.lane.b32.xlu1 %v5361_v37, %s4886_s12 }
  0xe5   :  { %575 = vrot.lane.b32.xlu0 %v5378_v50, %s4886_s12 }
  0xe6   :  { %v259_v5 = vpop.permute.xlu1 %258  ;;  %v855_v62 = vld [vmem:[#allocation3 + $0x48] sm:$0xff] }
  0xe7   :  { %295 = vst.msk [vmem:[#allocation3 + $0x120] sm:$0xff] %vm282_vm2, %v259_v5  ;;  %v897_v6 = vpack.c.bf16 %v855_v62, %v852_v40  ;;  %v356_v7 = vpop.permute.xlu0 %355  ;;  %v856_v9 = vld [vmem:[#allocation3 + $0x50] sm:$0xff]  ;;  %573 = vrot.lane.b32.xlu2 %v533_v4, %s4886_s12  ;;  %v878_v62 = vld [vmem:[#allocation3 + $0x100] sm:$0xff] }
  0xe8   :  { %392 = vst.msk [vmem:[#allocation3 + $0x120] sm:$0xff] %vm379_vm3, %v356_v7  ;;  %v898_v10 = vpack.c.bf16 %v856_v9, %v853_v8  ;;  %v178_v9 = vld [vmem:[#allocation2 + $0xa0] sm:$0xff] }
  0xe9   :  { %1063 = vmatmul.bf16.gmra.mxu0 %v897_v6  ;;  %489 = vst.msk [vmem:[#allocation3 + $0x120] sm:$0xff] %vm476_vm4, %v453_v0  ;;  %v342_v12 = vpop.permute.xlu2 %341  ;;  %v872_v0 = vld [vmem:[#allocation3 + $0xd0] sm:$0xff]  ;;  %v881_v6 = vld [vmem:[#allocation3 + $0x118] sm:$0xff] }
  0xea   :  { %1112 = vmatmul.bf16.gmra.mxu1 %v898_v10  ;;  %v911_v7 = vpack.c.bf16 %v881_v6, %v878_v62  ;;  %194 = vst.msk [vmem:[#allocation3 + $0xc0] sm:$0xff] %vm59_vm0, %v178_v9  ;;  %v890_v62 = vld [vmem:[#allocation3 + $0x160] sm:$0xff] }
  0xec   :  { %347 = vrot.lane.b32.xlu1 %v307_v11, %s4887_s20  ;;  %v884_v11 = vld [vmem:[#allocation3 + $0x130] sm:$0xff] }
  0xed   :  { %670 = vrot.lane.b32.xlu0 %v5397_v60, %s4887_s20 }
  0xee   :  { %v358_v16 = vpop.permute.xlu1 %357 }
  0xef   :  { %393 = vst.msk [vmem:[#allocation3 + $0x138] sm:$0xff] %vm379_vm3, %v358_v16  ;;  %v455_v17 = vpop.permute.xlu0 %454  ;;  %349 = vrot.lane.b32.xlu2 %v533_v4, %s4887_s20 }
  0xf0   :  { %490 = vst.msk [vmem:[#allocation3 + $0x138] sm:$0xff] %vm476_vm4, %v455_v17  ;;  %v882_v26 = vld [vmem:[#allocation3 + $0x120] sm:$0xff] }
  0xf1   :  { %v437_v19 = vpop.permute.xlu2 %436 }
  0xf4   :  { %672 = vrot.lane.b32.xlu1 %v5399_v27, %s4887_s20 }
  0xf5   :  { %446 = vrot.lane.b32.xlu0 %v5397_v60, %s4888_s25 }
  0xf6   :  { %v245_v23 = vpop.permute.xlu1 %244 }
  0xf7   :  { %288 = vst.msk [vmem:[#allocation3 + $0x78] sm:$0xff] %vm282_vm2, %v245_v23  ;;  %v568_v25 = vpop.permute.xlu0 %567  ;;  %v885_v28 = vld [vmem:[#allocation3 + $0x138] sm:$0xff]  ;;  %444 = vrot.lane.b32.xlu2 %v404_v13, %s4888_s25 }
  0xf8   :  { %610 = vst.msk [vmem:[#allocation3 + $0x80] sm:$0xff] %vm282_vm2, %v568_v25  ;;  %v912_v32 = vpack.c.bf16 %v885_v28, %v882_v26 }
  0xf9   :  { %385 = vst.msk [vmem:[#allocation3 + $0x78] sm:$0xff] %vm379_vm3, %v342_v12  ;;  %v761_v31 = vpop.permute.xlu2 %760  ;;  %v887_v12 = vld [vmem:[#allocation3 + $0x148] sm:$0xff] }
  0xfa   :  { %1088 = vmatmul.bf16.vlgmr.msra.gmra.mxu3 %v912_v32 }
  0xfc   :  { %766 = vrot.lane.b32.xlu1 %v5414_v1, %s4888_s25 }
  0xfd   :  { %585 = vrot.lane.b32.xlu0 %v5185_v44, %s4886_s12 }
  0xfe   :  { %v340_v33 = vpop.permute.xlu1 %339 }
  0xff   :  { %384 = vst.msk [vmem:[#allocation3 + $0x60] sm:$0xff] %vm379_vm3, %v340_v33  ;;  %v663_v37 = vpop.permute.xlu0 %662  ;;  %768 = vrot.lane.b32.xlu2 %v727_v18, %s4888_s25 }
 0x100   :  { %706 = vst.msk [vmem:[#allocation3 + $0x68] sm:$0xff] %vm379_vm3, %v663_v37 }
 0x101   :  { %481 = vst.msk [vmem:[#allocation3 + $0x60] sm:$0xff] %vm476_vm4, %v437_v19  ;;  %v360_v41 = vpop.permute.xlu2 %359 }
 0x104   :  { %587 = vrot.lane.b32.xlu1 %v5425_v2, %s4886_s12 }
 0x105   :  { %684 = vrot.lane.b32.xlu0 %v637_v42, %s4887_s20 }
 0x106   :  { %v665_v44 = vpop.permute.xlu1 %664 }
 0x107   :  { %707 = vst.msk [vmem:[#allocation3 + $0x80] sm:$0xff] %vm379_vm3, %v665_v44  ;;  %v439_v45 = vpop.permute.xlu0 %438  ;;  %682 = vrot.lane.b32.xlu2 %v5318_v15, %s4887_s20  ;;  %v507_v44 = vld [vmem:[#allocation2 + $0x111] sm:$0xff] }
 0x108   :  { %482 = vst.msk [vmem:[#allocation3 + $0x78] sm:$0xff] %vm476_vm4, %v439_v45  ;;  %v858_v53 = vld [vmem:[#allocation3 + $0x60] sm:$0xff] }
 0x109   :  { %803 = vst.msk [vmem:[#allocation3 + $0x80] sm:$0xff] %vm476_vm4, %v761_v31  ;;  %v459_v47 = vpop.permute.xlu2 %458  ;;  %v1157_v31 = vpop.f32.mrf.mxu2 }
 0x10a   :  { %523 = vst.msk [vmem:[#allocation3 + $0x158] sm:$0xff] %vm59_vm0, %v507_v44 }
 0x10c   :  { %778 = vrot.lane.b32.xlu1 %v732_v14, %s4888_s25 }
 0x10d   :  { %254 = vrot.lane.b32.xlu0 %v5414_v1, %s4886_s12  ;;  %v875_v1 = vld [vmem:[#allocation3 + $0xe8] sm:$0xff] }
 0x10e   :  { %v759_v15 = vpop.permute.xlu1 %758  ;;  %v908_v54 = vpack.c.bf16 %v875_v1, %v872_v0 }
 0x10f   :  { %802 = vst.msk [vmem:[#allocation3 + $0x68] sm:$0xff] %vm476_vm4, %v759_v15  ;;  %v263_v36 = vpop.permute.xlu0 %262  ;;  %v861_v55 = vld [vmem:[#allocation3 + $0x78] sm:$0xff]  ;;  %780 = vrot.lane.b32.xlu2 %v733_v52, %s4888_s25 }
 0x110   :  { %297 = vst.msk [vmem:[#allocation3 + $0x150] sm:$0xff] %vm282_vm2, %v263_v36  ;;  %v900_v56 = vpack.c.bf16 %v861_v55, %v858_v53  ;;  %v862_v58 = vld [vmem:[#allocation3 + $0x80] sm:$0xff]  ;;  %4252 = vmatmul.msk.bf16.gmra.mxu2 %vm59_vm0, %v908_v54 }
 0x111   :  { %394 = vst.msk [vmem:[#allocation3 + $0x150] sm:$0xff] %vm379_vm3, %v360_v41  ;;  %v570_v57 = vpop.permute.xlu2 %569  ;;  %v5531_v41 = vld [vmem:[%s7132_s2] ss:$0 sm:$0xff]  ;;  %v1159_v15 = vpop.f32.mrf.mxu2  ;;  %s5675_s2 = smov 0  }
 0x112   :  { %1068 = vmatmul.bf16.gmra.mxu0 %v900_v56  ;;  %611 = vst.msk [vmem:[#allocation3 + $0x98] sm:$0xff] %vm282_vm2, %v570_v57 }
 0x114   :  { %256 = vrot.lane.b32.xlu1 %v727_v18, %s4886_s12 }
 0x115   :  { %579 = vrot.lane.b32.xlu0 %v5090_v24, %s4886_s12 }
 0x116   :  { %v265_v59 = vpop.permute.xlu1 %264  ;;  %v859_v60 = vld [vmem:[#allocation3 + $0x68] sm:$0xff] }
 0x117   :  { %298 = vst.msk [vmem:[#allocation3 + $0x168] sm:$0xff] %vm282_vm2, %v265_v59  ;;  %v901_v61 = vpack.c.bf16 %v862_v58, %v859_v60  ;;  %v362_v63 = vpop.permute.xlu0 %361  ;;  %577 = vrot.lane.b32.xlu2 %v535_v49, %s4886_s12 }
 0x118   :  { %395 = vst.msk [vmem:[#allocation3 + $0x168] sm:$0xff] %vm379_vm3, %v362_v63 }
 0x119   :  { %1117 = vmatmul.bf16.gmra.mxu1 %v901_v61  ;;  %492 = vst.msk [vmem:[#allocation3 + $0x168] sm:$0xff] %vm476_vm4, %v459_v47  ;;  %v346_v43 = vpop.permute.xlu2 %345 }
 0x11c   :  { %351 = vrot.lane.b32.xlu1 %v5378_v50, %s4887_s20 }
 0x11d   :  { %674 = vrot.lane.b32.xlu0 %v5365_v38, %s4887_s20 }
 0x11e   :  { %v457_v24 = vpop.permute.xlu1 %456 }
 0x11f   :  { %491 = vst.msk [vmem:[#allocation3 + $0x150] sm:$0xff] %vm476_vm4, %v457_v24  ;;  %v247_v29 = vpop.permute.xlu0 %246  ;;  %353 = vrot.lane.b32.xlu2 %v535_v49, %s4887_s20  ;;  %v829_v24 = vld [vmem:[#allocation2 + $0x132] sm:$0xff] }
 0x120   :  { %289 = vst.msk [vmem:[#allocation3 + $0x90] sm:$0xff] %vm282_vm2, %v247_v29  ;;  %v891_v3 = vld [vmem:[#allocation3 + $0x168] sm:$0xff]  ;;  %4253 = vmatmul.msk.bf16.gmra.mxu2 %vm59_vm0, %v911_v7 }
 0x121   :  { %v441_v2 = vpop.permute.xlu2 %440  ;;  %845 = vst.msk [vmem:[#allocation3 + $0x178] sm:$0xff] %vm59_vm0, %v829_v24  ;;  %v504_v7 = vld [vmem:[#allocation2 + $0xe1] sm:$0xff] }
 0x122   :  { %520 = vst.msk [vmem:[#allocation3 + $0x110] sm:$0xff] %vm59_vm0, %v504_v7 }
 0x124   :  { %676 = vrot.lane.b32.xlu1 %v5139_v34, %s4887_s20 }
 0x125   :  { %450 = vrot.lane.b32.xlu0 %v5365_v38, %s4888_s25 }
 0x126   :  { %v249_v50 = vpop.permute.xlu1 %248  ;;  %v888_v40 = vld [vmem:[#allocation3 + $0x150] sm:$0xff] }
 0x127   :  { %290 = vst.msk [vmem:[#allocation3 + $0xa8] sm:$0xff] %vm282_vm2, %v249_v50  ;;  %v915_v4 = vpack.c.bf16 %v891_v3, %v888_v40  ;;  %v572_v5 = vpop.permute.xlu0 %571  ;;  %448 = vrot.lane.b32.xlu2 %v5399_v27, %s4888_s25 }
 0x128   :  { %612 = vst.msk [vmem:[#allocation3 + $0xb0] sm:$0xff] %vm282_vm2, %v572_v5 }
 0x129   :  { %1093 = vmatmul.bf16.gmra.mxu3 %v915_v4  ;;  %387 = vst.msk [vmem:[#allocation3 + $0xa8] sm:$0xff] %vm379_vm3, %v346_v43  ;;  %v765_v34 = vpop.permute.xlu2 %764 }
 0x12c   :  { %770 = vrot.lane.b32.xlu1 %v5146_v35, %s4888_s25 }
 0x12e   :  { %v344_v38 = vpop.permute.xlu1 %343 }
 0x12f   :  { %386 = vst.msk [vmem:[#allocation3 + $0x90] sm:$0xff] %vm379_vm3, %v344_v38  ;;  %v667_v8 = vpop.permute.xlu0 %666  ;;  %772 = vrot.lane.b32.xlu2 %v5123_v30, %s4888_s25  ;;  %v914_v30 = vpack.c.bf16 %v887_v12, %v884_v11 }
 0x130   :  { %708 = vst.msk [vmem:[#allocation3 + $0x98] sm:$0xff] %vm379_vm3, %v667_v8 }
 0x131   :  { %483 = vst.msk [vmem:[#allocation3 + $0x90] sm:$0xff] %vm476_vm4, %v441_v2  ;;  %v679_v27 = vpop.permute.xlu2 %678  ;;  %4254 = vmatmul.msk.bf16.gmra.mxu2 %vm59_vm0, %v914_v30  ;;  %v1162_v2 = vpop.f32.mrf.mxu2 }
 0x136   :  { %v669_v10 = vpop.permute.xlu1 %668 }
 0x137   :  { %709 = vst.msk [vmem:[#allocation3 + $0xb0] sm:$0xff] %vm379_vm3, %v669_v10  ;;  %v443_v35 = vpop.permute.xlu0 %442 }
 0x138   :  { %484 = vst.msk [vmem:[#allocation3 + $0xa8] sm:$0xff] %vm476_vm4, %v443_v35  ;;  %v864_v17 = vld [vmem:[#allocation3 + $0x90] sm:$0xff] }
 0x139   :  { %805 = vst.msk [vmem:[#allocation3 + $0xb0] sm:$0xff] %vm476_vm4, %v765_v34  ;;  %v777_v13 = vpop.permute.xlu2 %776  ;;  %v893_v34 = vld [vmem:[#allocation3 + $0x178] sm:$0xff]  ;;  %v1164_v9 = vpop.f32.mrf.mxu2 }
 0x13a   :  { %v917_v8 = vpack.c.bf16 %v893_v34, %v890_v62 }
 0x13e   :  { %v763_v14 = vpop.permute.xlu1 %762 }
 0x13f   :  { %804 = vst.msk [vmem:[#allocation3 + $0x98] sm:$0xff] %vm476_vm4, %v763_v14  ;;  %v582_v16 = vpop.permute.xlu0 %581  ;;  %v867_v18 = vld [vmem:[#allocation3 + $0xa8] sm:$0xff] }
 0x140   :  { %617 = vst.msk [vmem:[#allocation3 + $0x128] sm:$0xff] %vm282_vm2, %v582_v16  ;;  %v903_v19 = vpack.c.bf16 %v867_v18, %v864_v17  ;;  %v868_v21 = vld [vmem:[#allocation3 + $0xb0] sm:$0xff] }
 0x141   :  { %714 = vst.msk [vmem:[#allocation3 + $0x128] sm:$0xff] %vm379_vm3, %v679_v27  ;;  %v574_v20 = vpop.permute.xlu2 %573  ;;  %4255 = vmatmul.msk.bf16.gmra.mxu2 %vm59_vm0, %v917_v8 }
 0x142   :  { %1073 = vmatmul.bf16.gmra.mxu0 %v903_v19  ;;  %613 = vst.msk [vmem:[#allocation3 + $0xc8] sm:$0xff] %vm282_vm2, %v574_v20 }
 0x146   :  { %v584_v22 = vpop.permute.xlu1 %583  ;;  %v865_v23 = vld [vmem:[#allocation3 + $0x98] sm:$0xff] }
 0x147   :  { %618 = vst.msk [vmem:[#allocation3 + $0x140] sm:$0xff] %vm282_vm2, %v584_v22  ;;  %v904_v25 = vpack.c.bf16 %v868_v21, %v865_v23  ;;  %v681_v26 = vpop.permute.xlu0 %680  ;;  %v1059_v32 = vpop.f32.mrf.mxu0 }
 0x148   :  { %715 = vst.msk [vmem:[#allocation3 + $0x140] sm:$0xff] %vm379_vm3, %v681_v26 }
 0x149   :  { %1122 = vmatmul.bf16.gmra.mxu1 %v904_v25  ;;  %811 = vst.msk [vmem:[#allocation3 + $0x140] sm:$0xff] %vm476_vm4, %v777_v13  ;;  %v350_v28 = vpop.permute.xlu2 %349 }
 0x14e   :  { %v775_v33 = vpop.permute.xlu1 %774  ;;  %v1108_v37 = vpop.f32.mrf.mxu1 }
 0x14f   :  { %810 = vst.msk [vmem:[#allocation3 + $0x128] sm:$0xff] %vm476_vm4, %v775_v33  ;;  %v1109_v39 = vadd.f32 %v1108_v37, %v1059_v32  ;;  %v251_v42 = vpop.permute.xlu0 %250  ;;  %v1061_v49 = vpop.f32.mrf.mxu0 }
 0x150   :  { %291 = vst.msk [vmem:[#allocation3 + $0xc0] sm:$0xff] %vm282_vm2, %v251_v42  ;;  %v886_v51 = vld [vmem:[#allocation3 + $0x140] sm:$0xff] }
 0x151   :  { %v1158_v45 = vadd.f32 %v1157_v31, %v1109_v39  ;;  %v445_v47 = vpop.permute.xlu2 %444 }
 0x153   :  { %v1201_v48 = vmul.f32 %v5531_v41, %v1158_v45 }
 0x155   :  { %v5542_v52 = vadd.f32 %v5537_v46, %v1201_v48 }
 0x156   :  { %v253_v36 = vpop.permute.xlu1 %252  ;;  %v1110_v53 = vpop.f32.mrf.mxu1  ;;  %v883_v55 = vld [vmem:[#allocation3 + $0x128] sm:$0xff] }
 0x157   :  { %v1237_v56 = vmax.f32 %v5542_v52, 0.0   ;;  %292 = vst.msk [vmem:[#allocation3 + $0xd8] sm:$0xff] %vm282_vm2, %v253_v36  ;;  %v1111_v57 = vadd.f32 %v1110_v53, %v1061_v49  ;;  %v913_v58 = vpack.c.bf16 %v886_v51, %v883_v55  ;;  %v576_v59 = vpop.permute.xlu0 %575  ;;  %v1167_v51 = vpop.f32.mrf.mxu2 }
 0x158   :  { %614 = vst.msk [vmem:[#allocation3 + $0xe0] sm:$0xff] %vm282_vm2, %v576_v59 }
 0x159   :  { %v1160_v60 = vadd.f32 %v1159_v15, %v1111_v57  ;;  %1137 = vmatmul.bf16.vlgmr.msrb.gmra.mxu3 %v913_v58  ;;  %389 = vst.msk [vmem:[#allocation3 + $0xd8] sm:$0xff] %vm379_vm3, %v350_v28  ;;  %v769_v61 = vpop.permute.xlu2 %768 }
 0x15b   :  { %v1202_v63 = vmul.f32 %v5531_v41, %v1160_v60 }
 0x15d   :  { %v5550_v0 = vadd.f32 %v5537_v46, %v1202_v63 }
 0x15e   :  { %v348_v1 = vpop.permute.xlu1 %347 }
 0x15f   :  { %v1238_v54 = vmax.f32 %v5550_v0, 0.0   ;;  %388 = vst.msk [vmem:[#allocation3 + $0xc0] sm:$0xff] %vm379_vm3, %v348_v1  ;;  %v671_v43 = vpop.permute.xlu0 %670  ;;  %v1169_v57 = vpop.f32.mrf.mxu2 }
 0x160   :  { %710 = vst.msk [vmem:[#allocation3 + $0xc8] sm:$0xff] %vm379_vm3, %v671_v43 }
 0x161   :  { %485 = vst.msk [vmem:[#allocation3 + $0xc0] sm:$0xff] %vm476_vm4, %v445_v47  ;;  %v683_v29 = vpop.permute.xlu2 %682 }
 0x166   :  { %v673_v3 = vpop.permute.xlu1 %672  ;;  %v1064_v50 = vpop.f32.mrf.mxu0 }
 0x167   :  { %711 = vst.msk [vmem:[#allocation3 + $0xe0] sm:$0xff] %vm379_vm3, %v673_v3  ;;  %v1113_v40 = vpop.f32.mrf.mxu1  ;;  %v447_v4 = vpop.permute.xlu0 %446 }
 0x168   :  { %v1114_v5 = vadd.f32 %v1113_v40, %v1064_v50  ;;  %486 = vst.msk [vmem:[#allocation3 + $0xd8] sm:$0xff] %vm476_vm4, %v447_v4  ;;  %v870_v30 = vld [vmem:[#allocation3 + $0xc0] sm:$0xff] }
 0x169   :  { %807 = vst.msk [vmem:[#allocation3 + $0xe0] sm:$0xff] %vm476_vm4, %v769_v61  ;;  %v781_v6 = vpop.permute.xlu2 %780 }
 0x16a   :  { %v1163_v38 = vadd.f32 %v1162_v2, %v1114_v5 }
 0x16c   :  { %v1203_v27 = vmul.f32 %v5531_v41, %v1163_v38 }
 0x16e   :  { %v767_v10 = vpop.permute.xlu1 %766  ;;  %v1066_v35 = vpop.f32.mrf.mxu0  ;;  %v5564_v11 = vadd.f32 %v5537_v46, %v1203_v27 }
 0x16f   :  { %806 = vst.msk [vmem:[#allocation3 + $0xc8] sm:$0xff] %vm476_vm4, %v767_v10  ;;  %v1115_v12 = vpop.f32.mrf.mxu1  ;;  %v586_v13 = vpop.permute.xlu0 %585  ;;  %v873_v14 = vld [vmem:[#allocation3 + $0xd8] sm:$0xff] }
 0x170   :  { %v1239_v16 = vmax.f32 %v5564_v11, 0.0   ;;  %v1116_v17 = vadd.f32 %v1115_v12, %v1066_v35  ;;  %619 = vst.msk [vmem:[#allocation3 + $0x158] sm:$0xff] %vm282_vm2, %v586_v13  ;;  %v906_v18 = vpack.c.bf16 %v873_v14, %v870_v30  ;;  %v874_v22 = vld [vmem:[#allocation3 + $0xe0] sm:$0xff] }
 0x171   :  { %716 = vst.msk [vmem:[#allocation3 + $0x158] sm:$0xff] %vm379_vm3, %v683_v29  ;;  %v578_v19 = vpop.permute.xlu2 %577  ;;  %v1172_v29 = vpop.f32.mrf.mxu2 }
 0x172   :  { %v1165_v20 = vadd.f32 %v1164_v9, %v1116_v17  ;;  %1078 = vmatmul.bf16.gmra.mxu0 %v906_v18  ;;  %615 = vst.msk [vmem:[#allocation3 + $0xf8] sm:$0xff] %vm282_vm2, %v578_v19 }
 0x174   :  { %v1204_v21 = vmul.f32 %v5531_v41, %v1165_v20 }
 0x176   :  { %v588_v23 = vpop.permute.xlu1 %587  ;;  %v5573_v25 = vadd.f32 %v5537_v46, %v1204_v21  ;;  %v871_v26 = vld [vmem:[#allocation3 + $0xc8] sm:$0xff] }
 0x177   :  { %620 = vst.msk [vmem:[#allocation3 + $0x170] sm:$0xff] %vm282_vm2, %v588_v23  ;;  %v907_v28 = vpack.c.bf16 %v874_v22, %v871_v26  ;;  %v685_v32 = vpop.permute.xlu0 %684 }
 0x178   :  { %v1240_v31 = vmax.f32 %v5573_v25, 0.0   ;;  %717 = vst.msk [vmem:[#allocation3 + $0x170] sm:$0xff] %vm379_vm3, %v685_v32 }
 0x179   :  { %1127 = vmatmul.bf16.gmra.mxu1 %v907_v28  ;;  %813 = vst.msk [vmem:[#allocation3 + $0x170] sm:$0xff] %vm476_vm4, %v781_v6  ;;  %v354_v39 = vpop.permute.xlu2 %353  ;;  %v1174_v10 = vpop.f32.mrf.mxu2 }
 0x17d   :  { %v1089_v12 = vpop.f32.mrf.mxu3 }
 0x17e   :  { %v779_v33 = vpop.permute.xlu1 %778 }
 0x17f   :  { %812 = vst.msk [vmem:[#allocation3 + $0x158] sm:$0xff] %vm476_vm4, %v779_v33  ;;  %v255_v37 = vpop.permute.xlu0 %254 }
 0x180   :  { %293 = vst.msk [vmem:[#allocation3 + $0xf0] sm:$0xff] %vm282_vm2, %v255_v37  ;;  %v892_v42 = vld [vmem:[#allocation3 + $0x170] sm:$0xff] }
 0x181   :  { %v449_v49 = vpop.permute.xlu2 %448 }
 0x185   :  { %v1091_v30 = vpop.f32.mrf.mxu3 }
 0x186   :  { %v257_v44 = vpop.permute.xlu1 %256  ;;  %v889_v45 = vld [vmem:[#allocation3 + $0x158] sm:$0xff] }
 0x187   :  { %294 = vst.msk [vmem:[#allocation3 + $0x108] sm:$0xff] %vm282_vm2, %v257_v44  ;;  %v916_v47 = vpack.c.bf16 %v892_v42, %v889_v45  ;;  %v580_v48 = vpop.permute.xlu0 %579 }
 0x188   :  { %616 = vst.msk [vmem:[#allocation3 + $0x110] sm:$0xff] %vm282_vm2, %v580_v48 }
 0x189   :  { %1142 = vmatmul.bf16.gmra.mxu3 %v916_v47  ;;  %391 = vst.msk [vmem:[#allocation3 + $0x108] sm:$0xff] %vm379_vm3, %v354_v39  ;;  %v773_v55 = vpop.permute.xlu2 %772 }
 0x18e   :  { %v352_v15 = vpop.permute.xlu1 %351 }
 0x18f   :  { %390 = vst.msk [vmem:[#allocation3 + $0xf0] sm:$0xff] %vm379_vm3, %v352_v15  ;;  %v675_v36 = vpop.permute.xlu0 %674  ;;  %v1069_v53 = vpop.f32.mrf.mxu0 }
 0x190   :  { %712 = vst.msk [vmem:[#allocation3 + $0xf8] sm:$0xff] %vm379_vm3, %v675_v36 }
 0x191   :  { %487 = vst.msk [vmem:[#allocation3 + $0xf0] sm:$0xff] %vm476_vm4, %v449_v49 }
 0x193   :  { %v1177_v35 = vpop.f32.mrf.mxu2 }
 0x196   :  { %v677_v58 = vpop.permute.xlu1 %676  ;;  %v1118_v59 = vpop.f32.mrf.mxu1 }
 0x197   :  { %713 = vst.msk [vmem:[#allocation3 + $0x110] sm:$0xff] %vm379_vm3, %v677_v58  ;;  %v1119_v60 = vadd.f32 %v1118_v59, %v1069_v53  ;;  %v451_v61 = vpop.permute.xlu0 %450  ;;  %v1071_v43 = vpop.f32.mrf.mxu0 }
 0x198   :  { %488 = vst.msk [vmem:[#allocation3 + $0x108] sm:$0xff] %vm476_vm4, %v451_v61  ;;  %v876_v4 = vld [vmem:[#allocation3 + $0xf0] sm:$0xff] }
 0x199   :  { %v1168_v63 = vadd.f32 %v1167_v51, %v1119_v60  ;;  %809 = vst.msk [vmem:[#allocation3 + $0x110] sm:$0xff] %vm476_vm4, %v773_v55 }
 0x19b   :  { %v1205_v1 = vmul.f32 %v5531_v41, %v1168_v63  ;;  %v1179_v13 = vpop.f32.mrf.mxu2 }
 0x19d   :  { %v5592_v24 = vadd.f32 %v5537_v46, %v1205_v1 }
 0x19e   :  { %v771_v2 = vpop.permute.xlu1 %770  ;;  %v1120_v3 = vpop.f32.mrf.mxu1 }
 0x19f   :  { %v1241_v50 = vmax.f32 %v5592_v24, 0.0   ;;  %808 = vst.msk [vmem:[#allocation3 + $0xf8] sm:$0xff] %vm476_vm4, %v771_v2  ;;  %v1121_v40 = vadd.f32 %v1120_v3, %v1071_v43  ;;  %v879_v5 = vld [vmem:[#allocation3 + $0x108] sm:$0xff] }
 0x1a0   :  { %v909_v62 = vpack.c.bf16 %v879_v5, %v876_v4  ;;  %v880_v7 = vld [vmem:[#allocation3 + $0x110] sm:$0xff] }
 0x1a1   :  { %v1170_v6 = vadd.f32 %v1169_v57, %v1121_v40 }
 0x1a2   :  { %1083 = vmatmul.bf16.gmra.mxu0 %v909_v62 }
 0x1a3   :  { %v1206_v34 = vmul.f32 %v5531_v41, %v1170_v6  ;;  %v1182_v18 = vpop.f32.mrf.mxu2 }
 0x1a5   :  { %v5598_v38 = vadd.f32 %v5537_v46, %v1206_v34 }
 0x1a6   :  { %v877_v8 = vld [vmem:[#allocation3 + $0xf8] sm:$0xff] }
 0x1a7   :  { %v1242_v27 = vmax.f32 %v5598_v38, 0.0   ;;  %v910_v9 = vpack.c.bf16 %v880_v7, %v877_v8 }
 0x1a9   :  { %1132 = vmatmul.bf16.gmra.mxu1 %v910_v9 }
 0x1ab   :  { %v1184_v37 = vpop.f32.mrf.mxu2 }
 0x1ac   :  { %v1094_v21 = vpop.f32.mrf.mxu3 }
 0x1b4   :  { %v1096_v44 = vpop.f32.mrf.mxu3  ;;  %v1187_v48 = vpop.f32.mrf.mxu2 }
 0x1bc   :  { %v1189_v57 = vpop.f32.mrf.mxu2 }
 0x1bf   :  { %v1074_v14 = vpop.f32.mrf.mxu0 }
 0x1c6   :  { %v1123_v17 = vpop.f32.mrf.mxu1 }
 0x1c7   :  { %v1124_v19 = vadd.f32 %v1123_v17, %v1074_v14  ;;  %v1076_v23 = vpop.f32.mrf.mxu0 }
 0x1c9   :  { %v1173_v20 = vadd.f32 %v1172_v29, %v1124_v19 }
 0x1cb   :  { %v1207_v22 = vmul.f32 %v5531_v41, %v1173_v20 }
 0x1cd   :  { %v5603_v26 = vadd.f32 %v5537_v46, %v1207_v22 }
 0x1ce   :  { %v1125_v28 = vpop.f32.mrf.mxu1 }
 0x1cf   :  { %v1243_v32 = vmax.f32 %v5603_v26, 0.0   ;;  %v1126_v33 = vadd.f32 %v1125_v28, %v1076_v23 }
 0x1d1   :  { %v1175_v39 = vadd.f32 %v1174_v10, %v1126_v33 }
 0x1d3   :  { %v1208_v42 = vmul.f32 %v5531_v41, %v1175_v39 }
 0x1d5   :  { %v5608_v45 = vadd.f32 %v5537_v46, %v1208_v42 }
 0x1d7   :  { %v1244_v47 = vmax.f32 %v5608_v45, 0.0  }
 0x1dc   :  { %v1138_v49 = vpop.f32.mrf.mxu3 }
 0x1dd   :  { %v1139_v51 = vadd.f32 %v1138_v49, %v1089_v12  ;;  %v1192_v12 = vpop.f32.mrf.mxu2 }
 0x1df   :  { %v1188_v15 = vadd.f32 %v1187_v48, %v1139_v51 }
 0x1e1   :  { %v1213_v36 = vmul.f32 %v5531_v41, %v1188_v15 }
 0x1e3   :  { %v1233_v53 = vadd.f32 %v5537_v46, %v1213_v36 }
 0x1e4   :  { %v1140_v55 = vpop.f32.mrf.mxu3 }
 0x1e5   :  { %v1249_v58 = vmax.f32 %v1233_v53, 0.0   ;;  %v1141_v59 = vadd.f32 %v1140_v55, %v1091_v30  ;;  %v1194_v22 = vpop.f32.mrf.mxu2 }
 0x1e7   :  { %v1190_v60 = vadd.f32 %v1189_v57, %v1141_v59 }
 0x1e9   :  { %v1214_v61 = vmul.f32 %v5531_v41, %v1190_v60 }
 0x1eb   :  { %v1234_v63 = vadd.f32 %v5537_v46, %v1214_v61 }
 0x1ed   :  { %v1250_v1 = vmax.f32 %v1234_v63, 0.0  }
 0x1ef   :  { %v1079_v43 = vpop.f32.mrf.mxu0 }
 0x1f6   :  { %v1128_v29 = vpop.f32.mrf.mxu1 }
 0x1f7   :  { %v1129_v2 = vadd.f32 %v1128_v29, %v1079_v43  ;;  %v1081_v4 = vpop.f32.mrf.mxu0 }
 0x1f9   :  { %v1178_v3 = vadd.f32 %v1177_v35, %v1129_v2 }
 0x1fb   :  { %v1209_v40 = vmul.f32 %v5531_v41, %v1178_v3 }
 0x1fd   :  { %v1229_v5 = vadd.f32 %v5537_v46, %v1209_v40 }
 0x1fe   :  { %v1130_v62 = vpop.f32.mrf.mxu1 }
 0x1ff   :  { %v1245_v6 = vmax.f32 %v1229_v5, 0.0   ;;  %v1131_v34 = vadd.f32 %v1130_v62, %v1081_v4 }
 0x201   :  { %v1180_v7 = vadd.f32 %v1179_v13, %v1131_v34 }
 0x203   :  { %v1210_v8 = vmul.f32 %v5531_v41, %v1180_v7 }
 0x205   :  { %v1230_v9 = vadd.f32 %v5537_v46, %v1210_v8 }
 0x207   :  { %v1246_v10 = vmax.f32 %v1230_v9, 0.0  }
 0x20c   :  { %v1143_v30 = vpop.f32.mrf.mxu3 }
 0x20d   :  { %v1144_v14 = vadd.f32 %v1143_v30, %v1094_v21 }
 0x20f   :  { %v1193_v17 = vadd.f32 %v1192_v12, %v1144_v14 }
 0x211   :  { %v1215_v35 = vmul.f32 %v5531_v41, %v1193_v17 }
 0x213   :  { %v1235_v19 = vadd.f32 %v5537_v46, %v1215_v35 }
 0x214   :  { %v1145_v20 = vpop.f32.mrf.mxu3 }
 0x215   :  { %v1251_v23 = vmax.f32 %v1235_v19, 0.0   ;;  %v1146_v28 = vadd.f32 %v1145_v20, %v1096_v44 }
 0x217   :  { %v1195_v33 = vadd.f32 %v1194_v22, %v1146_v28 }
 0x219   :  { %v1216_v13 = vmul.f32 %v5531_v41, %v1195_v33 }
 0x21b   :  { %v1236_v39 = vadd.f32 %v5537_v46, %v1216_v13 }
 0x21d   :  { %v1252_v42 = vmax.f32 %v1236_v39, 0.0  }
 0x21f   :  { %v1084_v48 = vpop.f32.mrf.mxu0 }
 0x226   :  { %v1133_v49 = vpop.f32.mrf.mxu1 }
 0x227   :  { %v1134_v51 = vadd.f32 %v1133_v49, %v1084_v48  ;;  %v1086_v36 = vpop.f32.mrf.mxu0 }
 0x229   :  { %v1183_v15 = vadd.f32 %v1182_v18, %v1134_v51 }
 0x22b   :  { %v1211_v21 = vmul.f32 %v5531_v41, %v1183_v15 }
 0x22d   :  { %v1231_v53 = vadd.f32 %v5537_v46, %v1211_v21 }
 0x22e   :  { %v1135_v55 = vpop.f32.mrf.mxu1 }
 0x22f   :  { %v1247_v57 = vmax.f32 %v1231_v53, 0.0   ;;  %v1136_v59 = vadd.f32 %v1135_v55, %v1086_v36 }
 0x231   :  { %v1185_v60 = vadd.f32 %v1184_v37, %v1136_v59 }
 0x233   :  { %v1212_v44 = vmul.f32 %v5531_v41, %v1185_v60 }
 0x235   :  { %v1232_v61 = vadd.f32 %v5537_v46, %v1212_v44 }
 0x237   :  { %v1248_v63 = vmax.f32 %v1232_v61, 0.0  }
 0x238 LB: > { %v1423_v41 = vld [vmem:[#allocation2 + $0xa1] sm:$0xff]  ;;  %s4889_s3 = smov 32   ;;  %s4890_s24 = smov 64   ;;  %s4883_s2 = sphi %s5675_s2, %s1258_s2   ;;  %v4879_v56 = vphi %v1237_v56, %v7181_v56   ;;  %v4875_v54 = vphi %v1238_v54, %v7180_v54   ;;  %v4871_v16 = vphi %v1239_v16, %v7179_v16   ;;  %v4867_v31 = vphi %v1240_v31, %v7178_v31   ;;  %v4863_v50 = vphi %v1241_v50, %v7177_v50   ;;  %v4859_v27 = vphi %v1242_v27, %v7176_v27   ;;  %v4855_v32 = vphi %v1243_v32, %v7175_v32   ;;  %v4851_v47 = vphi %v1244_v47, %v7174_v47   ;;  %v4847_v6 = vphi %v1245_v6, %v7173_v6   ;;  %v4843_v10 = vphi %v1246_v10, %v7172_v10   ;;  %v4839_v57 = vphi %v1247_v57, %v7171_v57   ;;  %v4835_v63 = vphi %v1248_v63, %v7170_v63   ;;  %v4831_v58 = vphi %v1249_v58, %v7169_v58   ;;  %v4827_v1 = vphi %v1250_v1, %v7168_v1   ;;  %v4823_v23 = vphi %v1251_v23, %v7167_v23   ;;  %v4819_v42 = vphi %v1252_v42, %v7166_v42  }
 0x239   : > { %v1519_v46 = vld [vmem:[#allocation2 + $0xa2] sm:$0xff]  ;;  %1463 = vrot.lane.b32.xlu0 %v1423_v41, %s4889_s3  ;;  %s4256_s27 = sshll.u32 %s4883_s2, 2  ;;  %s4891_s18 = smov 96  }
 0x23a   : > { %1559 = vrot.lane.b32.xlu1 %v1519_v46, %s4890_s24  ;;  %s5734_s30 = scalar_lea.vmem %s7136_s6, %s4256_s27  ;;  %s4457_s26 = smul.u32 144, %s4883_s2 }
 0x23b   : > { %v1277_v52 = vld [vmem:[%s5734_s30] sm:$0xf]  ;;  %s1258_s2 = sadd.s32 1, %s4883_s2  }
 0x23c   : > { %v5737_v0 = vperm.slane %v1277_v52, 0  ;;  %v5739_v11 = vperm.slane %v1277_v52, 1  ;;  %s5902_s21 = scalar_lea.vmem %s7134_s4, %s4457_s26  ;;  %s6278_s12 = scalar_lea.vmem %s7135_s5, %s4457_s26 }
 0x23d   : > { %p6747_p0 = scmp.ge.s32.totalorder %s1258_s2, 2  }
 0x23e   : > { %v1287_v25 = vmul.f32 %v4847_v6, %v5737_v0  ;;  %v1288_v24 = vmul.f32 %v4843_v10, %v5737_v0  ;;  %v1289_v38 = vmul.f32 %v4839_v57, %v5737_v0  ;;  %v1290_v18 = vmul.f32 %v4835_v63, %v5737_v0 }
 0x23f   : > { %v1291_v26 = vmul.f32 %v4831_v58, %v5737_v0  ;;  %v1292_v34 = vmul.f32 %v4827_v1, %v5737_v0  ;;  %v1293_v7 = vmul.f32 %v4823_v23, %v5737_v0  ;;  %v1279_v39 = vmul.f32 %v4879_v56, %v5737_v0 }
 0x240   : > { %v1304_v37 = vadd.f32 %v5739_v11, %v1287_v25  ;;  %v1305_v45 = vadd.f32 %v5739_v11, %v1288_v24  ;;  %v1306_v43 = vadd.f32 %v5739_v11, %v1289_v38  ;;  %v1307_v29 = vadd.f32 %v5739_v11, %v1290_v18 }
 0x241   : > { %v1308_v2 = vadd.f32 %v5739_v11, %v1291_v26  ;;  %v1309_v8 = vadd.f32 %v5739_v11, %v1292_v34  ;;  %v1310_v9 = vadd.f32 %v5739_v11, %v1293_v7  ;;  %v1296_v48 = vadd.f32 %v5739_v11, %v1279_v39  ;;  %v1415_v34 = vld [vmem:[#allocation2 + $0x1] sm:$0xff] }
 0x242   : > { %v1320_v3 = vmax.f32 %v1304_v37, 0.0  ;;  %v1321_v40 = vmax.f32 %v1305_v45, 0.0  ;;  %v1322_v4 = vmax.f32 %v1306_v43, 0.0  ;;  %v1323_v5 = vmax.f32 %v1307_v29, 0.0 }
 0x243   : > { %v1324_v62 = vmax.f32 %v1308_v2, 0.0  ;;  %v1325_v12 = vmax.f32 %v1309_v8, 0.0  ;;  %v1326_v30 = vmax.f32 %v1310_v9, 0.0  ;;  %v1312_v15 = vmax.f32 %v1296_v48, 0.0 }
 0x244   : > { %1375 = vst.msk [vmem:[#allocation2 + $0xb1] sm:$0xff] %vm59_vm0, %v1320_v3  ;;  %v1280_v53 = vmul.f32 %v4875_v54, %v5737_v0  ;;  %v1281_v41 = vmul.f32 %v4871_v16, %v5737_v0  ;;  %v1294_v46 = vmul.f32 %v4819_v42, %v5737_v0  ;;  %vm4083_vm8 = vcmask (%p6747_p0), 525312  }
 0x245   : > { %1376 = vst.msk [vmem:[#allocation2 + $0xc1] sm:$0xff] %vm59_vm0, %v1321_v40  ;;  %vm3849_vm9 = vcmask (%p6747_p0), 1024  }
 0x246   : > { %1377 = vst.msk [vmem:[#allocation2 + $0xd1] sm:$0xff] %vm59_vm0, %v1322_v4  ;;  %v1297_v55 = vadd.f32 %v5739_v11, %v1280_v53  ;;  %v1298_v52 = vadd.f32 %v5739_v11, %v1281_v41  ;;  %v1311_v25 = vadd.f32 %v5739_v11, %v1294_v46  ;;  %v1391_v53 = vld [vmem:[#allocation2 + $0xa0] sm:$0xff] }
 0x247   : > { %1378 = vst.msk [vmem:[#allocation2 + $0xe1] sm:$0xff] %vm59_vm0, %v1323_v5  ;;  %v1282_v5 = vmul.f32 %v4867_v31, %v5737_v0 }
 0x248   : > { %1379 = vst.msk [vmem:[#allocation2 + $0xf1] sm:$0xff] %vm59_vm0, %v1324_v62  ;;  %v1313_v44 = vmax.f32 %v1297_v55, 0.0  ;;  %v1314_v18 = vmax.f32 %v1298_v52, 0.0  ;;  %v1327_v26 = vmax.f32 %v1311_v25, 0.0  ;;  %v4462_v52 = vld [vmem:[%s5902_s21 + $0x20] sm:$0xff]  ;;  %v4461_v25 = vld [vmem:[%s5902_s21 + $0x18] sm:$0xff] }
 0x249   : > { %1380 = vst.msk [vmem:[#allocation2 + $0x101] sm:$0xff] %vm59_vm0, %v1325_v12  ;;  %v1299_v62 = vadd.f32 %v5739_v11, %v1282_v5  ;;  %v4465_v12 = vld [vmem:[%s5902_s21 + $0x38] sm:$0xff]  ;;  %v4460_v5 = vld [vmem:[%s5902_s21 + $0x10] sm:$0xff] }
 0x24a   : > { %1381 = vst.msk [vmem:[#allocation2 + $0x111] sm:$0xff] %vm59_vm0, %v1326_v30  ;;  %4511 = vmatpush.bf16.msra.mxu1 %v4465_v12  ;;  %v1283_v30 = vmul.f32 %v4863_v50, %v5737_v0  ;;  %2259 = vmatpush.bf16.msra.mxu0 %v4465_v12 }
 0x24b   : > { %v5767_v14 = vld [vmem:[#allocation2 + $0xb2] sm:$0xff]  ;;  %1367 = vst.msk [vmem:[#allocation2 + $0x11] sm:$0xff] %vm59_vm0, %v1312_v15  ;;  %v1315_v8 = vmax.f32 %v1299_v62, 0.0  ;;  %v1284_v62 = vmul.f32 %v4859_v27, %v5737_v0 }
 0x24c   : > { %v1424_v17 = vld [vmem:[#allocation2 + $0xb1] sm:$0xff]  ;;  %1561 = vrot.lane.b32.xlu1 %v5767_v14, %s4890_s24  ;;  %v5775_v19 = vld [vmem:[#allocation2 + $0xc0] sm:$0xff]  ;;  %1368 = vst.msk [vmem:[#allocation2 + $0x21] sm:$0xff] %vm59_vm0, %v1313_v44 }
 0x24d   : > { %v1615_v35 = vld [vmem:[#allocation2 + $0xb0] sm:$0xff]  ;;  %1465 = vrot.lane.b32.xlu0 %v1424_v17, %s4889_s3  ;;  %1409 = vst.msk [vmem:[#allocation3 + $0xf0] sm:$0xff] %vm59_vm0, %v5775_v19  ;;  %v5786_v28 = vld [vmem:[#allocation2 + $0xc1] sm:$0xff]  ;;  %v1300_v17 = vadd.f32 %v5739_v11, %v1283_v30 }
 0x24e   : > { %1655 = vrot.lane.b32.xlu2 %v1615_v35, %s4891_s18  ;;  %1408 = vst.msk [vmem:[#allocation3 + $0xd8] sm:$0xff] %vm59_vm0, %v1615_v35  ;;  %v5778_v20 = vld [vmem:[#allocation2 + $0xd0] sm:$0xff]  ;;  %v5782_v22 = vld [vmem:[#allocation2 + $0xe0] sm:$0xff] }
 0x24f   : > { %1410 = vst.msk [vmem:[#allocation3 + $0x108] sm:$0xff] %vm59_vm0, %v5778_v20  ;;  %v5788_v33 = vld [vmem:[#allocation2 + $0xd1] sm:$0xff]  ;;  %v5807_v51 = vld [vmem:[#allocation2 + $0xc2] sm:$0xff]  ;;  %v1316_v48 = vmax.f32 %v1300_v17, 0.0 }
 0x250   : > { %v5790_v13 = vld [vmem:[#allocation2 + $0xf0] sm:$0xff]  ;;  %1411 = vst.msk [vmem:[#allocation3 + $0x120] sm:$0xff] %vm59_vm0, %v5782_v22  ;;  %v5813_v21 = vld [vmem:[#allocation2 + $0x100] sm:$0xff] }
 0x251   : > { %1412 = vst.msk [vmem:[#allocation3 + $0x138] sm:$0xff] %vm59_vm0, %v5790_v13  ;;  %v5805_v49 = vld [vmem:[#allocation2 + $0xd2] sm:$0xff]  ;;  %v5827_v59 = vld [vmem:[#allocation2 + $0xe1] sm:$0xff] }
 0x252   : > { %v5818_v36 = vld [vmem:[#allocation2 + $0x110] sm:$0xff]  ;;  %1413 = vst.msk [vmem:[#allocation3 + $0x150] sm:$0xff] %vm59_vm0, %v5813_v21  ;;  %v5847_v38 = vld [vmem:[#allocation2 + $0xe2] sm:$0xff] }
 0x253   : > { %1414 = vst.msk [vmem:[#allocation3 + $0x168] sm:$0xff] %vm59_vm0, %v5818_v36  ;;  %v5829_v60 = vld [vmem:[#allocation2 + $0xf1] sm:$0xff]  ;;  %v5856_v37 = vld [vmem:[#allocation2 + $0x22] sm:$0xff] }
 0x254   : > { %1469 = vrot.lane.b32.xlu1 %v5788_v33, %s4889_s3  ;;  %v1416_v61 = vld [vmem:[#allocation2 + $0x11] sm:$0xff]  ;;  %1369 = vst.msk [vmem:[#allocation2 + $0x31] sm:$0xff] %vm59_vm0, %v1314_v18  ;;  %v5859_v45 = vld [vmem:[#allocation2 + $0x20] sm:$0xff] }
 0x255   : > { %1467 = vrot.lane.b32.xlu0 %v5786_v28, %s4889_s3  ;;  %1719 = vst.msk [vmem:[#allocation3 + $0x8] sm:$0xff] %vm59_vm0, %v1416_v61  ;;  %v5845_v24 = vld [vmem:[#allocation2 + $0xf2] sm:$0xff]  ;;  %v5865_v43 = vld [vmem:[#allocation2 + $0x101] sm:$0xff] }
 0x256   : > { %1657 = vrot.lane.b32.xlu2 %v5775_v19, %s4891_s18  ;;  %1382 = vst.msk [vmem:[#allocation2 + $0x121] sm:$0xff] %vm59_vm0, %v1327_v26  ;;  %v5867_v29 = vld [vmem:[#allocation2 + $0x111] sm:$0xff]  ;;  %v5881_v40 = vld [vmem:[#allocation2 + $0x102] sm:$0xff] }
 0x257   : > { %2039 = vst.msk [vmem:[#allocation3 + $0x10] sm:$0xff] %vm59_vm0, %v5856_v37  ;;  %v5879_v3 = vld [vmem:[#allocation2 + $0x112] sm:$0xff]  ;;  %v5883_v4 = vld [vmem:[#allocation2 + $0x21] sm:$0xff] }
 0x258   : > { %1401 = vst.msk [vmem:[#allocation3 + $0x30] sm:$0xff] %vm59_vm0, %v5859_v45  ;;  %v1511_v35 = vld [vmem:[#allocation2 + $0x2] sm:$0xff]  ;;  %v1735_v39 = vld [vmem:[#allocation2 + $0x12] sm:$0xff] }
 0x259   : > { %1720 = vst.msk [vmem:[#allocation3 + $0x20] sm:$0xff] %vm59_vm0, %v5883_v4  ;;  %v4464_v15 = vld [vmem:[%s5902_s21 + $0x30] sm:$0xff]  ;;  %v4458_v17 = vld [vmem:[%s5902_s21] sm:$0xff] }
 0x25a   : > { %1370 = vst.msk [vmem:[#allocation2 + $0x41] sm:$0xff] %vm59_vm0, %v1315_v8  ;;  %v1607_v55 = vld [vmem:[#allocation2 + $0x10] sm:$0xff]  ;;  %4512 = vmatpush.bf16.msra.mxu1 %v4464_v15  ;;  %2260 = vmatpush.bf16.msra.mxu0 %v4464_v15 }
 0x25b   : > { %v5869_v2 = vld [vmem:[#allocation2 + $0x30] sm:$0xff]  ;;  %1371 = vst.msk [vmem:[#allocation2 + $0x51] sm:$0xff] %vm59_vm0, %v1316_v48 }
 0x25c   : > { %1659 = vrot.lane.b32.xlu1 %v5778_v20, %s4891_s18  ;;  %1402 = vst.msk [vmem:[#allocation3 + $0x48] sm:$0xff] %vm59_vm0, %v5869_v2  ;;  %v1418_v9 = vld [vmem:[#allocation2 + $0x31] sm:$0xff] }
 0x25d   : > { %1565 = vrot.lane.b32.xlu0 %v5805_v49, %s4890_s24  ;;  %v5904_v7 = vld [vmem:[#allocation2 + $0x120] sm:$0xff]  ;;  %1721 = vst.msk [vmem:[#allocation3 + $0x38] sm:$0xff] %vm59_vm0, %v1418_v9  ;;  %v1737_v18 = vld [vmem:[#allocation2 + $0x32] sm:$0xff] }
 0x25e   : > { %1563 = vrot.lane.b32.xlu2 %v5807_v51, %s4890_s24  ;;  %1407 = vst.msk [vmem:[#allocation3 + $0xc0] sm:$0xff] %vm59_vm0, %v1391_v53 }
 0x25f   : > { %1400 = vst.msk [vmem:[#allocation3 + $0x18] sm:$0xff] %vm59_vm0, %v1607_v55 }
 0x260   : > { %2040 = vst.msk [vmem:[#allocation3 + $0x28] sm:$0xff] %vm59_vm0, %v1737_v18 }
 0x261   : > { %v5923_v44 = vld [vmem:[#allocation2 + $0x42] sm:$0xff] }
 0x262   : > { %v5927_v41 = vld [vmem:[#allocation2 + $0x40] sm:$0xff]  ;;  %2041 = vst.msk [vmem:[#allocation3 + $0x40] sm:$0xff] %vm59_vm0, %v5923_v44  ;;  %v5933_v46 = vld [vmem:[#allocation2 + $0x50] sm:$0xff] }
 0x263   : > { %1403 = vst.msk [vmem:[#allocation3 + $0x60] sm:$0xff] %vm59_vm0, %v5927_v41  ;;  %v5948_v26 = vld [vmem:[#allocation2 + $0x41] sm:$0xff]  ;;  %v1420_v8 = vld [vmem:[#allocation2 + $0x51] sm:$0xff] }
 0x264   : > { %1473 = vrot.lane.b32.xlu1 %v5829_v60, %s4889_s3  ;;  %1404 = vst.msk [vmem:[#allocation3 + $0x78] sm:$0xff] %vm59_vm0, %v5933_v46 }
 0x265   : > { %1471 = vrot.lane.b32.xlu0 %v5827_v59, %s4889_s3  ;;  %1722 = vst.msk [vmem:[#allocation3 + $0x50] sm:$0xff] %vm59_vm0, %v5948_v26 }
 0x266   : > { %1661 = vrot.lane.b32.xlu2 %v5782_v22, %s4891_s18  ;;  %1723 = vst.msk [vmem:[#allocation3 + $0x68] sm:$0xff] %vm59_vm0, %v1420_v8 }
 0x26c   : > { %1663 = vrot.lane.b32.xlu1 %v5790_v13, %s4891_s18 }
 0x26d   : > { %1569 = vrot.lane.b32.xlu0 %v5845_v24, %s4890_s24 }
 0x26e   : > { %1567 = vrot.lane.b32.xlu2 %v5847_v38, %s4890_s24 }
 0x274   : > { %1477 = vrot.lane.b32.xlu1 %v5867_v29, %s4889_s3 }
 0x275   : > { %1475 = vrot.lane.b32.xlu0 %v5865_v43, %s4889_s3 }
 0x276   : > { %1665 = vrot.lane.b32.xlu2 %v5813_v21, %s4891_s18 }
 0x27c   : > { %1667 = vrot.lane.b32.xlu1 %v5818_v36, %s4891_s18 }
 0x27d   : > { %1573 = vrot.lane.b32.xlu0 %v5879_v3, %s4890_s24 }
 0x27e   : > { %1571 = vrot.lane.b32.xlu2 %v5881_v40, %s4890_s24 }
 0x284   : > { %1449 = vrot.lane.b32.xlu1 %v1416_v61, %s4889_s3  ;;  %v4463_v61 = vld [vmem:[%s5902_s21 + $0x28] sm:$0xff] }
 0x285   : > { %1447 = vrot.lane.b32.xlu0 %v1415_v34, %s4889_s3  ;;  %4513 = vmatpush.bf16.msra.mxu1 %v4463_v61  ;;  %v1301_v34 = vadd.f32 %v5739_v11, %v1284_v62 }
 0x286   : > { %1669 = vrot.lane.b32.xlu2 %v5904_v7, %s4891_s18  ;;  %2261 = vmatpush.bf16.msra.mxu0 %v4463_v61 }
 0x287   : > { %v1317_v12 = vmax.f32 %v1301_v34, 0.0 }
 0x289   : > { %4514 = vmatpush.bf16.msra.mxu1 %v4462_v52  ;;  %1372 = vst.msk [vmem:[#allocation2 + $0x61] sm:$0xff] %vm59_vm0, %v1317_v12 }
 0x28a   : > { %2262 = vmatpush.bf16.msra.mxu0 %v4462_v52  ;;  %v4473_v52 = vld [vmem:[%s5902_s21 + $0x78] sm:$0xff] }
 0x28c   : > { %1543 = vrot.lane.b32.xlu1 %v1511_v35, %s4890_s24  ;;  %v1285_v35 = vmul.f32 %v4855_v32, %v5737_v0 }
 0x28d   : > { %1769 = vrot.lane.b32.xlu0 %v5856_v37, %s4889_s3  ;;  %4515 = vmatpush.bf16.msra.mxu1 %v4461_v25 }
 0x28e   : > { %1767 = vrot.lane.b32.xlu2 %v1735_v39, %s4889_s3  ;;  %2263 = vmatpush.bf16.msra.mxu0 %v4461_v25  ;;  %v1739_v25 = vld [vmem:[#allocation2 + $0x52] sm:$0xff] }
 0x28f   : > { %2042 = vst.msk [vmem:[#allocation3 + $0x58] sm:$0xff] %vm59_vm0, %v1739_v25 }
 0x290   : > { %v5977_v15 = vld [vmem:[#allocation2 + $0x62] sm:$0xff] }
 0x291   : > { %4516 = vmatpush.bf16.msra.mxu1 %v4460_v5  ;;  %2043 = vst.msk [vmem:[#allocation3 + $0x70] sm:$0xff] %vm59_vm0, %v5977_v15 }
 0x292   : > { %2264 = vmatpush.bf16.msra.mxu0 %v4460_v5 }
 0x294   : > { %1865 = vrot.lane.b32.xlu1 %v5869_v2, %s4890_s24 }
 0x295   : > { %1863 = vrot.lane.b32.xlu0 %v5859_v45, %s4890_s24 }
 0x296   : > { %1545 = vrot.lane.b32.xlu2 %v1735_v39, %s4890_s24 }
 0x29c   : > { %1959 = vrot.lane.b32.xlu1 %v5883_v4, %s4891_s18 }
 0x29d   : > { %1641 = vrot.lane.b32.xlu0 %v5859_v45, %s4891_s18  ;;  %v4459_v45 = vld [vmem:[%s5902_s21 + $0x8] sm:$0xff] }
 0x29e   : > { %1639 = vrot.lane.b32.xlu2 %v1607_v55, %s4891_s18  ;;  %4517 = vmatpush.bf16.msra.mxu1 %v4459_v45  ;;  %v5982_v55 = vld [vmem:[#allocation2 + $0x60] sm:$0xff] }
 0x29f   : > { %2265 = vmatpush.bf16.msra.mxu0 %v4459_v45  ;;  %1405 = vst.msk [vmem:[#allocation3 + $0x90] sm:$0xff] %vm59_vm0, %v5982_v55 }
 0x2a2   : > { %4518 = vmatpush.bf16.msra.mxu1 %v4458_v17 }
 0x2a3   : > { %2266 = vmatpush.bf16.msra.mxu0 %v4458_v17 }
 0x2a4   : > { %1453 = vrot.lane.b32.xlu1 %v1418_v9, %s4889_s3 }
 0x2a5   : > { %1451 = vrot.lane.b32.xlu0 %v5883_v4, %s4889_s3  ;;  %v1302_v4 = vadd.f32 %v5739_v11, %v1285_v35 }
 0x2a6   : > { %1961 = vrot.lane.b32.xlu2 %v1418_v9, %s4891_s18  ;;  %2308 = vmatpush.bf16.msrb.mxu1 %v4473_v52 }
 0x2a7   : > { %v1318_v9 = vmax.f32 %v1302_v4, 0.0 }
 0x2a8   : > { %v1656_v30 = vpop.permute.xlu2 %1655 }
 0x2a9   : > { %1373 = vst.msk [vmem:[#allocation2 + $0x71] sm:$0xff] %vm59_vm0, %v1318_v9 }
 0x2ab   : > { %v1464_v39 = vpop.permute.xlu0 %1463 }
 0x2ac   : > { %v1560_v48 = vpop.permute.xlu1 %1559  ;;  %1503 = vst.msk [vmem:[#allocation3 + $0xc0] sm:$0xff] %vm282_vm2, %v1464_v39  ;;  %1547 = vrot.lane.b32.xlu1 %v5856_v37, %s4890_s24 }
 0x2ad   : > { %1599 = vst.msk [vmem:[#allocation3 + $0xc0] sm:$0xff] %vm379_vm3, %v1560_v48  ;;  %1773 = vrot.lane.b32.xlu0 %v5923_v44, %s4889_s3  ;;  %v4471_v48 = vld [vmem:[%s5902_s21 + $0x68] sm:$0xff] }
 0x2ae   : > { %1695 = vst.msk [vmem:[#allocation3 + $0xc0] sm:$0xff] %vm476_vm4, %v1656_v30  ;;  %1771 = vrot.lane.b32.xlu2 %v1737_v18, %s4889_s3 }
 0x2b0   : > { %v1658_v53 = vpop.permute.xlu2 %1657  ;;  %v5991_v37 = vld [vmem:[#allocation2 + $0x70] sm:$0xff] }
 0x2b1   : > { %1406 = vst.msk [vmem:[#allocation3 + $0xa8] sm:$0xff] %vm59_vm0, %v5991_v37  ;;  %v6017_v12 = vld [vmem:[#allocation2 + $0x71] sm:$0xff] }
 0x2b2   : > { %1725 = vst.msk [vmem:[#allocation3 + $0x98] sm:$0xff] %vm59_vm0, %v6017_v12 }
 0x2b4   : > { %1869 = vrot.lane.b32.xlu1 %v5933_v46, %s4890_s24 }
 0x2b5   : > { %1867 = vrot.lane.b32.xlu0 %v5927_v41, %s4890_s24 }
 0x2b6   : > { %1549 = vrot.lane.b32.xlu2 %v1737_v18, %s4890_s24  ;;  %v6002_v18 = vld [vmem:[#allocation2 + $0x61] sm:$0xff] }
 0x2b7   : > { %1724 = vst.msk [vmem:[#allocation3 + $0x80] sm:$0xff] %vm59_vm0, %v6002_v18 }
 0x2b8   : > { %v1564_v61 = vpop.permute.xlu2 %1563 }
 0x2bc   : > { %1963 = vrot.lane.b32.xlu1 %v5948_v26, %s4891_s18 }
 0x2bd   : > { %1645 = vrot.lane.b32.xlu0 %v5927_v41, %s4891_s18  ;;  %v1286_v41 = vmul.f32 %v4851_v47, %v5737_v0 }
 0x2be   : > { %1643 = vrot.lane.b32.xlu2 %v5869_v2, %s4891_s18  ;;  %v1562_v5 = vpop.permute.xlu1 %1561  ;;  %v4472_v2 = vld [vmem:[%s5902_s21 + $0x70] sm:$0xff] }
 0x2bf   : > { %v1466_v62 = vpop.permute.xlu0 %1465  ;;  %v1303_v34 = vadd.f32 %v5739_v11, %v1286_v41  ;;  %2309 = vmatpush.bf16.msrb.mxu1 %v4472_v2  ;;  %v4469_v2 = vld [vmem:[%s5902_s21 + $0x58] sm:$0xff] }
 0x2c0   : > { %1504 = vst.msk [vmem:[#allocation3 + $0xd8] sm:$0xff] %vm282_vm2, %v1466_v62  ;;  %v1662_v45 = vpop.permute.xlu2 %1661 }
 0x2c1   : > { %1600 = vst.msk [vmem:[#allocation3 + $0xd8] sm:$0xff] %vm379_vm3, %v1562_v5  ;;  %v1319_v30 = vmax.f32 %v1303_v34, 0.0 }
 0x2c2   : > { %1696 = vst.msk [vmem:[#allocation3 + $0xd8] sm:$0xff] %vm476_vm4, %v1658_v53 }
 0x2c3   : > { %1374 = vst.msk [vmem:[#allocation2 + $0x81] sm:$0xff] %vm59_vm0, %v1319_v30  ;;  %2310 = vmatpush.bf16.msrb.mxu1 %v4471_v48 }
 0x2c4   : > { %1457 = vrot.lane.b32.xlu1 %v1420_v8, %s4889_s3 }
 0x2c5   : > { %1455 = vrot.lane.b32.xlu0 %v5948_v26, %s4889_s3  ;;  %v2079_v26 = vld [vmem:[#allocation3 + $0xc0] sm:$0xff] }
 0x2c6   : > { %1965 = vrot.lane.b32.xlu2 %v1420_v8, %s4891_s18  ;;  %v1470_v17 = vpop.permute.xlu1 %1469 }
 0x2c7   : > { %v1468_v0 = vpop.permute.xlu0 %1467  ;;  %1506 = vst.msk [vmem:[#allocation3 + $0x108] sm:$0xff] %vm282_vm2, %v1470_v17 }
 0x2c8   : > { %1505 = vst.msk [vmem:[#allocation3 + $0xf0] sm:$0xff] %vm282_vm2, %v1468_v0  ;;  %v1568_v11 = vpop.permute.xlu2 %1567 }
 0x2c9   : > { %1601 = vst.msk [vmem:[#allocation3 + $0xf0] sm:$0xff] %vm379_vm3, %v1564_v61  ;;  %v2082_v35 = vld [vmem:[#allocation3 + $0xd8] sm:$0xff]  ;;  %v4470_v61 = vld [vmem:[%s5902_s21 + $0x60] sm:$0xff] }
 0x2ca   : > { %v2115_v39 = vpack.c.bf16 %v2082_v35, %v2079_v26  ;;  %v6032_v8 = vld [vmem:[#allocation2 + $0x82] sm:$0xff]  ;;  %2311 = vmatpush.bf16.msrb.mxu1 %v4470_v61 }
 0x2cb   : > { %2045 = vst.msk [vmem:[#allocation3 + $0xa0] sm:$0xff] %vm59_vm0, %v6032_v8  ;;  %v6056_v30 = vld [vmem:[#allocation2 + $0x81] sm:$0xff] }
 0x2cc   : > { %2287 = vmatmul.bf16.vlgmr.msra.gmra.mxu1 %v2115_v39  ;;  %1551 = vrot.lane.b32.xlu1 %v5923_v44, %s4890_s24  ;;  %v1383_v44 = vld [vmem:[#allocation2] sm:$0xff]  ;;  %1726 = vst.msk [vmem:[#allocation3 + $0xb0] sm:$0xff] %vm59_vm0, %v6056_v30  ;;  %v2060_v61 = vld [vmem:[#allocation3 + $0x28] sm:$0xff] }
 0x2cd   : > { %1777 = vrot.lane.b32.xlu0 %v5977_v15, %s4889_s3  ;;  %1399 = vst.msk [vmem:[#allocation3] sm:$0xff] %vm59_vm0, %v1383_v44 }
 0x2ce   : > { %1775 = vrot.lane.b32.xlu2 %v1739_v25, %s4889_s3  ;;  %v1660_v9 = vpop.permute.xlu1 %1659  ;;  %2312 = vmatpush.bf16.msrb.mxu1 %v4469_v2 }
 0x2cf   : > { %v1566_v4 = vpop.permute.xlu0 %1565  ;;  %1697 = vst.msk [vmem:[#allocation3 + $0xf0] sm:$0xff] %vm476_vm4, %v1660_v9  ;;  %v4467_v9 = vld [vmem:[%s5902_s21 + $0x48] sm:$0xff] }
 0x2d0   : > { %1602 = vst.msk [vmem:[#allocation3 + $0x108] sm:$0xff] %vm379_vm3, %v1566_v4  ;;  %v1666_v53 = vpop.permute.xlu2 %1665 }
 0x2d1   : > { %1698 = vst.msk [vmem:[#allocation3 + $0x108] sm:$0xff] %vm476_vm4, %v1662_v45 }
 0x2d4   : > { %1873 = vrot.lane.b32.xlu1 %v5991_v37, %s4890_s24 }
 0x2d5   : > { %1871 = vrot.lane.b32.xlu0 %v5982_v55, %s4890_s24 }
 0x2d6   : > { %1553 = vrot.lane.b32.xlu2 %v1739_v25, %s4890_s24  ;;  %v1474_v5 = vpop.permute.xlu1 %1473  ;;  %v2085_v62 = vld [vmem:[#allocation3 + $0xf0] sm:$0xff] }
 0x2d7   : > { %v1472_v52 = vpop.permute.xlu0 %1471  ;;  %1508 = vst.msk [vmem:[#allocation3 + $0x138] sm:$0xff] %vm282_vm2, %v1474_v5  ;;  %v1741_v25 = vld [vmem:[#allocation2 + $0x72] sm:$0xff] }
 0x2d8   : > { %1507 = vst.msk [vmem:[#allocation3 + $0x120] sm:$0xff] %vm282_vm2, %v1472_v52  ;;  %v1572_v41 = vpop.permute.xlu2 %1571  ;;  %v2088_v45 = vld [vmem:[#allocation3 + $0x108] sm:$0xff] }
 0x2d9   : > { %1603 = vst.msk [vmem:[#allocation3 + $0x120] sm:$0xff] %vm379_vm3, %v1568_v11  ;;  %v2118_v34 = vpack.c.bf16 %v2088_v45, %v2085_v62  ;;  %v4468_v11 = vld [vmem:[%s5902_s21 + $0x50] sm:$0xff] }
 0x2da   : > { %2044 = vst.msk [vmem:[#allocation3 + $0x88] sm:$0xff] %vm59_vm0, %v1741_v25  ;;  %2313 = vmatpush.bf16.msrb.mxu1 %v4468_v11  ;;  %v6088_v45 = vld [vmem:[#allocation2 + $0x90] sm:$0xff] }
 0x2dc   : > { %2292 = vmatmul.bf16.gmra.mxu1 %v2118_v34  ;;  %1967 = vrot.lane.b32.xlu1 %v6002_v18, %s4891_s18 }
 0x2dd   : > { %1649 = vrot.lane.b32.xlu0 %v5982_v55, %s4891_s18 }
 0x2de   : > { %1647 = vrot.lane.b32.xlu2 %v5933_v46, %s4891_s18  ;;  %v1664_v17 = vpop.permute.xlu1 %1663  ;;  %v4475_v46 = vld [vmem:[%s5902_s21 + $0x88] sm:$0xff]  ;;  %2314 = vmatpush.bf16.msrb.mxu1 %v4467_v9 }
 0x2df   : > { %v1570_v0 = vpop.permute.xlu0 %1569  ;;  %1699 = vst.msk [vmem:[#allocation3 + $0x120] sm:$0xff] %vm476_vm4, %v1664_v17  ;;  %2363 = vmatpush.bf16.msra.mxu2 %v4475_v46  ;;  %4519 = vmatpush.bf16.msra.mxu3 %v4475_v46 }
 0x2e0   : > { %1604 = vst.msk [vmem:[#allocation3 + $0x138] sm:$0xff] %vm379_vm3, %v1570_v0  ;;  %v1670_v55 = vpop.permute.xlu2 %1669 }
 0x2e1   : > { %1700 = vst.msk [vmem:[#allocation3 + $0x138] sm:$0xff] %vm476_vm4, %v1666_v53 }
 0x2e4   : > { %1461 = vrot.lane.b32.xlu1 %v6017_v12, %s4889_s3 }
 0x2e5   : > { %1459 = vrot.lane.b32.xlu0 %v6002_v18, %s4889_s3  ;;  %v4474_v18 = vld [vmem:[%s5902_s21 + $0x80] sm:$0xff] }
 0x2e6   : > { %1969 = vrot.lane.b32.xlu2 %v6017_v12, %s4891_s18  ;;  %v1478_v35 = vpop.permute.xlu1 %1477  ;;  %v2091_v39 = vld [vmem:[#allocation3 + $0x120] sm:$0xff]  ;;  %2364 = vmatpush.bf16.msra.mxu2 %v4474_v18  ;;  %v2057_v12 = vld [vmem:[#allocation3 + $0x10] sm:$0xff] }
 0x2e7   : > { %v1476_v26 = vpop.permute.xlu0 %1475  ;;  %1510 = vst.msk [vmem:[#allocation3 + $0x168] sm:$0xff] %vm282_vm2, %v1478_v35  ;;  %4520 = vmatpush.bf16.msra.mxu3 %v4474_v18  ;;  %v2105_v44 = vpack.c.bf16 %v2060_v61, %v2057_v12 }
 0x2e8   : > { %1509 = vst.msk [vmem:[#allocation3 + $0x150] sm:$0xff] %vm282_vm2, %v1476_v26  ;;  %v1768_v48 = vpop.permute.xlu2 %1767  ;;  %v2094_v4 = vld [vmem:[#allocation3 + $0x138] sm:$0xff] }
 0x2e9   : > { %1605 = vst.msk [vmem:[#allocation3 + $0x150] sm:$0xff] %vm379_vm3, %v1572_v41  ;;  %v2121_v53 = vpack.c.bf16 %v2094_v4, %v2091_v39  ;;  %4330 = vmatmul.msk.bf16.vlgmr.msra.gmra.mxu2 %vm59_vm0, %v2105_v44  ;;  %v4466_v41 = vld [vmem:[%s5902_s21 + $0x40] sm:$0xff]  ;;  %v6105_v26 = vld [vmem:[#allocation2 + $0x91] sm:$0xff] }
 0x2ea   : > { %1815 = vst.msk [vmem:[#allocation3 + $0x8] sm:$0xff] %vm282_vm2, %v1768_v48  ;;  %2315 = vmatpush.bf16.msrb.mxu1 %v4466_v41  ;;  %v2069_v41 = vld [vmem:[#allocation3 + $0x70] sm:$0xff] }
 0x2ec   : > { %2297 = vmatmul.bf16.gmra.mxu1 %v2121_v53  ;;  %1555 = vrot.lane.b32.xlu1 %v5977_v15, %s4890_s24 }
 0x2ed   : > { %1781 = vrot.lane.b32.xlu0 %v6032_v8, %s4889_s3  ;;  %v1837_v8 = vld [vmem:[#allocation2 + $0x80] sm:$0xff] }
 0x2ee   : > { %1779 = vrot.lane.b32.xlu2 %v1741_v25, %s4889_s3  ;;  %v1668_v5 = vpop.permute.xlu1 %1667 }
 0x2ef   : > { %v1574_v52 = vpop.permute.xlu0 %1573  ;;  %1701 = vst.msk [vmem:[#allocation3 + $0x150] sm:$0xff] %vm476_vm4, %v1668_v5 }
 0x2f0   : > { %1606 = vst.msk [vmem:[#allocation3 + $0x168] sm:$0xff] %vm379_vm3, %v1574_v52  ;;  %v1546_v62 = vpop.permute.xlu2 %1545 }
 0x2f1   : > { %1702 = vst.msk [vmem:[#allocation3 + $0x168] sm:$0xff] %vm476_vm4, %v1670_v55 }
 0x2f4   : > { %1877 = vrot.lane.b32.xlu1 %v6088_v45, %s4890_s24 }
 0x2f5   : > { %1875 = vrot.lane.b32.xlu0 %v1837_v8, %s4890_s24 }
 0x2f6   : > { %1557 = vrot.lane.b32.xlu2 %v1741_v25, %s4890_s24  ;;  %v1450_v2 = vpop.permute.xlu1 %1449  ;;  %v2097_v34 = vld [vmem:[#allocation3 + $0x150] sm:$0xff] }
 0x2f7   : > { %v1448_v15 = vpop.permute.xlu0 %1447  ;;  %1496 = vst.msk [vmem:[#allocation3 + $0x18] sm:$0xff] %vm282_vm2, %v1450_v2 }
 0x2f8   : > { %1495 = vst.msk [vmem:[#allocation3] sm:$0xff] %vm282_vm2, %v1448_v15  ;;  %v1640_v0 = vpop.permute.xlu2 %1639  ;;  %v2100_v17 = vld [vmem:[#allocation3 + $0x168] sm:$0xff] }
 0x2f9   : > { %v2124_v55 = vpack.c.bf16 %v2100_v17, %v2097_v34  ;;  %1592 = vst.msk [vmem:[#allocation3 + $0x18] sm:$0xff] %vm379_vm3, %v1546_v62 }
 0x2fc   : > { %2302 = vmatmul.bf16.gmra.mxu1 %v2124_v55  ;;  %1971 = vrot.lane.b32.xlu1 %v6056_v30, %s4891_s18 }
 0x2fd   : > { %1653 = vrot.lane.b32.xlu0 %v1837_v8, %s4891_s18  ;;  %v2072_v8 = vld [vmem:[#allocation3 + $0x88] sm:$0xff] }
 0x2fe   : > { %1651 = vrot.lane.b32.xlu2 %v5991_v37, %s4891_s18  ;;  %v1544_v11 = vpop.permute.xlu1 %1543  ;;  %v2111_v15 = vpack.c.bf16 %v2072_v8, %v2069_v41 }
 0x2ff   : > { %v1770_v25 = vpop.permute.xlu0 %1769  ;;  %1591 = vst.msk [vmem:[#allocation3] sm:$0xff] %vm379_vm3, %v1544_v11 }
 0x300   : > { %1816 = vst.msk [vmem:[#allocation3 + $0x20] sm:$0xff] %vm282_vm2, %v1770_v25  ;;  %v1962_v46 = vpop.permute.xlu2 %1961 }
 0x301   : > { %1687 = vst.msk [vmem:[#allocation3] sm:$0xff] %vm476_vm4, %v1640_v0 }
 0x304   : > { %1785 = vrot.lane.b32.xlu1 %v5807_v51, %s4889_s3  ;;  %v2066_v51 = vld [vmem:[#allocation3 + $0x58] sm:$0xff] }
 0x305   : > { %1783 = vrot.lane.b32.xlu0 %v5767_v14, %s4889_s3  ;;  %v2063_v14 = vld [vmem:[#allocation3 + $0x40] sm:$0xff] }
 0x306   : > { %1973 = vrot.lane.b32.xlu2 %v6105_v26, %s4891_s18  ;;  %v1866_v30 = vpop.permute.xlu1 %1865  ;;  %v2108_v39 = vpack.c.bf16 %v2066_v51, %v2063_v14 }
 0x307   : > { %v1864_v37 = vpop.permute.xlu0 %1863  ;;  %1912 = vst.msk [vmem:[#allocation3 + $0x20] sm:$0xff] %vm379_vm3, %v1866_v30  ;;  %v2030_v30 = vld [vmem:[#allocation2 + $0x92] sm:$0xff] }
 0x308   : > { %1911 = vst.msk [vmem:[#allocation3 + $0x8] sm:$0xff] %vm379_vm3, %v1864_v37  ;;  %v1772_v35 = vpop.permute.xlu2 %1771  ;;  %4331 = vmatmul.msk.bf16.gmra.mxu2 %vm59_vm0, %v2108_v39  ;;  %v2055_v53 = vld [vmem:[#allocation3] sm:$0xff]  ;;  %v1942_v37 = vld [vmem:[#allocation2 + $0x131] sm:$0xff] }
 0x309   : > { %2008 = vst.msk [vmem:[#allocation3 + $0x20] sm:$0xff] %vm476_vm4, %v1962_v46  ;;  %v2075_v39 = vld [vmem:[#allocation3 + $0xa0] sm:$0xff] }
 0x30a   : > { %1817 = vst.msk [vmem:[#allocation3 + $0x38] sm:$0xff] %vm282_vm2, %v1772_v35 }
 0x30b   : > { %2046 = vst.msk [vmem:[#allocation3 + $0xb8] sm:$0xff] %vm59_vm0, %v2030_v30 }
 0x30c   : > { %1975 = vrot.lane.b32.xlu1 %v5786_v28, %s4891_s18 }
 0x30d   : > { %1881 = vrot.lane.b32.xlu0 %v5778_v20, %s4890_s24  ;;  %v1750_v20 = vld [vmem:[#allocation2 + $0x122] sm:$0xff] }
 0x30e   : > { %1879 = vrot.lane.b32.xlu2 %v5775_v19, %s4890_s24  ;;  %v1960_v4 = vpop.permute.xlu1 %1959  ;;  %2053 = vst.msk [vmem:[#allocation3 + $0x160] sm:$0xff] %vm59_vm0, %v1750_v20 }
 0x30f   : > { %v1642_v48 = vpop.permute.xlu0 %1641  ;;  %2007 = vst.msk [vmem:[#allocation3 + $0x8] sm:$0xff] %vm476_vm4, %v1960_v4 }
 0x310   : > { %1688 = vst.msk [vmem:[#allocation3 + $0x18] sm:$0xff] %vm476_vm4, %v1642_v48  ;;  %v1550_v9 = vpop.permute.xlu2 %1549  ;;  %v2059_v28 = vld [vmem:[#allocation3 + $0x20] sm:$0xff] }
 0x312   : > { %v2078_v48 = vld [vmem:[#allocation3 + $0xb8] sm:$0xff] }
 0x313   : > { %v2114_v4 = vpack.c.bf16 %v2078_v48, %v2075_v39  ;;  %3173 = vst.msk [vmem:[#allocation3 + $0xb8] sm:$0xff] %vm59_vm0, %v2030_v30 }
 0x314   : > { %1789 = vrot.lane.b32.xlu1 %v5847_v38, %s4889_s3 }
 0x315   : > { %1787 = vrot.lane.b32.xlu0 %v5805_v49, %s4889_s3 }
 0x316   : > { %1977 = vrot.lane.b32.xlu2 %v5788_v33, %s4891_s18  ;;  %v1454_v18 = vpop.permute.xlu1 %1453  ;;  %v2056_v44 = vld [vmem:[#allocation3 + $0x8] sm:$0xff] }
 0x317   : > { %v1452_v19 = vpop.permute.xlu0 %1451  ;;  %v2058_v12 = vld [vmem:[#allocation3 + $0x18] sm:$0xff]  ;;  %1498 = vst.msk [vmem:[#allocation3 + $0x48] sm:$0xff] %vm282_vm2, %v1454_v18  ;;  %v2104_v49 = vpack.c.bf16 %v2059_v28, %v2056_v44  ;;  %v1941_v33 = vld [vmem:[#allocation2 + $0x121] sm:$0xff] }
 0x318   : > { %1497 = vst.msk [vmem:[#allocation3 + $0x30] sm:$0xff] %vm282_vm2, %v1452_v19  ;;  %v2103_v61 = vpack.c.bf16 %v2058_v12, %v2055_v53  ;;  %v1644_v52 = vpop.permute.xlu2 %1643  ;;  %4332 = vmatmul.msk.bf16.gmra.mxu2 %vm59_vm0, %v2111_v15  ;;  %v1711_v19 = vld [vmem:[#allocation2 + $0xb1] sm:$0xff] }
 0x319   : > { %1594 = vst.msk [vmem:[#allocation3 + $0x48] sm:$0xff] %vm379_vm3, %v1550_v9  ;;  %2316 = vmatmul.bf16.vlgmr.msrb.gmra.mxu1 %v2104_v49  ;;  %v1713_v15 = vld [vmem:[#allocation2 + $0xd1] sm:$0xff] }
 0x31a   : > { %2267 = vmatmul.bf16.vlgmr.msra.gmra.mxu0 %v2103_v61  ;;  %1734 = vst.msk [vmem:[#allocation3 + $0x170] sm:$0xff] %vm59_vm0, %v1941_v33 }
 0x31b   : > { %1727 = vst.msk [vmem:[#allocation3 + $0xc8] sm:$0xff] %vm59_vm0, %v1711_v19 }
 0x31c   : > { %1979 = vrot.lane.b32.xlu1 %v5827_v59, %s4891_s18  ;;  %1729 = vst.msk [vmem:[#allocation3 + $0xf8] sm:$0xff] %vm59_vm0, %v1713_v15 }
 0x31d   : > { %1885 = vrot.lane.b32.xlu0 %v5790_v13, %s4890_s24 }
 0x31e   : > { %1883 = vrot.lane.b32.xlu2 %v5782_v22, %s4890_s24  ;;  %v1548_v5 = vpop.permute.xlu1 %1547 }
 0x31f   : > { %v1774_v38 = vpop.permute.xlu0 %1773  ;;  %1593 = vst.msk [vmem:[#allocation3 + $0x30] sm:$0xff] %vm379_vm3, %v1548_v5 }
 0x320   : > { %1818 = vst.msk [vmem:[#allocation3 + $0x50] sm:$0xff] %vm282_vm2, %v1774_v38  ;;  %v1966_v62 = vpop.permute.xlu2 %1965  ;;  %v1712_v38 = vld [vmem:[#allocation2 + $0xc1] sm:$0xff] }
 0x321   : > { %1689 = vst.msk [vmem:[#allocation3 + $0x30] sm:$0xff] %vm476_vm4, %v1644_v52 }
 0x322   : > { %1728 = vst.msk [vmem:[#allocation3 + $0xe0] sm:$0xff] %vm59_vm0, %v1712_v38 }
 0x324   : > { %1793 = vrot.lane.b32.xlu1 %v5881_v40, %s4889_s3 }
 0x325   : > { %1791 = vrot.lane.b32.xlu0 %v5845_v24, %s4889_s3 }
 0x326   : > { %1981 = vrot.lane.b32.xlu2 %v5829_v60, %s4891_s18  ;;  %v1870_v13 = vpop.permute.xlu1 %1869 }
 0x327   : > { %v1868_v22 = vpop.permute.xlu0 %1867  ;;  %1914 = vst.msk [vmem:[#allocation3 + $0x50] sm:$0xff] %vm379_vm3, %v1870_v13 }
 0x328   : > { %1913 = vst.msk [vmem:[#allocation3 + $0x38] sm:$0xff] %vm379_vm3, %v1868_v22  ;;  %v1776_v59 = vpop.permute.xlu2 %1775  ;;  %v2061_v34 = vld [vmem:[#allocation3 + $0x30] sm:$0xff]  ;;  %4333 = vmatmul.msk.bf16.gmra.mxu2 %vm59_vm0, %v2114_v4 }
 0x329   : > { %2010 = vst.msk [vmem:[#allocation3 + $0x50] sm:$0xff] %vm476_vm4, %v1966_v62  ;;  %v2031_v62 = vld [vmem:[#allocation2 + $0xc2] sm:$0xff]  ;;  %v2032_v22 = vld [vmem:[#allocation2 + $0xd2] sm:$0xff] }
 0x32a   : > { %1819 = vst.msk [vmem:[#allocation3 + $0x68] sm:$0xff] %vm282_vm2, %v1776_v59 }
 0x32b   : > { %2047 = vst.msk [vmem:[#allocation3 + $0xd0] sm:$0xff] %vm59_vm0, %v2031_v62 }
 0x32c   : > { %1983 = vrot.lane.b32.xlu1 %v5865_v43, %s4891_s18  ;;  %2048 = vst.msk [vmem:[#allocation3 + $0xe8] sm:$0xff] %vm59_vm0, %v2032_v22 }
 0x32d   : > { %1889 = vrot.lane.b32.xlu0 %v5818_v36, %s4890_s24 }
 0x32e   : > { %1887 = vrot.lane.b32.xlu2 %v5813_v21, %s4890_s24  ;;  %v1964_v24 = vpop.permute.xlu1 %1963 }
 0x32f   : > { %v1646_v60 = vpop.permute.xlu0 %1645  ;;  %2009 = vst.msk [vmem:[#allocation3 + $0x38] sm:$0xff] %vm476_vm4, %v1964_v24 }
 0x330   : > { %1690 = vst.msk [vmem:[#allocation3 + $0x48] sm:$0xff] %vm476_vm4, %v1646_v60  ;;  %v1554_v40 = vpop.permute.xlu2 %1553  ;;  %v2065_v2 = vld [vmem:[#allocation3 + $0x50] sm:$0xff] }
 0x332   : > { %v2081_v60 = vld [vmem:[#allocation3 + $0xd0] sm:$0xff] }
 0x333   : > { %v2084_v24 = vld [vmem:[#allocation3 + $0xe8] sm:$0xff] }
 0x334   : > { %1797 = vrot.lane.b32.xlu1 %v1750_v20, %s4889_s3 }
 0x335   : > { %1795 = vrot.lane.b32.xlu0 %v5879_v3, %s4889_s3  ;;  %v1846_v3 = vld [vmem:[#allocation2 + $0x130] sm:$0xff] }
 0x336   : > { %1985 = vrot.lane.b32.xlu2 %v5867_v29, %s4891_s18  ;;  %v1458_v43 = vpop.permute.xlu1 %1457  ;;  %v2062_v17 = vld [vmem:[#allocation3 + $0x38] sm:$0xff] }
 0x337   : > { %v1456_v36 = vpop.permute.xlu0 %1455  ;;  %v2064_v21 = vld [vmem:[#allocation3 + $0x48] sm:$0xff]  ;;  %1500 = vst.msk [vmem:[#allocation3 + $0x78] sm:$0xff] %vm282_vm2, %v1458_v43  ;;  %v2107_v25 = vpack.c.bf16 %v2065_v2, %v2062_v17 }
 0x338   : > { %1499 = vst.msk [vmem:[#allocation3 + $0x60] sm:$0xff] %vm282_vm2, %v1456_v36  ;;  %v2106_v0 = vpack.c.bf16 %v2064_v21, %v2061_v34  ;;  %v1648_v55 = vpop.permute.xlu2 %1647  ;;  %v2117_v36 = vpack.c.bf16 %v2084_v24, %v2081_v60  ;;  %v1714_v21 = vld [vmem:[#allocation2 + $0xe1] sm:$0xff]  ;;  %v1717_v60 = vld [vmem:[#allocation2 + $0x111] sm:$0xff] }
 0x339   : > { %1596 = vst.msk [vmem:[#allocation3 + $0x78] sm:$0xff] %vm379_vm3, %v1554_v40  ;;  %2321 = vmatmul.bf16.gmra.mxu1 %v2107_v25  ;;  %v2034_v25 = vld [vmem:[#allocation2 + $0xf2] sm:$0xff]  ;;  %v2550_v24 = vld [vmem:[#allocation2 + $0xa1] sm:$0xff] }
 0x33a   : > { %2272 = vmatmul.bf16.gmra.mxu0 %v2106_v0  ;;  %4334 = vmatmul.msk.bf16.gmra.mxu2 %vm59_vm0, %v2117_v36  ;;  %1730 = vst.msk [vmem:[#allocation3 + $0x110] sm:$0xff] %vm59_vm0, %v1714_v21  ;;  %v2033_v0 = vld [vmem:[#allocation2 + $0xe2] sm:$0xff] }
 0x33b   : > { %2049 = vst.msk [vmem:[#allocation3 + $0x100] sm:$0xff] %vm59_vm0, %v2033_v0 }
 0x33c   : > { %1987 = vrot.lane.b32.xlu1 %v1941_v33, %s4891_s18  ;;  %2050 = vst.msk [vmem:[#allocation3 + $0x118] sm:$0xff] %vm59_vm0, %v2034_v25 }
 0x33d   : > { %1893 = vrot.lane.b32.xlu0 %v1846_v3, %s4890_s24  ;;  %1733 = vst.msk [vmem:[#allocation3 + $0x158] sm:$0xff] %vm59_vm0, %v1717_v60 }
 0x33e   : > { %1891 = vrot.lane.b32.xlu2 %v5904_v7, %s4890_s24  ;;  %v1552_v11 = vpop.permute.xlu1 %1551 }
 0x33f   : > { %v1778_v29 = vpop.permute.xlu0 %1777  ;;  %1595 = vst.msk [vmem:[#allocation3 + $0x60] sm:$0xff] %vm379_vm3, %v1552_v11  ;;  %v2638_v11 = vld [vmem:[#allocation2 + $0x2] sm:$0xff] }
 0x340   : > { %1820 = vst.msk [vmem:[#allocation3 + $0x80] sm:$0xff] %vm282_vm2, %v1778_v29  ;;  %v1970_v46 = vpop.permute.xlu2 %1969 }
 0x341   : > { %1691 = vst.msk [vmem:[#allocation3 + $0x60] sm:$0xff] %vm476_vm4, %v1648_v55 }
 0x342   : > { %v2087_v39 = vld [vmem:[#allocation3 + $0x100] sm:$0xff] }
 0x344   : > { %2670 = vrot.lane.b32.xlu1 %v2638_v11, %s4890_s24  ;;  %v2099_v11 = vld [vmem:[#allocation3 + $0x160] sm:$0xff] }
 0x346   : > { %1989 = vrot.lane.b32.xlu2 %v1942_v37, %s4891_s18  ;;  %v1874_v14 = vpop.permute.xlu1 %1873 }
 0x347   : > { %v1872_v35 = vpop.permute.xlu0 %1871  ;;  %1916 = vst.msk [vmem:[#allocation3 + $0x80] sm:$0xff] %vm379_vm3, %v1874_v14 }
 0x348   : > { %1915 = vst.msk [vmem:[#allocation3 + $0x68] sm:$0xff] %vm379_vm3, %v1872_v35  ;;  %v1780_v7 = vpop.permute.xlu2 %1779  ;;  %v2067_v44 = vld [vmem:[#allocation3 + $0x60] sm:$0xff] }
 0x349   : > { %v6184_v51 = vpop.f32.mrf.mxu1  ;;  %2012 = vst.msk [vmem:[#allocation3 + $0x80] sm:$0xff] %vm476_vm4, %v1970_v46  ;;  %v1715_v46 = vld [vmem:[#allocation2 + $0xf1] sm:$0xff] }
 0x34a   : > { %1821 = vst.msk [vmem:[#allocation3 + $0x98] sm:$0xff] %vm282_vm2, %v1780_v7 }
 0x34b   : > { %1731 = vst.msk [vmem:[#allocation3 + $0x128] sm:$0xff] %vm59_vm0, %v1715_v46 }
 0x34c   : > { %3004 = vrot.lane.b32.xlu1 %v6088_v45, %s4890_s24  ;;  %v2646_v45 = vld [vmem:[#allocation2 + $0xa2] sm:$0xff] }
 0x34e   : > { %3100 = vrot.lane.b32.xlu2 %v6105_v26, %s4891_s18  ;;  %v1968_v20 = vpop.permute.xlu1 %1967 }
 0x34f   : > { %v1650_v9 = vpop.permute.xlu0 %1649  ;;  %2011 = vst.msk [vmem:[#allocation3 + $0x68] sm:$0xff] %vm476_vm4, %v1968_v20  ;;  %v2090_v20 = vld [vmem:[#allocation3 + $0x118] sm:$0xff] }
 0x350   : > { %1692 = vst.msk [vmem:[#allocation3 + $0x78] sm:$0xff] %vm476_vm4, %v1650_v9  ;;  %v1558_v28 = vpop.permute.xlu2 %1557  ;;  %v2071_v53 = vld [vmem:[#allocation3 + $0x80] sm:$0xff] }
 0x351   : > { %v6195_v18 = vpop.f32.mrf.mxu1 }
 0x354   : > { %2686 = vrot.lane.b32.xlu1 %v2646_v45, %s4890_s24 }
 0x356   : > { %v1462_v61 = vpop.permute.xlu1 %1461  ;;  %v2068_v49 = vld [vmem:[#allocation3 + $0x68] sm:$0xff] }
 0x357   : > { %v1460_v12 = vpop.permute.xlu0 %1459  ;;  %v2070_v52 = vld [vmem:[#allocation3 + $0x78] sm:$0xff]  ;;  %1502 = vst.msk [vmem:[#allocation3 + $0xa8] sm:$0xff] %vm282_vm2, %v1462_v61  ;;  %v2110_v5 = vpack.c.bf16 %v2071_v53, %v2068_v49 }
 0x358   : > { %1501 = vst.msk [vmem:[#allocation3 + $0x90] sm:$0xff] %vm282_vm2, %v1460_v12  ;;  %v2109_v26 = vpack.c.bf16 %v2070_v52, %v2067_v44  ;;  %v1652_v33 = vpop.permute.xlu2 %1651  ;;  %v2035_v12 = vld [vmem:[#allocation2 + $0x102] sm:$0xff]  ;;  %v2036_v49 = vld [vmem:[#allocation2 + $0x112] sm:$0xff] }
 0x359   : > { %1598 = vst.msk [vmem:[#allocation3 + $0xa8] sm:$0xff] %vm379_vm3, %v1558_v28  ;;  %2326 = vmatmul.bf16.gmra.mxu1 %v2110_v5  ;;  %v6201_v13 = vpop.f32.mrf.mxu1  ;;  %v2120_v28 = vpack.c.bf16 %v2090_v20, %v2087_v39  ;;  %v1716_v52 = vld [vmem:[#allocation2 + $0x101] sm:$0xff] }
 0x35a   : > { %2277 = vmatmul.bf16.gmra.mxu0 %v2109_v26  ;;  %2051 = vst.msk [vmem:[#allocation3 + $0x130] sm:$0xff] %vm59_vm0, %v2035_v12  ;;  %v2542_v26 = vld [vmem:[#allocation2 + $0x1] sm:$0xff] }
 0x35b   : > { %4335 = vmatmul.msk.bf16.vlgmr.msra.gmra.mxu3 %vm59_vm0, %v2120_v28  ;;  %2574 = vrot.lane.b32.xlu0 %v2542_v26, %s4889_s3  ;;  %1732 = vst.msk [vmem:[#allocation3 + $0x140] sm:$0xff] %vm59_vm0, %v1716_v52 }
 0x35c   : > { %2052 = vst.msk [vmem:[#allocation3 + $0x148] sm:$0xff] %vm59_vm0, %v2036_v49 }
 0x35e   : > { %v1556_v41 = vpop.permute.xlu1 %1555 }
 0x35f   : > { %v1782_v59 = vpop.permute.xlu0 %1781  ;;  %1597 = vst.msk [vmem:[#allocation3 + $0x90] sm:$0xff] %vm379_vm3, %v1556_v41 }
 0x360   : > { %1822 = vst.msk [vmem:[#allocation3 + $0xb0] sm:$0xff] %vm282_vm2, %v1782_v59  ;;  %v1974_v8 = vpop.permute.xlu2 %1973 }
 0x361   : > { %1693 = vst.msk [vmem:[#allocation3 + $0x90] sm:$0xff] %vm476_vm4, %v1652_v33  ;;  %v6209_v43 = vpop.f32.mrf.mxu1  ;;  %v2093_v41 = vld [vmem:[#allocation3 + $0x130] sm:$0xff] }
 0x363   : > { %v2096_v15 = vld [vmem:[#allocation3 + $0x148] sm:$0xff]  ;;  %2590 = vrot.lane.b32.xlu0 %v2550_v24, %s4889_s3 }
 0x366   : > { %v1878_v2 = vpop.permute.xlu1 %1877 }
 0x367   : > { %v1876_v40 = vpop.permute.xlu0 %1875  ;;  %1918 = vst.msk [vmem:[#allocation3 + $0xb0] sm:$0xff] %vm379_vm3, %v1878_v2  ;;  %v2038_v2 = vld [vmem:[#allocation2 + $0x132] sm:$0xff] }
 0x368   : > { %1917 = vst.msk [vmem:[#allocation3 + $0x98] sm:$0xff] %vm379_vm3, %v1876_v40  ;;  %v1880_v34 = vpop.permute.xlu2 %1879  ;;  %v2073_v14 = vld [vmem:[#allocation3 + $0x90] sm:$0xff]  ;;  %v2123_v40 = vpack.c.bf16 %v2096_v15, %v2093_v41 }
 0x369   : > { %2014 = vst.msk [vmem:[#allocation3 + $0xb0] sm:$0xff] %vm476_vm4, %v1974_v8  ;;  %v6219_v3 = vpop.f32.mrf.mxu1 }
 0x36a   : > { %2054 = vst.msk [vmem:[#allocation3 + $0x178] sm:$0xff] %vm59_vm0, %v2038_v2 }
 0x36b   : > { %4336 = vmatmul.msk.bf16.gmra.mxu3 %vm59_vm0, %v2123_v40 }
 0x36e   : > { %v1972_v55 = vpop.permute.xlu1 %1971 }
 0x36f   : > { %v1654_v17 = vpop.permute.xlu0 %1653  ;;  %2013 = vst.msk [vmem:[#allocation3 + $0x98] sm:$0xff] %vm476_vm4, %v1972_v55 }
 0x370   : > { %1694 = vst.msk [vmem:[#allocation3 + $0xa8] sm:$0xff] %vm476_vm4, %v1654_v17  ;;  %v1978_v29 = vpop.permute.xlu2 %1977  ;;  %v2077_v37 = vld [vmem:[#allocation3 + $0xb0] sm:$0xff]  ;;  %v2366_v17 = vpop.f32.mrf.mxu2 }
 0x371   : > { %v6229_v19 = vpop.f32.mrf.mxu1  ;;  %v2102_v55 = vld [vmem:[#allocation3 + $0x178] sm:$0xff] }
 0x372   : > { %3181 = vst.msk [vmem:[#allocation3 + $0x178] sm:$0xff] %vm59_vm0, %v2038_v2 }
 0x376   : > { %v1786_v35 = vpop.permute.xlu1 %1785  ;;  %v2074_v4 = vld [vmem:[#allocation3 + $0x98] sm:$0xff] }
 0x377   : > { %v1784_v30 = vpop.permute.xlu0 %1783  ;;  %v2076_v7 = vld [vmem:[#allocation3 + $0xa8] sm:$0xff]  ;;  %1824 = vst.msk [vmem:[#allocation3 + $0xe0] sm:$0xff] %vm282_vm2, %v1786_v35  ;;  %v2113_v9 = vpack.c.bf16 %v2077_v37, %v2074_v4  ;;  %v2126_v4 = vpack.c.bf16 %v2102_v55, %v2099_v11 }
 0x378   : > { %1823 = vst.msk [vmem:[#allocation3 + $0xc8] sm:$0xff] %vm282_vm2, %v1784_v30  ;;  %v2112_v48 = vpack.c.bf16 %v2076_v7, %v2073_v14  ;;  %v1884_v53 = vpop.permute.xlu2 %1883  ;;  %v4679_v14 = vld [vmem:[%s5734_s30] sm:$0xf] }
 0x379   : > { %1919 = vst.msk [vmem:[#allocation3 + $0xc8] sm:$0xff] %vm379_vm3, %v1880_v34  ;;  %2331 = vmatmul.bf16.gmra.mxu1 %v2113_v9  ;;  %v6240_v33 = vpop.f32.mrf.mxu1  ;;  %v6257_v7 = vperm.slane %v4679_v14, 2  ;;  %v6261_v20 = vperm.slane %v4679_v14, 3 }
 0x37a   : > { %2282 = vmatmul.bf16.gmra.mxu0 %v2112_v48 }
 0x37b   : > { %4337 = vmatmul.msk.bf16.gmra.mxu3 %vm59_vm0, %v2126_v4 }
 0x37e   : > { %v1976_v44 = vpop.permute.xlu1 %1975 }
 0x37f   : > { %v1882_v61 = vpop.permute.xlu0 %1881  ;;  %2015 = vst.msk [vmem:[#allocation3 + $0xc8] sm:$0xff] %vm476_vm4, %v1976_v44 }
 0x380   : > { %1920 = vst.msk [vmem:[#allocation3 + $0xe0] sm:$0xff] %vm379_vm3, %v1882_v61  ;;  %v1982_v38 = vpop.permute.xlu2 %1981 }
 0x381   : > { %2016 = vst.msk [vmem:[#allocation3 + $0xe0] sm:$0xff] %vm476_vm4, %v1978_v29  ;;  %v6249_v21 = vpop.f32.mrf.mxu1 }
 0x386   : > { %v1790_v62 = vpop.permute.xlu1 %1789  ;;  %v2080_v22 = vld [vmem:[#allocation3 + $0xc8] sm:$0xff] }
 0x387   : > { %v1788_v5 = vpop.permute.xlu0 %1787  ;;  %1826 = vst.msk [vmem:[#allocation3 + $0x110] sm:$0xff] %vm282_vm2, %v1790_v62 }
 0x388   : > { %1825 = vst.msk [vmem:[#allocation3 + $0xf8] sm:$0xff] %vm282_vm2, %v1788_v5  ;;  %v2083_v59 = vld [vmem:[#allocation3 + $0xe0] sm:$0xff]  ;;  %v1888_v0 = vpop.permute.xlu2 %1887 }
 0x389   : > { %1921 = vst.msk [vmem:[#allocation3 + $0xf8] sm:$0xff] %vm379_vm3, %v1884_v53  ;;  %v2116_v8 = vpack.c.bf16 %v2083_v59, %v2080_v22 }
 0x38b   : > { %2336 = vmatmul.bf16.gmra.mxu1 %v2116_v8 }
 0x38e   : > { %v1980_v34 = vpop.permute.xlu1 %1979 }
 0x38f   : > { %v1886_v36 = vpop.permute.xlu0 %1885  ;;  %2017 = vst.msk [vmem:[#allocation3 + $0xf8] sm:$0xff] %vm476_vm4, %v1980_v34 }
 0x390   : > { %1922 = vst.msk [vmem:[#allocation3 + $0x110] sm:$0xff] %vm379_vm3, %v1886_v36  ;;  %v1986_v28 = vpop.permute.xlu2 %1985 }
 0x391   : > { %2018 = vst.msk [vmem:[#allocation3 + $0x110] sm:$0xff] %vm476_vm4, %v1982_v38  ;;  %v2368_v38 = vpop.f32.mrf.mxu2 }
 0x396   : > { %v2317_v46 = vpop.f32.mrf.mxu1  ;;  %v1794_v37 = vpop.permute.xlu1 %1793  ;;  %v2086_v30 = vld [vmem:[#allocation3 + $0xf8] sm:$0xff] }
 0x397   : > { %v1792_v25 = vpop.permute.xlu0 %1791  ;;  %v2268_v29 = vpop.f32.mrf.mxu0  ;;  %1828 = vst.msk [vmem:[#allocation3 + $0x140] sm:$0xff] %vm282_vm2, %v1794_v37 }
 0x398   : > { %1827 = vst.msk [vmem:[#allocation3 + $0x128] sm:$0xff] %vm282_vm2, %v1792_v25  ;;  %v2318_v35 = vadd.f32 %v2317_v46, %v2268_v29  ;;  %v2089_v39 = vld [vmem:[#allocation3 + $0x110] sm:$0xff]  ;;  %v1892_v22 = vpop.permute.xlu2 %1891 }
 0x399   : > { %1923 = vst.msk [vmem:[#allocation3 + $0x128] sm:$0xff] %vm379_vm3, %v1888_v0  ;;  %v2119_v48 = vpack.c.bf16 %v2089_v39, %v2086_v30  ;;  %v4494_v0 = vld [vmem:[%s6278_s12 + $0x88] sm:$0xff] }
 0x39a   : > { %v2367_v9 = vadd.f32 %v2366_v17, %v2318_v35  ;;  %3490 = vmatpush.bf16.msrb.mxu0 %v4494_v0  ;;  %v4493_v17 = vld [vmem:[%s6278_s12 + $0x80] sm:$0xff]  ;;  %v2371_v35 = vpop.f32.mrf.mxu2 }
 0x39b   : > { %2341 = vmatmul.bf16.gmra.mxu1 %v2119_v48 }
 0x39c   : > { %v2407_v53 = vmul.f32 %v6257_v7, %v2367_v9 }
 0x39e   : > { %v2424_v12 = vadd.f32 %v6261_v20, %v2407_v53  ;;  %v2319_v52 = vpop.f32.mrf.mxu1  ;;  %v1984_v26 = vpop.permute.xlu1 %1983  ;;  %3491 = vmatpush.bf16.msrb.mxu0 %v4493_v17 }
 0x39f   : > { %v1890_v61 = vpop.permute.xlu0 %1889  ;;  %v2270_v44 = vpop.f32.mrf.mxu0  ;;  %2019 = vst.msk [vmem:[#allocation3 + $0x128] sm:$0xff] %vm476_vm4, %v1984_v26 }
 0x3a0   : > { %1924 = vst.msk [vmem:[#allocation3 + $0x140] sm:$0xff] %vm379_vm3, %v1890_v61  ;;  %v2440_v49 = vmax.f32 %v2424_v12, 0.0  ;;  %v2320_v45 = vadd.f32 %v2319_v52, %v2270_v44  ;;  %v1990_v25 = vpop.permute.xlu2 %1989 }
 0x3a1   : > { %2020 = vst.msk [vmem:[#allocation3 + $0x140] sm:$0xff] %vm476_vm4, %v1986_v28 }
 0x3a2   : > { %2494 = vst.msk [vmem:[#allocation2 + $0x11] sm:$0xff] %vm59_vm0, %v2440_v49  ;;  %v2369_v5 = vadd.f32 %v2368_v38, %v2320_v45  ;;  %v2373_v49 = vpop.f32.mrf.mxu2 }
 0x3a4   : > { %v2408_v62 = vmul.f32 %v6257_v7, %v2369_v5 }
 0x3a6   : > { %v2425_v59 = vadd.f32 %v6261_v20, %v2408_v62  ;;  %v1798_v8 = vpop.permute.xlu1 %1797  ;;  %v2092_v15 = vld [vmem:[#allocation3 + $0x128] sm:$0xff] }
 0x3a7   : > { %v1796_v41 = vpop.permute.xlu0 %1795  ;;  %1830 = vst.msk [vmem:[#allocation3 + $0x170] sm:$0xff] %vm282_vm2, %v1798_v8 }
 0x3a8   : > { %1829 = vst.msk [vmem:[#allocation3 + $0x158] sm:$0xff] %vm282_vm2, %v1796_v41  ;;  %v2441_v60 = vmax.f32 %v2425_v59, 0.0  ;;  %v2095_v24 = vld [vmem:[#allocation3 + $0x140] sm:$0xff] }
 0x3a9   : > { %1925 = vst.msk [vmem:[#allocation3 + $0x158] sm:$0xff] %vm379_vm3, %v1892_v22  ;;  %v2862_v40 = vld [vmem:[#allocation2 + $0x12] sm:$0xff]  ;;  %v2122_v36 = vpack.c.bf16 %v2095_v24, %v2092_v15 }
 0x3aa   : > { %v2543_v2 = vld [vmem:[#allocation2 + $0x11] sm:$0xff]  ;;  %2495 = vst.msk [vmem:[#allocation2 + $0x21] sm:$0xff] %vm59_vm0, %v2441_v60  ;;  %2894 = vrot.lane.b32.xlu2 %v2862_v40, %s4889_s3 }
 0x3ab   : > { %v2734_v34 = vld [vmem:[#allocation2 + $0x10] sm:$0xff]  ;;  %2576 = vrot.lane.b32.xlu1 %v2543_v2, %s4889_s3  ;;  %2346 = vmatmul.bf16.gmra.mxu1 %v2122_v36  ;;  %2846 = vst.msk [vmem:[#allocation3 + $0x8] sm:$0xff] %vm59_vm0, %v2543_v2 }
 0x3ac   : > { %2527 = vst.msk [vmem:[#allocation3 + $0x18] sm:$0xff] %vm59_vm0, %v2734_v34 }
 0x3ae   : > { %v1988_v29 = vpop.permute.xlu1 %1987 }
 0x3af   : > { %v1894_v55 = vpop.permute.xlu0 %1893  ;;  %2021 = vst.msk [vmem:[#allocation3 + $0x158] sm:$0xff] %vm476_vm4, %v1988_v29 }
 0x3b0   : > { %1926 = vst.msk [vmem:[#allocation3 + $0x170] sm:$0xff] %vm379_vm3, %v1894_v55 }
 0x3b1   : > { %2022 = vst.msk [vmem:[#allocation3 + $0x170] sm:$0xff] %vm476_vm4, %v1990_v25  ;;  %v2863_v11 = vld [vmem:[#allocation2 + $0x22] sm:$0xff] }
 0x3b2   : > { %v3054_v46 = vld [vmem:[#allocation2 + $0x21] sm:$0xff]  ;;  %2896 = vrot.lane.b32.xlu0 %v2863_v11, %s4889_s3  ;;  %2672 = vrot.lane.b32.xlu2 %v2862_v40, %s4890_s24  ;;  %3166 = vst.msk [vmem:[#allocation3 + $0x10] sm:$0xff] %vm59_vm0, %v2863_v11 }
 0x3b3   : > { %v2958_v37 = vld [vmem:[#allocation2 + $0x20] sm:$0xff]  ;;  %3086 = vrot.lane.b32.xlu1 %v3054_v46, %s4891_s18  ;;  %2847 = vst.msk [vmem:[#allocation3 + $0x20] sm:$0xff] %vm59_vm0, %v3054_v46 }
 0x3b4   : > { %2528 = vst.msk [vmem:[#allocation3 + $0x30] sm:$0xff] %vm59_vm0, %v2958_v37 }
 0x3b6   : > { %v2322_v14 = vpop.f32.mrf.mxu1  ;;  %v2098_v39 = vld [vmem:[#allocation3 + $0x158] sm:$0xff] }
 0x3b7   : > { %v2273_v30 = vpop.f32.mrf.mxu0 }
 0x3b8   : > { %v2323_v48 = vadd.f32 %v2322_v14, %v2273_v30  ;;  %v2101_v4 = vld [vmem:[#allocation3 + $0x170] sm:$0xff] }
 0x3b9   : > { %v2125_v9 = vpack.c.bf16 %v2101_v4, %v2098_v39  ;;  %v3184_v24 = vld [vmem:[#allocation3 + $0x10] sm:$0xff] }
 0x3ba   : > { %v2372_v28 = vadd.f32 %v2371_v35, %v2323_v48  ;;  %2990 = vrot.lane.b32.xlu0 %v2958_v37, %s4890_s24  ;;  %2766 = vrot.lane.b32.xlu2 %v2734_v34, %s4891_s18  ;;  %v2376_v34 = vpop.f32.mrf.mxu2 }
 0x3bb   : > { %2674 = vrot.lane.b32.xlu1 %v2863_v11, %s4890_s24  ;;  %2351 = vmatmul.bf16.gmra.mxu1 %v2125_v9 }
 0x3bc   : > { %v2409_v53 = vmul.f32 %v6257_v7, %v2372_v28 }
 0x3be   : > { %v2426_v12 = vadd.f32 %v6261_v20, %v2409_v53  ;;  %v2324_v44 = vpop.f32.mrf.mxu1 }
 0x3bf   : > { %v2275_v61 = vpop.f32.mrf.mxu0 }
 0x3c0   : > { %v2442_v52 = vmax.f32 %v2426_v12, 0.0  ;;  %v2325_v26 = vadd.f32 %v2324_v44, %v2275_v61  ;;  %v2671_v12 = vpop.permute.xlu1 %2670 }
 0x3c2   : > { %2496 = vst.msk [vmem:[#allocation2 + $0x31] sm:$0xff] %vm59_vm0, %v2442_v52  ;;  %v2374_v45 = vadd.f32 %v2373_v49, %v2325_v26  ;;  %2768 = vrot.lane.b32.xlu0 %v2958_v37, %s4891_s18  ;;  %v2378_v35 = vpop.f32.mrf.mxu2  ;;  %v2510_v26 = vld [vmem:[#allocation2] sm:$0xff] }
 0x3c3   : > { %2526 = vst.msk [vmem:[#allocation3] sm:$0xff] %vm59_vm0, %v2510_v26  ;;  %v4481_v26 = vld [vmem:[%s6278_s12 + $0x20] sm:$0xff] }
 0x3c4   : > { %v2410_v38 = vmul.f32 %v6257_v7, %v2374_v45 }
 0x3c6   : > { %v2427_v5 = vadd.f32 %v6261_v20, %v2410_v38 }
 0x3c8   : > { %v2443_v62 = vmax.f32 %v2427_v5, 0.0 }
 0x3c9   : > { %v3055_v22 = vld [vmem:[#allocation2 + $0x31] sm:$0xff] }
 0x3ca   : > { %v2959_v59 = vld [vmem:[#allocation2 + $0x30] sm:$0xff]  ;;  %2497 = vst.msk [vmem:[#allocation2 + $0x41] sm:$0xff] %vm59_vm0, %v2443_v62  ;;  %2578 = vrot.lane.b32.xlu0 %v3054_v46, %s4889_s3  ;;  %3088 = vrot.lane.b32.xlu2 %v3055_v22, %s4891_s18  ;;  %v2381_v49 = vpop.f32.mrf.mxu2 }
 0x3cb   : > { %v2864_v41 = vld [vmem:[#allocation2 + $0x32] sm:$0xff]  ;;  %2992 = vrot.lane.b32.xlu1 %v2959_v59, %s4890_s24  ;;  %2848 = vst.msk [vmem:[#allocation3 + $0x38] sm:$0xff] %vm59_vm0, %v3055_v22 }
 0x3cc   : > { %3167 = vst.msk [vmem:[#allocation3 + $0x28] sm:$0xff] %vm59_vm0, %v2864_v41 }
 0x3cd   : > { %2529 = vst.msk [vmem:[#allocation3 + $0x48] sm:$0xff] %vm59_vm0, %v2959_v59  ;;  %v2575_v5 = vpop.permute.xlu0 %2574 }
 0x3ce   : > { %2622 = vst.msk [vmem:[#allocation3] sm:$0xff] %vm282_vm2, %v2575_v5 }
 0x3cf   : > { %2718 = vst.msk [vmem:[#allocation3] sm:$0xff] %vm379_vm3, %v2671_v12 }
 0x3d1   : > { %v2865_v8 = vld [vmem:[#allocation2 + $0x42] sm:$0xff] }
 0x3d2   : > { %v2960_v15 = vld [vmem:[#allocation2 + $0x40] sm:$0xff]  ;;  %2900 = vrot.lane.b32.xlu0 %v2865_v8, %s4889_s3  ;;  %2898 = vrot.lane.b32.xlu2 %v2864_v41, %s4889_s3  ;;  %3168 = vst.msk [vmem:[#allocation3 + $0x40] sm:$0xff] %vm59_vm0, %v2865_v8 }
 0x3d3   : > { %v3056_v60 = vld [vmem:[#allocation2 + $0x41] sm:$0xff]  ;;  %2580 = vrot.lane.b32.xlu1 %v3055_v22, %s4889_s3  ;;  %2530 = vst.msk [vmem:[#allocation3 + $0x60] sm:$0xff] %vm59_vm0, %v2960_v15  ;;  %v6344_v22 = vpop.permute.xlu1 %3004 }
 0x3d4   : > { %v3187_v40 = vld [vmem:[#allocation3 + $0x28] sm:$0xff]  ;;  %2849 = vst.msk [vmem:[#allocation3 + $0x50] sm:$0xff] %vm59_vm0, %v3056_v60 }
 0x3d5   : > { %v3232_v2 = vpack.c.bf16 %v3187_v40, %v3184_v24  ;;  %v2518_v40 = vld [vmem:[#allocation2 + $0xa0] sm:$0xff] }
 0x3d6   : > { %v2327_v0 = vpop.f32.mrf.mxu1  ;;  %2534 = vst.msk [vmem:[#allocation3 + $0xc0] sm:$0xff] %vm59_vm0, %v2518_v40 }
 0x3d7   : > { %4411 = vmatmul.msk.bf16.vlgmr.msrb.gmra.mxu0 %vm59_vm0, %v3232_v2  ;;  %v2278_v36 = vpop.f32.mrf.mxu0  ;;  %v2383_v2 = vpop.f32.mrf.mxu2 }
 0x3d8   : > { %v2328_v17 = vadd.f32 %v2327_v0, %v2278_v36  ;;  %v2591_v36 = vpop.permute.xlu0 %2590 }
 0x3d9   : > { %v3190_v44 = vld [vmem:[#allocation3 + $0x40] sm:$0xff]  ;;  %2630 = vst.msk [vmem:[#allocation3 + $0xc0] sm:$0xff] %vm282_vm2, %v2591_v36 }
 0x3da   : > { %v2377_v55 = vadd.f32 %v2376_v34, %v2328_v17  ;;  %2994 = vrot.lane.b32.xlu0 %v2960_v15, %s4890_s24  ;;  %2676 = vrot.lane.b32.xlu2 %v2864_v41, %s4890_s24 }
 0x3db   : > { %3090 = vrot.lane.b32.xlu1 %v3056_v60, %s4891_s18  ;;  %v2687_v17 = vpop.permute.xlu1 %2686 }
 0x3dc   : > { %v2411_v25 = vmul.f32 %v6257_v7, %v2377_v55  ;;  %2726 = vst.msk [vmem:[#allocation3 + $0xc0] sm:$0xff] %vm379_vm3, %v2687_v17 }
 0x3de   : > { %v2428_v29 = vadd.f32 %v6261_v20, %v2411_v25  ;;  %v2329_v46 = vpop.f32.mrf.mxu1 }
 0x3df   : > { %v2280_v11 = vpop.f32.mrf.mxu0 }
 0x3e0   : > { %v2444_v37 = vmax.f32 %v2428_v29, 0.0  ;;  %v2330_v30 = vadd.f32 %v2329_v46, %v2280_v11  ;;  %v4484_v11 = vld [vmem:[%s6278_s12 + $0x38] sm:$0xff] }
 0x3e1   : > { %3386 = vmatpush.bf16.msrb.mxu3 %v4484_v11 }
 0x3e2   : > { %2498 = vst.msk [vmem:[#allocation2 + $0x51] sm:$0xff] %vm59_vm0, %v2444_v37  ;;  %v2379_v14 = vadd.f32 %v2378_v35, %v2330_v30  ;;  %2772 = vrot.lane.b32.xlu0 %v2960_v15, %s4891_s18  ;;  %2770 = vrot.lane.b32.xlu2 %v2959_v59, %s4891_s18  ;;  %v4483_v35 = vld [vmem:[%s6278_s12 + $0x30] sm:$0xff] }
 0x3e3   : > { %2678 = vrot.lane.b32.xlu1 %v2865_v8, %s4890_s24 }
 0x3e4   : > { %v2412_v39 = vmul.f32 %v6257_v7, %v2379_v14 }
 0x3e5   : > { %3387 = vmatpush.bf16.msrb.mxu3 %v4483_v35 }
 0x3e6   : > { %v2429_v48 = vadd.f32 %v6261_v20, %v2412_v39  ;;  %v2386_v39 = vpop.f32.mrf.mxu2 }
 0x3e8   : > { %v2445_v4 = vmax.f32 %v2429_v48, 0.0 }
 0x3e9   : > { %v3057_v9 = vld [vmem:[#allocation2 + $0x51] sm:$0xff] }
 0x3ea   : > { %v2961_v28 = vld [vmem:[#allocation2 + $0x50] sm:$0xff]  ;;  %2499 = vst.msk [vmem:[#allocation2 + $0x61] sm:$0xff] %vm59_vm0, %v2445_v4  ;;  %2582 = vrot.lane.b32.xlu0 %v3056_v60, %s4889_s3  ;;  %3092 = vrot.lane.b32.xlu2 %v3057_v9, %s4891_s18  ;;  %v6353_v60 = vpop.permute.xlu2 %3100 }
 0x3eb   : > { %v2866_v53 = vld [vmem:[#allocation2 + $0x52] sm:$0xff]  ;;  %2996 = vrot.lane.b32.xlu1 %v2961_v28, %s4890_s24  ;;  %2850 = vst.msk [vmem:[#allocation3 + $0x68] sm:$0xff] %vm59_vm0, %v3057_v9 }
 0x3ec   : > { %3169 = vst.msk [vmem:[#allocation3 + $0x58] sm:$0xff] %vm59_vm0, %v2866_v53 }
 0x3ed   : > { %2531 = vst.msk [vmem:[#allocation3 + $0x78] sm:$0xff] %vm59_vm0, %v2961_v28 }
 0x3f1   : > { %v2867_v61 = vld [vmem:[#allocation2 + $0x62] sm:$0xff] }
 0x3f2   : > { %2904 = vrot.lane.b32.xlu0 %v2867_v61, %s4889_s3  ;;  %2902 = vrot.lane.b32.xlu2 %v2866_v53, %s4889_s3  ;;  %3170 = vst.msk [vmem:[#allocation3 + $0x70] sm:$0xff] %vm59_vm0, %v2867_v61  ;;  %v3058_v38 = vld [vmem:[#allocation2 + $0x61] sm:$0xff] }
 0x3f3   : > { %v3193_v52 = vld [vmem:[#allocation3 + $0x58] sm:$0xff]  ;;  %2584 = vrot.lane.b32.xlu1 %v3057_v9, %s4889_s3  ;;  %v2962_v62 = vld [vmem:[#allocation2 + $0x60] sm:$0xff]  ;;  %2851 = vst.msk [vmem:[#allocation3 + $0x80] sm:$0xff] %vm59_vm0, %v3058_v38  ;;  %v4482_v9 = vld [vmem:[%s6278_s12 + $0x28] sm:$0xff] }
 0x3f4   : > { %v3235_v45 = vpack.c.bf16 %v3193_v52, %v3190_v44  ;;  %2532 = vst.msk [vmem:[#allocation3 + $0x90] sm:$0xff] %vm59_vm0, %v2962_v62  ;;  %v4492_v44 = vld [vmem:[%s6278_s12 + $0x78] sm:$0xff]  ;;  %3388 = vmatpush.bf16.msrb.mxu3 %v4482_v9 }
 0x3f5   : > { %3435 = vmatpush.bf16.msrb.mxu2 %v4492_v44  ;;  %v4477_v44 = vld [vmem:[%s6278_s12] sm:$0xff] }
 0x3f6   : > { %4412 = vmatmul.msk.bf16.gmra.mxu0 %vm59_vm0, %v3235_v45  ;;  %v2332_v41 = vpop.f32.mrf.mxu1  ;;  %v2391_v45 = vpop.f32.mrf.mxu3 }
 0x3f7   : > { %v2283_v59 = vpop.f32.mrf.mxu0 }
 0x3f8   : > { %v2333_v8 = vadd.f32 %v2332_v41, %v2283_v59  ;;  %3389 = vmatpush.bf16.msrb.mxu3 %v4481_v26  ;;  %v2388_v59 = vpop.f32.mrf.mxu2  ;;  %v4480_v41 = vld [vmem:[%s6278_s12 + $0x18] sm:$0xff] }
 0x3fa   : > { %v2382_v15 = vadd.f32 %v2381_v49, %v2333_v8  ;;  %2998 = vrot.lane.b32.xlu0 %v2962_v62, %s4890_s24  ;;  %2680 = vrot.lane.b32.xlu2 %v2866_v53, %s4890_s24 }
 0x3fb   : > { %3094 = vrot.lane.b32.xlu1 %v3058_v38, %s4891_s18 }
 0x3fc   : > { %v2413_v24 = vmul.f32 %v6257_v7, %v2382_v15  ;;  %3390 = vmatpush.bf16.msrb.mxu3 %v4480_v41 }
 0x3fe   : > { %v2430_v34 = vadd.f32 %v6261_v20, %v2413_v24  ;;  %v2334_v55 = vpop.f32.mrf.mxu1 }
 0x3ff   : > { %v2285_v0 = vpop.f32.mrf.mxu0 }
 0x400   : > { %v2446_v25 = vmax.f32 %v2430_v34, 0.0  ;;  %v2335_v29 = vadd.f32 %v2334_v55, %v2285_v0  ;;  %v4490_v34 = vld [vmem:[%s6278_s12 + $0x68] sm:$0xff]  ;;  %v4479_v55 = vld [vmem:[%s6278_s12 + $0x10] sm:$0xff] }
 0x401   : > { %3391 = vmatpush.bf16.msrb.mxu3 %v4479_v55 }
 0x402   : > { %2500 = vst.msk [vmem:[#allocation2 + $0x71] sm:$0xff] %vm59_vm0, %v2446_v25  ;;  %v2384_v46 = vadd.f32 %v2383_v2, %v2335_v29  ;;  %2776 = vrot.lane.b32.xlu0 %v2962_v62, %s4891_s18  ;;  %2774 = vrot.lane.b32.xlu2 %v2961_v28, %s4891_s18  ;;  %v3196_v2 = vld [vmem:[#allocation3 + $0x70] sm:$0xff]  ;;  %v4489_v29 = vld [vmem:[%s6278_s12 + $0x60] sm:$0xff] }
 0x403   : > { %2682 = vrot.lane.b32.xlu1 %v2867_v61, %s4890_s24 }
 0x404   : > { %v2414_v37 = vmul.f32 %v6257_v7, %v2384_v46  ;;  %v2895_v30 = vpop.permute.xlu2 %2894  ;;  %v2393_v46 = vpop.f32.mrf.mxu3 }
 0x405   : > { %2942 = vst.msk [vmem:[#allocation3 + $0x8] sm:$0xff] %vm282_vm2, %v2895_v30  ;;  %v4478_v30 = vld [vmem:[%s6278_s12 + $0x8] sm:$0xff] }
 0x406   : > { %v2431_v14 = vadd.f32 %v6261_v20, %v2414_v37  ;;  %3392 = vmatpush.bf16.msrb.mxu3 %v4478_v30 }
 0x408   : > { %v2447_v48 = vmax.f32 %v2431_v14, 0.0  ;;  %v2337_v4 = vpop.f32.mrf.mxu1 }
 0x409   : > { %v2338_v28 = vadd.f32 %v2337_v4, %v6184_v51  ;;  %v3059_v53 = vld [vmem:[#allocation2 + $0x71] sm:$0xff] }
 0x40a   : > { %v6372_v12 = vld [vmem:[#allocation2 + $0x70] sm:$0xff]  ;;  %2501 = vst.msk [vmem:[#allocation2 + $0x81] sm:$0xff] %vm59_vm0, %v2447_v48  ;;  %2586 = vrot.lane.b32.xlu0 %v3058_v38, %s4889_s3  ;;  %3096 = vrot.lane.b32.xlu2 %v3059_v53, %s4891_s18  ;;  %v4488_v48 = vld [vmem:[%s6278_s12 + $0x58] sm:$0xff] }
 0x40b   : > { %v2868_v61 = vld [vmem:[#allocation2 + $0x72] sm:$0xff]  ;;  %v2387_v52 = vadd.f32 %v2386_v39, %v2338_v28  ;;  %3000 = vrot.lane.b32.xlu1 %v6372_v12, %s4890_s24  ;;  %2852 = vst.msk [vmem:[#allocation3 + $0x98] sm:$0xff] %vm59_vm0, %v3059_v53  ;;  %3393 = vmatpush.bf16.msrb.mxu3 %v4477_v44 }
 0x40c   : > { %3171 = vst.msk [vmem:[#allocation3 + $0x88] sm:$0xff] %vm59_vm0, %v2868_v61  ;;  %v2673_v51 = vpop.permute.xlu2 %2672  ;;  %v4491_v38 = vld [vmem:[%s6278_s12 + $0x70] sm:$0xff] }
 0x40d   : > { %v2415_v49 = vmul.f32 %v6257_v7, %v2387_v52  ;;  %2533 = vst.msk [vmem:[#allocation3 + $0xa8] sm:$0xff] %vm59_vm0, %v6372_v12  ;;  %3436 = vmatpush.bf16.msrb.mxu2 %v4491_v38 }
 0x40f   : > { %v2432_v5 = vadd.f32 %v6261_v20, %v2415_v49 }
 0x410   : > { %v2339_v62 = vpop.f32.mrf.mxu1 }
 0x411   : > { %v2448_v8 = vmax.f32 %v2432_v5, 0.0  ;;  %v2340_v15 = vadd.f32 %v2339_v62, %v6195_v18  ;;  %v2869_v24 = vld [vmem:[#allocation2 + $0x82] sm:$0xff]  ;;  %3437 = vmatpush.bf16.msrb.mxu2 %v4490_v34  ;;  %v2396_v62 = vpop.f32.mrf.mxu3 }
 0x412   : > { %v3060_v40 = vld [vmem:[#allocation2 + $0x81] sm:$0xff]  ;;  %2908 = vrot.lane.b32.xlu0 %v2869_v24, %s4889_s3  ;;  %2906 = vrot.lane.b32.xlu2 %v2868_v61, %s4889_s3  ;;  %3172 = vst.msk [vmem:[#allocation3 + $0xa0] sm:$0xff] %vm59_vm0, %v2869_v24 }
 0x413   : > { %v3199_v36 = vld [vmem:[#allocation3 + $0x88] sm:$0xff]  ;;  %2502 = vst.msk [vmem:[#allocation2 + $0xb1] sm:$0xff] %vm59_vm0, %v2448_v8  ;;  %v2389_v0 = vadd.f32 %v2388_v59, %v2340_v15  ;;  %2588 = vrot.lane.b32.xlu1 %v3059_v53, %s4889_s3  ;;  %v2964_v39 = vld [vmem:[#allocation2 + $0x80] sm:$0xff] }
 0x414   : > { %v3238_v18 = vpack.c.bf16 %v3199_v36, %v3196_v2  ;;  %v2767_v17 = vpop.permute.xlu2 %2766  ;;  %2853 = vst.msk [vmem:[#allocation3 + $0xb0] sm:$0xff] %vm59_vm0, %v3060_v40  ;;  %v4486_v59 = vld [vmem:[%s6278_s12 + $0x48] sm:$0xff] }
 0x415   : > { %v2416_v25 = vmul.f32 %v6257_v7, %v2389_v0  ;;  %2814 = vst.msk [vmem:[#allocation3] sm:$0xff] %vm476_vm4, %v2767_v17  ;;  %3438 = vmatpush.bf16.msrb.mxu2 %v4489_v29 }
 0x416   : > { %4413 = vmatmul.msk.bf16.gmra.mxu0 %vm59_vm0, %v3238_v18 }
 0x417   : > { %v2433_v11 = vadd.f32 %v6261_v20, %v2416_v25 }
 0x418   : > { %v2342_v37 = vpop.f32.mrf.mxu1 }
 0x419   : > { %v2449_v35 = vmax.f32 %v2433_v11, 0.0  ;;  %v2343_v14 = vadd.f32 %v2342_v37, %v6201_v13  ;;  %3439 = vmatpush.bf16.msrb.mxu2 %v4488_v48  ;;  %v3202_v49 = vld [vmem:[#allocation3 + $0xa0] sm:$0xff]  ;;  %v2398_v11 = vpop.f32.mrf.mxu3 }
 0x41a   : > { %3002 = vrot.lane.b32.xlu0 %v2964_v39, %s4890_s24  ;;  %2684 = vrot.lane.b32.xlu2 %v2868_v61, %s4890_s24  ;;  %v2551_v4 = vld [vmem:[#allocation2 + $0xb1] sm:$0xff] }
 0x41b   : > { %2503 = vst.msk [vmem:[#allocation2 + $0xc1] sm:$0xff] %vm59_vm0, %v2449_v35  ;;  %v2392_v9 = vadd.f32 %v2391_v45, %v2343_v14  ;;  %3098 = vrot.lane.b32.xlu1 %v3060_v40, %s4891_s18  ;;  %v6410_v53 = vld [vmem:[#allocation2 + $0xb0] sm:$0xff]  ;;  %v3205_v45 = vld [vmem:[#allocation3 + $0xb8] sm:$0xff] }
 0x41c   : > { %2854 = vst.msk [vmem:[#allocation3 + $0xc8] sm:$0xff] %vm59_vm0, %v2551_v4  ;;  %v4487_v61 = vld [vmem:[%s6278_s12 + $0x50] sm:$0xff]  ;;  %v3241_v8 = vpack.c.bf16 %v3205_v45, %v3202_v49 }
 0x41d   : > { %v2577_v28 = vpop.permute.xlu1 %2576  ;;  %v2417_v13 = vmul.f32 %v6257_v7, %v2392_v9  ;;  %2535 = vst.msk [vmem:[#allocation3 + $0xd8] sm:$0xff] %vm59_vm0, %v6410_v53  ;;  %3440 = vmatpush.bf16.msrb.mxu2 %v4487_v61  ;;  %v2870_v17 = vld [vmem:[#allocation2 + $0xb2] sm:$0xff] }
 0x41e   : > { %2623 = vst.msk [vmem:[#allocation3 + $0x18] sm:$0xff] %vm282_vm2, %v2577_v28 }
 0x41f   : > { %2719 = vst.msk [vmem:[#allocation3 + $0x18] sm:$0xff] %vm379_vm3, %v2673_v51  ;;  %v2434_v52 = vadd.f32 %v6261_v20, %v2417_v13 }
 0x420   : > { %v2344_v26 = vpop.f32.mrf.mxu1 }
 0x421   : > { %v2450_v38 = vmax.f32 %v2434_v52, 0.0  ;;  %v2345_v5 = vadd.f32 %v2344_v26, %v6209_v43  ;;  %3441 = vmatpush.bf16.msrb.mxu2 %v4486_v59 }
 0x422   : > { %2780 = vrot.lane.b32.xlu0 %v2964_v39, %s4891_s18  ;;  %2778 = vrot.lane.b32.xlu2 %v6372_v12, %s4891_s18  ;;  %v2871_v51 = vld [vmem:[#allocation2 + $0xc2] sm:$0xff] }
 0x423   : > { %2504 = vst.msk [vmem:[#allocation2 + $0xd1] sm:$0xff] %vm59_vm0, %v2450_v38  ;;  %v2394_v41 = vadd.f32 %v2393_v46, %v2345_v5  ;;  %2592 = vrot.lane.b32.xlu1 %v2551_v4, %s4889_s3  ;;  %v6428_v15 = vld [vmem:[#allocation2 + $0xc1] sm:$0xff]  ;;  %v2401_v5 = vpop.f32.mrf.mxu3 }
 0x424   : > { %v2897_v24 = vpop.permute.xlu0 %2896  ;;  %v6430_v40 = vpop.permute.xlu2 %3088  ;;  %v6432_v43 = vld [vmem:[#allocation2 + $0xc0] sm:$0xff]  ;;  %3174 = vst.msk [vmem:[#allocation3 + $0xd0] sm:$0xff] %vm59_vm0, %v2871_v51 }
 0x425   : > { %v2418_v2 = vmul.f32 %v6257_v7, %v2394_v41  ;;  %2943 = vst.msk [vmem:[#allocation3 + $0x20] sm:$0xff] %vm282_vm2, %v2897_v24  ;;  %v4485_v12 = vld [vmem:[%s6278_s12 + $0x40] sm:$0xff]  ;;  %v3087_v25 = vpop.permute.xlu1 %3086 }
 0x426   : > { %4414 = vmatmul.msk.bf16.gmra.mxu0 %vm59_vm0, %v3241_v8  ;;  %2855 = vst.msk [vmem:[#allocation3 + $0xe0] sm:$0xff] %vm59_vm0, %v6428_v15  ;;  %3442 = vmatpush.bf16.msrb.mxu2 %v4485_v12 }
 0x427   : > { %v2435_v36 = vadd.f32 %v6261_v20, %v2418_v2  ;;  %2536 = vst.msk [vmem:[#allocation3 + $0xf0] sm:$0xff] %vm59_vm0, %v6432_v43 }
 0x428   : > { %v2347_v34 = vpop.f32.mrf.mxu1 }
 0x429   : > { %v2451_v0 = vmax.f32 %v2435_v36, 0.0  ;;  %v2348_v18 = vadd.f32 %v2347_v34, %v6219_v3  ;;  %v3182_v36 = vld [vmem:[#allocation3] sm:$0xff] }
 0x42a   : > { %2912 = vrot.lane.b32.xlu0 %v2871_v51, %s4889_s3  ;;  %2910 = vrot.lane.b32.xlu2 %v2870_v17, %s4889_s3  ;;  %v6447_v55 = vld [vmem:[#allocation2 + $0xd2] sm:$0xff] }
 0x42b   : > { %2505 = vst.msk [vmem:[#allocation2 + $0xe1] sm:$0xff] %vm59_vm0, %v2451_v0  ;;  %v2397_v29 = vadd.f32 %v2396_v62, %v2348_v18  ;;  %3102 = vrot.lane.b32.xlu1 %v6428_v15, %s4891_s18  ;;  %v6456_v30 = vld [vmem:[#allocation2 + $0xd1] sm:$0xff] }
 0x42c   : > { %v2991_v46 = vpop.permute.xlu0 %2990  ;;  %v2899_v37 = vpop.permute.xlu2 %2898  ;;  %3175 = vst.msk [vmem:[#allocation3 + $0xe8] sm:$0xff] %vm59_vm0, %v6447_v55  ;;  %v6459_v35 = vld [vmem:[#allocation2 + $0xd0] sm:$0xff] }
 0x42d   : > { %v2419_v3 = vmul.f32 %v6257_v7, %v2397_v29  ;;  %3038 = vst.msk [vmem:[#allocation3 + $0x8] sm:$0xff] %vm379_vm3, %v2991_v46  ;;  %v3208_v44 = vld [vmem:[#allocation3 + $0xd0] sm:$0xff]  ;;  %v2675_v45 = vpop.permute.xlu1 %2674 }
 0x42e   : > { %3134 = vst.msk [vmem:[#allocation3 + $0x8] sm:$0xff] %vm476_vm4, %v3087_v25  ;;  %v2403_v25 = vpop.f32.mrf.mxu3 }
 0x42f   : > { %v2436_v14 = vadd.f32 %v6261_v20, %v2419_v3  ;;  %2944 = vst.msk [vmem:[#allocation3 + $0x38] sm:$0xff] %vm282_vm2, %v2899_v37 }
 0x430   : > { %v2349_v39 = vpop.f32.mrf.mxu1  ;;  %2856 = vst.msk [vmem:[#allocation3 + $0xf8] sm:$0xff] %vm59_vm0, %v6456_v30 }
 0x431   : > { %v2452_v48 = vmax.f32 %v2436_v14, 0.0  ;;  %v2350_v4 = vadd.f32 %v2349_v39, %v6229_v19  ;;  %2537 = vst.msk [vmem:[#allocation3 + $0x108] sm:$0xff] %vm59_vm0, %v6459_v35 }
 0x432   : > { %3006 = vrot.lane.b32.xlu0 %v6432_v43, %s4890_s24  ;;  %2688 = vrot.lane.b32.xlu2 %v2870_v17, %s4890_s24  ;;  %v6471_v9 = vld [vmem:[#allocation2 + $0xe2] sm:$0xff] }
 0x433   : > { %2506 = vst.msk [vmem:[#allocation2 + $0xf1] sm:$0xff] %vm59_vm0, %v2452_v48  ;;  %v2399_v28 = vadd.f32 %v2398_v11, %v2350_v4  ;;  %2690 = vrot.lane.b32.xlu1 %v2871_v51, %s4890_s24  ;;  %v3211_v13 = vld [vmem:[#allocation3 + $0xe8] sm:$0xff]  ;;  %v6479_v49 = vld [vmem:[#allocation2 + $0xe0] sm:$0xff] }
 0x434   : > { %v6475_v61 = vld [vmem:[#allocation2 + $0xe1] sm:$0xff]  ;;  %v2769_v19 = vpop.permute.xlu0 %2768  ;;  %v2677_v52 = vpop.permute.xlu2 %2676  ;;  %v3244_v26 = vpack.c.bf16 %v3211_v13, %v3208_v44  ;;  %3176 = vst.msk [vmem:[#allocation3 + $0x100] sm:$0xff] %vm59_vm0, %v6471_v9 }
 0x435   : > { %v2420_v38 = vmul.f32 %v6257_v7, %v2399_v28  ;;  %2815 = vst.msk [vmem:[#allocation3 + $0x18] sm:$0xff] %vm476_vm4, %v2769_v19  ;;  %v3183_v44 = vld [vmem:[#allocation3 + $0x8] sm:$0xff] }
 0x436   : > { %4415 = vmatmul.msk.bf16.gmra.mxu0 %vm59_vm0, %v3244_v26  ;;  %2857 = vst.msk [vmem:[#allocation3 + $0x110] sm:$0xff] %vm59_vm0, %v6475_v61 }
 0x437   : > { %v2437_v62 = vadd.f32 %v6261_v20, %v2420_v38  ;;  %2538 = vst.msk [vmem:[#allocation3 + $0x120] sm:$0xff] %vm59_vm0, %v6479_v49 }
 0x438   : > { %v2352_v59 = vpop.f32.mrf.mxu1 }
 0x439   : > { %v2453_v51 = vmax.f32 %v2437_v62, 0.0  ;;  %v2353_v41 = vadd.f32 %v2352_v59, %v6240_v33 }
 0x43a   : > { %2784 = vrot.lane.b32.xlu0 %v6432_v43, %s4891_s18  ;;  %2782 = vrot.lane.b32.xlu2 %v6410_v53, %s4891_s18  ;;  %v6494_v8 = vld [vmem:[#allocation2 + $0xf2] sm:$0xff] }
 0x43b   : > { %2507 = vst.msk [vmem:[#allocation2 + $0x101] sm:$0xff] %vm59_vm0, %v2453_v51  ;;  %v2402_v24 = vadd.f32 %v2401_v5, %v2353_v41  ;;  %3008 = vrot.lane.b32.xlu1 %v6459_v35, %s4890_s24  ;;  %v6506_v18 = vld [vmem:[#allocation2 + $0xf1] sm:$0xff]  ;;  %v3214_v37 = vld [vmem:[#allocation3 + $0x100] sm:$0xff] }
 0x43c   : > { %v2579_v2 = vpop.permute.xlu0 %2578  ;;  %v2771_v12 = vpop.permute.xlu2 %2770  ;;  %v3185_v34 = vld [vmem:[#allocation3 + $0x18] sm:$0xff]  ;;  %3177 = vst.msk [vmem:[#allocation3 + $0x118] sm:$0xff] %vm59_vm0, %v6494_v8  ;;  %v6529_v4 = vld [vmem:[#allocation2 + $0xf0] sm:$0xff] }
 0x43d   : > { %v2421_v33 = vmul.f32 %v6257_v7, %v2402_v24  ;;  %2624 = vst.msk [vmem:[#allocation3 + $0x30] sm:$0xff] %vm282_vm2, %v2579_v2  ;;  %v2993_v53 = vpop.permute.xlu1 %2992  ;;  %v3230_v43 = vpack.c.bf16 %v3185_v34, %v3182_v36 }
 0x43e   : > { %2720 = vst.msk [vmem:[#allocation3 + $0x30] sm:$0xff] %vm379_vm3, %v2675_v45 }
 0x43f   : > { %v2438_v0 = vadd.f32 %v6261_v20, %v2421_v33  ;;  %3039 = vst.msk [vmem:[#allocation3 + $0x20] sm:$0xff] %vm379_vm3, %v2993_v53  ;;  %3394 = vmatmul.bf16.vlgmr.msrb.gmra.mxu3 %v3230_v43 }
 0x440   : > { %3135 = vst.msk [vmem:[#allocation3 + $0x20] sm:$0xff] %vm476_vm4, %v6430_v40  ;;  %v2354_v17 = vpop.f32.mrf.mxu1 }
 0x441   : > { %v2454_v29 = vmax.f32 %v2438_v0, 0.0  ;;  %2816 = vst.msk [vmem:[#allocation3 + $0x30] sm:$0xff] %vm476_vm4, %v2771_v12  ;;  %v2355_v11 = vadd.f32 %v2354_v17, %v6249_v21 }
 0x442   : > { %2594 = vrot.lane.b32.xlu0 %v6428_v15, %s4889_s3  ;;  %3104 = vrot.lane.b32.xlu2 %v6456_v30, %s4891_s18  ;;  %v6516_v46 = vld [vmem:[#allocation2 + $0x102] sm:$0xff]  ;;  %2858 = vst.msk [vmem:[#allocation3 + $0x128] sm:$0xff] %vm59_vm0, %v6506_v18 }
 0x443   : > { %2508 = vst.msk [vmem:[#allocation2 + $0x111] sm:$0xff] %vm59_vm0, %v2454_v29  ;;  %v2404_v40 = vadd.f32 %v2403_v25, %v2355_v11  ;;  %2596 = vrot.lane.b32.xlu1 %v6456_v30, %s4889_s3  ;;  %v3217_v3 = vld [vmem:[#allocation3 + $0x118] sm:$0xff]  ;;  %v6533_v30 = vld [vmem:[#allocation2 + $0x101] sm:$0xff] }
 0x444   : > { %v2901_v21 = vpop.permute.xlu0 %2900  ;;  %v6523_v14 = vpop.permute.xlu2 %3092  ;;  %v3247_v15 = vpack.c.bf16 %v3217_v3, %v3214_v37  ;;  %3178 = vst.msk [vmem:[#allocation3 + $0x130] sm:$0xff] %vm59_vm0, %v6516_v46  ;;  %v6537_v19 = vld [vmem:[#allocation2 + $0x100] sm:$0xff] }
 0x445   : > { %v2422_v39 = vmul.f32 %v6257_v7, %v2404_v40  ;;  %2945 = vst.msk [vmem:[#allocation3 + $0x50] sm:$0xff] %vm282_vm2, %v2901_v21  ;;  %v2581_v48 = vpop.permute.xlu1 %2580 }
 0x446   : > { %2625 = vst.msk [vmem:[#allocation3 + $0x48] sm:$0xff] %vm282_vm2, %v2581_v48  ;;  %4416 = vmatmul.msk.bf16.gmra.mxu0 %vm59_vm0, %v3247_v15 }
 0x447   : > { %v2439_v28 = vadd.f32 %v6261_v20, %v2422_v39  ;;  %2721 = vst.msk [vmem:[#allocation3 + $0x48] sm:$0xff] %vm379_vm3, %v2677_v52  ;;  %v3186_v13 = vld [vmem:[#allocation3 + $0x20] sm:$0xff] }
 0x448   : > { %v3231_v7 = vpack.c.bf16 %v3186_v13, %v3183_v44  ;;  %2539 = vst.msk [vmem:[#allocation3 + $0x138] sm:$0xff] %vm59_vm0, %v6529_v4  ;;  %v3188_v53 = vld [vmem:[#allocation3 + $0x30] sm:$0xff] }
 0x449   : > { %v2455_v26 = vmax.f32 %v2439_v28, 0.0  ;;  %2859 = vst.msk [vmem:[#allocation3 + $0x140] sm:$0xff] %vm59_vm0, %v6533_v30 }
 0x44a   : > { %3443 = vmatmul.bf16.vlgmr.msrb.gmra.mxu2 %v3231_v7  ;;  %2916 = vrot.lane.b32.xlu0 %v6471_v9, %s4889_s3  ;;  %v6545_v45 = vld [vmem:[#allocation2 + $0x112] sm:$0xff]  ;;  %2540 = vst.msk [vmem:[#allocation3 + $0x150] sm:$0xff] %vm59_vm0, %v6537_v19 }
 0x44b   : > { %2509 = vst.msk [vmem:[#allocation2 + $0x121] sm:$0xff] %vm59_vm0, %v2455_v26  ;;  %2914 = vrot.lane.b32.xlu2 %v6447_v55, %s4889_s3  ;;  %3106 = vrot.lane.b32.xlu1 %v6475_v61, %s4891_s18  ;;  %v6557_v5 = vld [vmem:[#allocation2 + $0x111] sm:$0xff] }
 0x44c   : > { %v2995_v20 = vpop.permute.xlu0 %2994  ;;  %v2903_v52 = vpop.permute.xlu2 %2902  ;;  %3179 = vst.msk [vmem:[#allocation3 + $0x148] sm:$0xff] %vm59_vm0, %v6545_v45  ;;  %v6560_v62 = vld [vmem:[#allocation2 + $0x110] sm:$0xff] }
 0x44d   : > { %3040 = vst.msk [vmem:[#allocation3 + $0x38] sm:$0xff] %vm379_vm3, %v2995_v20  ;;  %v3091_v38 = vpop.permute.xlu1 %3090  ;;  %v3220_v41 = vld [vmem:[#allocation3 + $0x130] sm:$0xff] }
 0x44e   : > { %3136 = vst.msk [vmem:[#allocation3 + $0x38] sm:$0xff] %vm476_vm4, %v3091_v38  ;;  %v2973_v38 = vld [vmem:[#allocation2 + $0x130] sm:$0xff] }
 0x44f   : > { %2946 = vst.msk [vmem:[#allocation3 + $0x68] sm:$0xff] %vm282_vm2, %v2903_v52 }
 0x450   : > { %2860 = vst.msk [vmem:[#allocation3 + $0x158] sm:$0xff] %vm59_vm0, %v6557_v5 }
 0x451   : > { %2541 = vst.msk [vmem:[#allocation3 + $0x168] sm:$0xff] %vm59_vm0, %v6560_v62 }
 0x452   : > { %3010 = vrot.lane.b32.xlu0 %v6479_v49, %s4890_s24  ;;  %v6569_v59 = vld [vmem:[#allocation2 + $0x122] sm:$0xff] }
 0x453   : > { %v6571_v51 = vld [vmem:[#allocation2 + $0x121] sm:$0xff]  ;;  %2692 = vrot.lane.b32.xlu2 %v6447_v55, %s4890_s24  ;;  %3012 = vrot.lane.b32.xlu1 %v6529_v4, %s4890_s24  ;;  %3180 = vst.msk [vmem:[#allocation3 + $0x160] sm:$0xff] %vm59_vm0, %v6569_v59 }
 0x454   : > { %v3223_v24 = vld [vmem:[#allocation3 + $0x148] sm:$0xff]  ;;  %v2773_v2 = vpop.permute.xlu0 %2772  ;;  %v2681_v12 = vpop.permute.xlu2 %2680  ;;  %2861 = vst.msk [vmem:[#allocation3 + $0x170] sm:$0xff] %vm59_vm0, %v6571_v51 }
 0x455   : > { %v3250_v36 = vpack.c.bf16 %v3223_v24, %v3220_v41  ;;  %2817 = vst.msk [vmem:[#allocation3 + $0x48] sm:$0xff] %vm476_vm4, %v2773_v2  ;;  %v2679_v34 = vpop.permute.xlu1 %2678  ;;  %v3189_v37 = vld [vmem:[#allocation3 + $0x38] sm:$0xff] }
 0x457   : > { %4417 = vmatmul.msk.bf16.gmra.mxu0 %vm59_vm0, %v3250_v36 }
 0x45a   : > { %2788 = vrot.lane.b32.xlu0 %v6479_v49, %s4891_s18  ;;  %v3229_v49 = vld [vmem:[#allocation3 + $0x178] sm:$0xff] }
 0x45b   : > { %2786 = vrot.lane.b32.xlu2 %v6459_v35, %s4891_s18  ;;  %2600 = vrot.lane.b32.xlu1 %v6506_v18, %s4889_s3  ;;  %v3226_v35 = vld [vmem:[#allocation3 + $0x160] sm:$0xff] }
 0x45c   : > { %v2583_v55 = vpop.permute.xlu0 %2582  ;;  %v2775_v33 = vpop.permute.xlu2 %2774  ;;  %v3191_v43 = vld [vmem:[#allocation3 + $0x48] sm:$0xff]  ;;  %v3253_v11 = vpack.c.bf16 %v3229_v49, %v3226_v35 }
 0x45d   : > { %2626 = vst.msk [vmem:[#allocation3 + $0x60] sm:$0xff] %vm282_vm2, %v2583_v55  ;;  %v2997_v0 = vpop.permute.xlu1 %2996  ;;  %v3233_v17 = vpack.c.bf16 %v3191_v43, %v3188_v53  ;;  %v3069_v43 = vld [vmem:[#allocation2 + $0x131] sm:$0xff] }
 0x45e   : > { %2722 = vst.msk [vmem:[#allocation3 + $0x60] sm:$0xff] %vm379_vm3, %v2679_v34 }
 0x45f   : > { %3041 = vst.msk [vmem:[#allocation3 + $0x50] sm:$0xff] %vm379_vm3, %v2997_v0  ;;  %3399 = vmatmul.bf16.gmra.mxu3 %v3233_v17 }
 0x460   : > { %3137 = vst.msk [vmem:[#allocation3 + $0x50] sm:$0xff] %vm476_vm4, %v6523_v14 }
 0x461   : > { %2818 = vst.msk [vmem:[#allocation3 + $0x60] sm:$0xff] %vm476_vm4, %v2775_v33 }
 0x462   : > { %2598 = vrot.lane.b32.xlu0 %v6475_v61, %s4889_s3 }
 0x463   : > { %3108 = vrot.lane.b32.xlu2 %v6506_v18, %s4891_s18  ;;  %2694 = vrot.lane.b32.xlu1 %v6471_v9, %s4890_s24 }
 0x464   : > { %v2905_v25 = vpop.permute.xlu0 %2904  ;;  %v3097_v29 = vpop.permute.xlu2 %3096 }
 0x465   : > { %2947 = vst.msk [vmem:[#allocation3 + $0x80] sm:$0xff] %vm282_vm2, %v2905_v25  ;;  %v2585_v40 = vpop.permute.xlu1 %2584 }
 0x466   : > { %2627 = vst.msk [vmem:[#allocation3 + $0x78] sm:$0xff] %vm282_vm2, %v2585_v40 }
 0x467   : > { %4418 = vmatmul.msk.bf16.gmra.mxu0 %vm59_vm0, %v3253_v11  ;;  %2723 = vst.msk [vmem:[#allocation3 + $0x78] sm:$0xff] %vm379_vm3, %v2681_v12  ;;  %v3192_v61 = vld [vmem:[#allocation3 + $0x50] sm:$0xff] }
 0x468   : > { %v3234_v3 = vpack.c.bf16 %v3192_v61, %v3189_v37 }
 0x46a   : > { %3448 = vmatmul.bf16.gmra.mxu2 %v3234_v3  ;;  %2920 = vrot.lane.b32.xlu0 %v6516_v46, %s4889_s3 }
 0x46b   : > { %2918 = vrot.lane.b32.xlu2 %v6494_v8, %s4889_s3  ;;  %3016 = vrot.lane.b32.xlu1 %v6560_v62, %s4890_s24 }
 0x46c   : > { %v2999_v9 = vpop.permute.xlu0 %2998  ;;  %v2907_v18 = vpop.permute.xlu2 %2906 }
 0x46d   : > { %3042 = vst.msk [vmem:[#allocation3 + $0x68] sm:$0xff] %vm379_vm3, %v2999_v9  ;;  %v3095_v21 = vpop.permute.xlu1 %3094 }
 0x46e   : > { %3138 = vst.msk [vmem:[#allocation3 + $0x68] sm:$0xff] %vm476_vm4, %v3095_v21 }
 0x46f   : > { %2948 = vst.msk [vmem:[#allocation3 + $0x98] sm:$0xff] %vm282_vm2, %v2907_v18 }
 0x472   : > { %3014 = vrot.lane.b32.xlu0 %v6537_v19, %s4890_s24 }
 0x473   : > { %2696 = vrot.lane.b32.xlu2 %v6494_v8, %s4890_s24  ;;  %3110 = vrot.lane.b32.xlu1 %v6533_v30, %s4891_s18  ;;  %v3194_v8 = vld [vmem:[#allocation3 + $0x60] sm:$0xff] }
 0x474   : > { %v2777_v14 = vpop.permute.xlu0 %2776  ;;  %v2685_v15 = vpop.permute.xlu2 %2684 }
 0x475   : > { %2819 = vst.msk [vmem:[#allocation3 + $0x78] sm:$0xff] %vm476_vm4, %v2777_v14  ;;  %v2683_v39 = vpop.permute.xlu1 %2682  ;;  %v3195_v20 = vld [vmem:[#allocation3 + $0x68] sm:$0xff] }
 0x47a   : > { %2792 = vrot.lane.b32.xlu0 %v6537_v19, %s4891_s18 }
 0x47b   : > { %2790 = vrot.lane.b32.xlu2 %v6529_v4, %s4891_s18  ;;  %2604 = vrot.lane.b32.xlu1 %v6557_v5, %s4889_s3 }
 0x47c   : > { %v2587_v48 = vpop.permute.xlu0 %2586  ;;  %v2779_v28 = vpop.permute.xlu2 %2778  ;;  %v3197_v44 = vld [vmem:[#allocation3 + $0x78] sm:$0xff] }
 0x47d   : > { %2628 = vst.msk [vmem:[#allocation3 + $0x90] sm:$0xff] %vm282_vm2, %v2587_v48  ;;  %v3001_v13 = vpop.permute.xlu1 %3000  ;;  %v3236_v7 = vpack.c.bf16 %v3197_v44, %v3194_v8 }
 0x47e   : > { %2724 = vst.msk [vmem:[#allocation3 + $0x90] sm:$0xff] %vm379_vm3, %v2683_v39 }
 0x47f   : > { %3043 = vst.msk [vmem:[#allocation3 + $0x80] sm:$0xff] %vm379_vm3, %v3001_v13  ;;  %3404 = vmatmul.bf16.gmra.mxu3 %v3236_v7  ;;  %v3493_v13 = vpop.f32.mrf.mxu0 }
 0x480   : > { %3139 = vst.msk [vmem:[#allocation3 + $0x80] sm:$0xff] %vm476_vm4, %v3097_v29 }
 0x481   : > { %2820 = vst.msk [vmem:[#allocation3 + $0x90] sm:$0xff] %vm476_vm4, %v2779_v28 }
 0x482   : > { %2602 = vrot.lane.b32.xlu0 %v6533_v30, %s4889_s3 }
 0x483   : > { %3112 = vrot.lane.b32.xlu2 %v6557_v5, %s4891_s18  ;;  %2698 = vrot.lane.b32.xlu1 %v6516_v46, %s4890_s24  ;;  %v2972_v5 = vld [vmem:[#allocation2 + $0x120] sm:$0xff] }
 0x484   : > { %v2909_v4 = vpop.permute.xlu0 %2908  ;;  %v2911_v19 = vpop.permute.xlu2 %2910 }
 0x485   : > { %2949 = vst.msk [vmem:[#allocation3 + $0xb0] sm:$0xff] %vm282_vm2, %v2909_v4  ;;  %v2589_v26 = vpop.permute.xlu1 %2588 }
 0x486   : > { %3045 = vst.msk [vmem:[#allocation3 + $0xb0] sm:$0xff] %vm379_vm3, %v6344_v22 }
 0x487   : > { %3141 = vst.msk [vmem:[#allocation3 + $0xb0] sm:$0xff] %vm476_vm4, %v6353_v60  ;;  %v3198_v52 = vld [vmem:[#allocation3 + $0x80] sm:$0xff] }
 0x488   : > { %2629 = vst.msk [vmem:[#allocation3 + $0xa8] sm:$0xff] %vm282_vm2, %v2589_v26  ;;  %v3237_v30 = vpack.c.bf16 %v3198_v52, %v3195_v20  ;;  %v3200_v34 = vld [vmem:[#allocation3 + $0x90] sm:$0xff] }
 0x489   : > { %2725 = vst.msk [vmem:[#allocation3 + $0xa8] sm:$0xff] %vm379_vm3, %v2685_v15 }
 0x48a   : > { %2950 = vst.msk [vmem:[#allocation3 + $0xc8] sm:$0xff] %vm282_vm2, %v2911_v19  ;;  %3453 = vmatmul.bf16.gmra.mxu2 %v3237_v30  ;;  %2924 = vrot.lane.b32.xlu0 %v6569_v59, %s4889_s3 }
 0x48b   : > { %2922 = vrot.lane.b32.xlu2 %v6545_v45, %s4889_s3  ;;  %3020 = vrot.lane.b32.xlu1 %v2973_v38, %s4890_s24  ;;  %s4104_s3 = sshll.u32 (%p6747_p0), %s7146_s16, 4  ;;  %s4105_s3 = int_to_ptr.hbm [resolvable:$true] %s4104_s3 }
 0x48c   : > { %v3003_v22 = vpop.permute.xlu0 %3002  ;;  %v2689_v60 = vpop.permute.xlu2 %2688 }
 0x48d   : > { %3044 = vst.msk [vmem:[#allocation3 + $0x98] sm:$0xff] %vm379_vm3, %v3003_v22  ;;  %v3099_v46 = vpop.permute.xlu1 %3098 }
 0x48e   : > { %3140 = vst.msk [vmem:[#allocation3 + $0x98] sm:$0xff] %vm476_vm4, %v3099_v46  ;;  %v3204_v12 = vld [vmem:[#allocation3 + $0xb0] sm:$0xff] }
 0x492   : > { %3018 = vrot.lane.b32.xlu0 %v2972_v5, %s4890_s24 }
 0x493   : > { %2700 = vrot.lane.b32.xlu2 %v6545_v45, %s4890_s24  ;;  %3114 = vrot.lane.b32.xlu1 %v6571_v51, %s4891_s18 }
 0x494   : > { %v2781_v59 = vpop.permute.xlu0 %2780  ;;  %v2783_v41 = vpop.permute.xlu2 %2782 }
 0x495   : > { %2821 = vst.msk [vmem:[#allocation3 + $0xa8] sm:$0xff] %vm476_vm4, %v2781_v59  ;;  %v2593_v24 = vpop.permute.xlu1 %2592  ;;  %v3201_v2 = vld [vmem:[#allocation3 + $0x98] sm:$0xff] }
 0x496   : > { %2631 = vst.msk [vmem:[#allocation3 + $0xd8] sm:$0xff] %vm282_vm2, %v2593_v24  ;;  %v3240_v36 = vpack.c.bf16 %v3204_v12, %v3201_v2 }
 0x497   : > { %2727 = vst.msk [vmem:[#allocation3 + $0xd8] sm:$0xff] %vm379_vm3, %v2689_v60 }
 0x498   : > { %2822 = vst.msk [vmem:[#allocation3 + $0xc0] sm:$0xff] %vm476_vm4, %v2783_v41 }
 0x49a   : > { %3458 = vmatmul.bf16.gmra.mxu2 %v3240_v36  ;;  %2796 = vrot.lane.b32.xlu0 %v2972_v5, %s4891_s18 }
 0x49b   : > { %2794 = vrot.lane.b32.xlu2 %v6560_v62, %s4891_s18 }
 0x49c   : > { %v2913_v45 = vpop.permute.xlu0 %2912  ;;  %v3105_v51 = vpop.permute.xlu2 %3104  ;;  %v3203_v55 = vld [vmem:[#allocation3 + $0xa8] sm:$0xff] }
 0x49d   : > { %2951 = vst.msk [vmem:[#allocation3 + $0xe0] sm:$0xff] %vm282_vm2, %v2913_v45  ;;  %v3103_v33 = vpop.permute.xlu1 %3102  ;;  %v3239_v53 = vpack.c.bf16 %v3203_v55, %v3200_v34 }
 0x49f   : > { %3409 = vmatmul.bf16.gmra.mxu3 %v3239_v53  ;;  %v3206_v11 = vld [vmem:[#allocation3 + $0xc0] sm:$0xff] }
 0x4a3   : > { %3116 = vrot.lane.b32.xlu2 %v3069_v43, %s4891_s18 }
 0x4a4   : > { %v3007_v0 = vpop.permute.xlu0 %3006 }
 0x4a5   : > { %3046 = vst.msk [vmem:[#allocation3 + $0xc8] sm:$0xff] %vm379_vm3, %v3007_v0  ;;  %v2691_v17 = vpop.permute.xlu1 %2690  ;;  %v2915_v35 = vpop.permute.xlu2 %2914 }
 0x4a6   : > { %3142 = vst.msk [vmem:[#allocation3 + $0xc8] sm:$0xff] %vm476_vm4, %v3103_v33 }
 0x4a7   : > { %2952 = vst.msk [vmem:[#allocation3 + $0xf8] sm:$0xff] %vm282_vm2, %v2915_v35 }
 0x4ac   : > { %v2785_v62 = vpop.permute.xlu0 %2784 }
 0x4ad   : > { %2823 = vst.msk [vmem:[#allocation3 + $0xd8] sm:$0xff] %vm476_vm4, %v2785_v62  ;;  %v3009_v49 = vpop.permute.xlu1 %3008  ;;  %v2693_v25 = vpop.permute.xlu2 %2692  ;;  %v3207_v9 = vld [vmem:[#allocation3 + $0xc8] sm:$0xff] }
 0x4ae   : > { %3047 = vst.msk [vmem:[#allocation3 + $0xe0] sm:$0xff] %vm379_vm3, %v3009_v49 }
 0x4af   : > { %3143 = vst.msk [vmem:[#allocation3 + $0xe0] sm:$0xff] %vm476_vm4, %v3105_v51  ;;  %v3495_v51 = vpop.f32.mrf.mxu0 }
 0x4b4   : > { %v2595_v29 = vpop.permute.xlu0 %2594  ;;  %v3209_v40 = vld [vmem:[#allocation3 + $0xd8] sm:$0xff] }
 0x4b5   : > { %2632 = vst.msk [vmem:[#allocation3 + $0xf0] sm:$0xff] %vm282_vm2, %v2595_v29  ;;  %v2597_v37 = vpop.permute.xlu1 %2596  ;;  %v2787_v61 = vpop.permute.xlu2 %2786  ;;  %v3242_v3 = vpack.c.bf16 %v3209_v40, %v3206_v11 }
 0x4b6   : > { %2728 = vst.msk [vmem:[#allocation3 + $0xf0] sm:$0xff] %vm379_vm3, %v2691_v17  ;;  %v3210_v18 = vld [vmem:[#allocation3 + $0xe0] sm:$0xff] }
 0x4b7   : > { %2633 = vst.msk [vmem:[#allocation3 + $0x108] sm:$0xff] %vm282_vm2, %v2597_v37  ;;  %3414 = vmatmul.bf16.gmra.mxu3 %v3242_v3  ;;  %v3243_v21 = vpack.c.bf16 %v3210_v18, %v3207_v9 }
 0x4b8   : > { %2729 = vst.msk [vmem:[#allocation3 + $0x108] sm:$0xff] %vm379_vm3, %v2693_v25 }
 0x4b9   : > { %2824 = vst.msk [vmem:[#allocation3 + $0xf0] sm:$0xff] %vm476_vm4, %v2787_v61  ;;  %3463 = vmatmul.bf16.gmra.mxu2 %v3243_v21 }
 0x4bc   : > { %v2917_v14 = vpop.permute.xlu0 %2916 }
 0x4bd   : > { %2953 = vst.msk [vmem:[#allocation3 + $0x110] sm:$0xff] %vm282_vm2, %v2917_v14  ;;  %v3107_v15 = vpop.permute.xlu1 %3106  ;;  %v3109_v39 = vpop.permute.xlu2 %3108 }
 0x4c0   : > { %v3212_v59 = vld [vmem:[#allocation3 + $0xf0] sm:$0xff] }
 0x4c2   : > { %v3395_v44 = vpop.f32.mrf.mxu3 }
 0x4c4   : > { %v3011_v48 = vpop.permute.xlu0 %3010 }
 0x4c5   : > { %3048 = vst.msk [vmem:[#allocation3 + $0xf8] sm:$0xff] %vm379_vm3, %v3011_v48  ;;  %v3013_v28 = vpop.permute.xlu1 %3012  ;;  %v2919_v8 = vpop.permute.xlu2 %2918 }
 0x4c6   : > { %3144 = vst.msk [vmem:[#allocation3 + $0xf8] sm:$0xff] %vm476_vm4, %v3107_v15 }
 0x4c7   : > { %3049 = vst.msk [vmem:[#allocation3 + $0x110] sm:$0xff] %vm379_vm3, %v3013_v28 }
 0x4c8   : > { %3145 = vst.msk [vmem:[#allocation3 + $0x110] sm:$0xff] %vm476_vm4, %v3109_v39 }
 0x4c9   : > { %2954 = vst.msk [vmem:[#allocation3 + $0x128] sm:$0xff] %vm282_vm2, %v2919_v8 }
 0x4ca   : > { %v3397_v46 = vpop.f32.mrf.mxu3 }
 0x4cc   : > { %v2789_v7 = vpop.permute.xlu0 %2788 }
 0x4cd   : > { %v3444_v4 = vpop.f32.mrf.mxu2  ;;  %2825 = vst.msk [vmem:[#allocation3 + $0x108] sm:$0xff] %vm476_vm4, %v2789_v7  ;;  %v2601_v19 = vpop.permute.xlu1 %2600  ;;  %v3213_v26 = vld [vmem:[#allocation3 + $0xf8] sm:$0xff] }
 0x4ce   : > { %v3445_v20 = vadd.f32 %v3444_v4, %v3395_v44  ;;  %2635 = vst.msk [vmem:[#allocation3 + $0x138] sm:$0xff] %vm282_vm2, %v2601_v19  ;;  %v2697_v52 = vpop.permute.xlu2 %2696 }
 0x4cf   : > { %2731 = vst.msk [vmem:[#allocation3 + $0x138] sm:$0xff] %vm379_vm3, %v2697_v52  ;;  %v3216_v30 = vld [vmem:[#allocation3 + $0x110] sm:$0xff] }
 0x4d0   : > { %v3494_v38 = vadd.f32 %v3493_v13, %v3445_v20  ;;  %v3246_v22 = vpack.c.bf16 %v3216_v30, %v3213_v26 }
 0x4d2   : > { %v6688_v56 = vadd.f32 %v4879_v56, %v3494_v38   ;;  %3468 = vmatmul.bf16.gmra.mxu2 %v3246_v22 }
 0x4d4   : > { %v7154_v60 = vmov %v6688_v56  ;;  %v2599_v5 = vpop.permute.xlu0 %2598  ;;  %v3215_v41 = vld [vmem:[#allocation3 + $0x108] sm:$0xff] }
 0x4d5   : > { %v3446_v24 = vpop.f32.mrf.mxu2  ;;  %2634 = vst.msk [vmem:[#allocation3 + $0x120] sm:$0xff] %vm282_vm2, %v2599_v5  ;;  %v2695_v2 = vpop.permute.xlu1 %2694  ;;  %v3245_v12 = vpack.c.bf16 %v3215_v41, %v3212_v59 }
 0x4d6   : > { %v3447_v36 = vadd.f32 %v3446_v24, %v3397_v46  ;;  %2730 = vst.msk [vmem:[#allocation3 + $0x120] sm:$0xff] %vm379_vm3, %v2695_v2  ;;  %v2791_v45 = vpop.permute.xlu2 %2790 }
 0x4d7   : > { %2826 = vst.msk [vmem:[#allocation3 + $0x120] sm:$0xff] %vm476_vm4, %v2791_v45  ;;  %3419 = vmatmul.bf16.gmra.mxu3 %v3245_v12 }
 0x4d8   : > { %v3496_v34 = vadd.f32 %v3495_v51, %v3447_v36 }
 0x4da   : > { %v6694_v54 = vadd.f32 %v4875_v54, %v3496_v34  }
 0x4dc   : > { %v7155_v55 = vmov %v6694_v54  ;;  %v2921_v56 = vpop.permute.xlu0 %2920  ;;  %v3498_v54 = vpop.f32.mrf.mxu0 }
 0x4dd   : > { %2955 = vst.msk [vmem:[#allocation3 + $0x140] sm:$0xff] %vm282_vm2, %v2921_v56  ;;  %v3017_v33 = vpop.permute.xlu1 %3016 }
 0x4de   : > { %3051 = vst.msk [vmem:[#allocation3 + $0x140] sm:$0xff] %vm379_vm3, %v3017_v33  ;;  %v3113_v53 = vpop.permute.xlu2 %3112  ;;  %v3218_v14 = vld [vmem:[#allocation3 + $0x120] sm:$0xff] }
 0x4df   : > { %3147 = vst.msk [vmem:[#allocation3 + $0x140] sm:$0xff] %vm476_vm4, %v3113_v53 }
 0x4e2   : > { %v3400_v35 = vpop.f32.mrf.mxu3 }
 0x4e4   : > { %v3015_v43 = vpop.permute.xlu0 %3014  ;;  %v3500_v13 = vpop.f32.mrf.mxu0 }
 0x4e5   : > { %3050 = vst.msk [vmem:[#allocation3 + $0x128] sm:$0xff] %vm379_vm3, %v3015_v43  ;;  %v3111_v0 = vpop.permute.xlu1 %3110 }
 0x4e6   : > { %3146 = vst.msk [vmem:[#allocation3 + $0x128] sm:$0xff] %vm476_vm4, %v3111_v0  ;;  %v2923_v17 = vpop.permute.xlu2 %2922  ;;  %v3222_v11 = vld [vmem:[#allocation3 + $0x140] sm:$0xff] }
 0x4e7   : > { %2956 = vst.msk [vmem:[#allocation3 + $0x158] sm:$0xff] %vm282_vm2, %v2923_v17 }
 0x4ea   : > { %v3402_v18 = vpop.f32.mrf.mxu3 }
 0x4ec   : > { %v2793_v62 = vpop.permute.xlu0 %2792  ;;  %v3503_v46 = vpop.f32.mrf.mxu0 }
 0x4ed   : > { %v3449_v49 = vpop.f32.mrf.mxu2  ;;  %2827 = vst.msk [vmem:[#allocation3 + $0x138] sm:$0xff] %vm476_vm4, %v2793_v62  ;;  %v2605_v25 = vpop.permute.xlu1 %2604  ;;  %v3219_v29 = vld [vmem:[#allocation3 + $0x128] sm:$0xff] }
 0x4ee   : > { %v3450_v40 = vadd.f32 %v3449_v49, %v3400_v35  ;;  %2637 = vst.msk [vmem:[#allocation3 + $0x168] sm:$0xff] %vm282_vm2, %v2605_v25  ;;  %v2701_v37 = vpop.permute.xlu2 %2700  ;;  %v3249_v61 = vpack.c.bf16 %v3222_v11, %v3219_v29 }
 0x4ef   : > { %2733 = vst.msk [vmem:[#allocation3 + $0x168] sm:$0xff] %vm379_vm3, %v2701_v37 }
 0x4f0   : > { %v3499_v3 = vadd.f32 %v3498_v54, %v3450_v40  ;;  %3473 = vmatmul.bf16.gmra.mxu2 %v3249_v61 }
 0x4f2   : > { %v6706_v16 = vadd.f32 %v4871_v16, %v3499_v3  }
 0x4f4   : > { %v7156_v9 = vmov %v6706_v16  ;;  %v2603_v21 = vpop.permute.xlu0 %2602  ;;  %v3221_v15 = vld [vmem:[#allocation3 + $0x138] sm:$0xff]  ;;  %v3505_v33 = vpop.f32.mrf.mxu0 }
 0x4f5   : > { %v3451_v39 = vpop.f32.mrf.mxu2  ;;  %2636 = vst.msk [vmem:[#allocation3 + $0x150] sm:$0xff] %vm282_vm2, %v2603_v21  ;;  %v2699_v48 = vpop.permute.xlu1 %2698  ;;  %v3248_v28 = vpack.c.bf16 %v3221_v15, %v3218_v14 }
 0x4f6   : > { %v3452_v8 = vadd.f32 %v3451_v39, %v3402_v18  ;;  %2732 = vst.msk [vmem:[#allocation3 + $0x150] sm:$0xff] %vm379_vm3, %v2699_v48  ;;  %v2795_v44 = vpop.permute.xlu2 %2794 }
 0x4f7   : > { %2828 = vst.msk [vmem:[#allocation3 + $0x150] sm:$0xff] %vm476_vm4, %v2795_v44  ;;  %3424 = vmatmul.bf16.gmra.mxu3 %v3248_v28 }
 0x4f8   : > { %v3501_v7 = vadd.f32 %v3500_v13, %v3452_v8 }
 0x4fa   : > { %v6712_v31 = vadd.f32 %v4867_v31, %v3501_v7  }
 0x4fc   : > { %v7157_v4 = vmov %v6712_v31  ;;  %v2925_v16 = vpop.permute.xlu0 %2924  ;;  %v3508_v17 = vpop.f32.mrf.mxu0 }
 0x4fd   : > { %2957 = vst.msk [vmem:[#allocation3 + $0x170] sm:$0xff] %vm282_vm2, %v2925_v16  ;;  %v3021_v19 = vpop.permute.xlu1 %3020 }
 0x4fe   : > { %3053 = vst.msk [vmem:[#allocation3 + $0x170] sm:$0xff] %vm379_vm3, %v3021_v19  ;;  %v3117_v26 = vpop.permute.xlu2 %3116  ;;  %v3224_v12 = vld [vmem:[#allocation3 + $0x150] sm:$0xff] }
 0x4ff   : > { %3149 = vst.msk [vmem:[#allocation3 + $0x170] sm:$0xff] %vm476_vm4, %v3117_v26 }
 0x502   : > { %v3405_v30 = vpop.f32.mrf.mxu3 }
 0x504   : > { %v3019_v20 = vpop.permute.xlu0 %3018  ;;  %v3510_v11 = vpop.f32.mrf.mxu0 }
 0x505   : > { %3052 = vst.msk [vmem:[#allocation3 + $0x158] sm:$0xff] %vm379_vm3, %v3019_v20  ;;  %v3115_v52 = vpop.permute.xlu1 %3114 }
 0x506   : > { %3148 = vst.msk [vmem:[#allocation3 + $0x158] sm:$0xff] %vm476_vm4, %v3115_v52  ;;  %v3228_v38 = vld [vmem:[#allocation3 + $0x170] sm:$0xff] }
 0x50a   : > { %v3407_v45 = vpop.f32.mrf.mxu3 }
 0x50c   : > { %v2797_v22 = vpop.permute.xlu0 %2796  ;;  %v3513_v3 = vpop.f32.mrf.mxu0 }
 0x50d   : > { %v3454_v31 = vpop.f32.mrf.mxu2  ;;  %2829 = vst.msk [vmem:[#allocation3 + $0x168] sm:$0xff] %vm476_vm4, %v2797_v22  ;;  %v3225_v5 = vld [vmem:[#allocation3 + $0x158] sm:$0xff] }
 0x50e   : > { %v3455_v59 = vadd.f32 %v3454_v31, %v3405_v30  ;;  %v3252_v41 = vpack.c.bf16 %v3228_v38, %v3225_v5 }
 0x510   : > { %v3504_v24 = vadd.f32 %v3503_v46, %v3455_v59  ;;  %3478 = vmatmul.bf16.gmra.mxu2 %v3252_v41 }
 0x512   : > { %v6721_v50 = vadd.f32 %v4863_v50, %v3504_v24  }
 0x514   : > { %v7158_v2 = vmov %v6721_v50  ;;  %v3227_v36 = vld [vmem:[#allocation3 + $0x168] sm:$0xff] }
 0x515   : > { %v3456_v51 = vpop.f32.mrf.mxu2  ;;  %v3251_v34 = vpack.c.bf16 %v3227_v36, %v3224_v12 }
 0x516   : > { %v3457_v56 = vadd.f32 %v3456_v51, %v3407_v45 }
 0x517   : > { %3429 = vmatmul.bf16.gmra.mxu3 %v3251_v34 }
 0x518   : > { %v3506_v53 = vadd.f32 %v3505_v33, %v3457_v56 }
 0x51a   : > { %v6724_v27 = vadd.f32 %v4859_v27, %v3506_v53  }
 0x51c   : > { %v7159_v43 = vmov %v6724_v27 }
 0x51d   : > { %v3459_v0 = vpop.f32.mrf.mxu2 }
 0x522   : > { %v3410_v35 = vpop.f32.mrf.mxu3 }
 0x523   : > { %v3460_v54 = vadd.f32 %v3459_v0, %v3410_v35 }
 0x525   : > { %v3509_v62 = vadd.f32 %v3508_v17, %v3460_v54  ;;  %v3461_v50 = vpop.f32.mrf.mxu2 }
 0x527   : > { %v6727_v32 = vadd.f32 %v4855_v32, %v3509_v62  }
 0x529   : > { %v7160_v49 = vmov %v6727_v32  ;;  %v3515_v32 = vpop.f32.mrf.mxu0 }
 0x52a   : > { %v3412_v25 = vpop.f32.mrf.mxu3 }
 0x52b   : > { %v3462_v29 = vadd.f32 %v3461_v50, %v3412_v25  ;;  %v7177_v50 = vmov %v7158_v2 }
 0x52d   : > { %v3511_v40 = vadd.f32 %v3510_v11, %v3462_v29  ;;  %v3552_v29 = vld [vmem:[%s7137_s7 + $0x18] sm:$0xff] (%p6747_p0)  ;;  %v3551_v11 = vld [vmem:[%s7137_s7 + $0x10] sm:$0xff] (%p6747_p0) }
 0x52e   :  { %4521 = vmatpush.msra.mxu1 (%p6747_p0), %v3552_v29  ;;  %4522 = vmatpush.msra.mxu2 (%p6747_p0), %v3552_v29 }
 0x52f   : > { %v6730_v47 = vadd.f32 %v4851_v47, %v3511_v40   ;;  %v3550_v40 = vld [vmem:[%s7137_s7 + $0x8] sm:$0xff] (%p6747_p0)  ;;  %3617 = vmatpush.msra.mxu0 (%p6747_p0), %v3552_v29 }
 0x530   :  { %4523 = vmatpush.msra.mxu1 (%p6747_p0), %v3551_v11  ;;  %4524 = vmatpush.msra.mxu2 (%p6747_p0), %v3551_v11 }
 0x531   : > { %v7161_v37 = vmov %v6730_v47  ;;  %v3518_v13 = vpop.f32.mrf.mxu0  ;;  %3618 = vmatpush.msra.mxu0 (%p6747_p0), %v3551_v11 }
 0x532   :  { %4525 = vmatpush.msra.mxu1 (%p6747_p0), %v3550_v40  ;;  %4526 = vmatpush.msra.mxu2 (%p6747_p0), %v3550_v40 }
 0x533   :  { %3619 = vmatpush.msra.mxu0 (%p6747_p0), %v3550_v40 }
 0x53a   : > { %v3415_v61 = vpop.f32.mrf.mxu3 }
 0x53c   : > { %v3464_v18 = vpop.f32.mrf.mxu2 }
 0x53d   : > { %v3465_v27 = vadd.f32 %v3464_v18, %v3415_v61 }
 0x53f   : > { %v3514_v21 = vadd.f32 %v3513_v3, %v3465_v27  ;;  %v7176_v27 = vmov %v7159_v43 }
 0x541   : > { %v6733_v6 = vadd.f32 %v4847_v6, %v3514_v21  }
 0x542   : > { %v3417_v15 = vpop.f32.mrf.mxu3 }
 0x543   : > { %v7162_v14 = vmov %v6733_v6  ;;  %v3520_v6 = vpop.f32.mrf.mxu0 }
 0x544   : > { %v3466_v39 = vpop.f32.mrf.mxu2 }
 0x545   : > { %v3467_v48 = vadd.f32 %v3466_v39, %v3417_v15 }
 0x547   : > { %v3516_v28 = vadd.f32 %v3515_v32, %v3467_v48  ;;  %v7175_v32 = vmov %v7160_v49 }
 0x549   : > { %v6736_v10 = vadd.f32 %v4843_v10, %v3516_v28  }
 0x54b   : > { %v7163_v8 = vmov %v6736_v10  ;;  %v3523_v46 = vpop.f32.mrf.mxu0 }
 0x553   : > { %v3525_v36 = vpop.f32.mrf.mxu0 }
 0x555   : > { %v3469_v44 = vpop.f32.mrf.mxu2 }
 0x55a   : > { %v3420_v7 = vpop.f32.mrf.mxu3 }
 0x55b   : > { %v3470_v47 = vadd.f32 %v3469_v44, %v3420_v7  ;;  %v3528_v34 = vpop.f32.mrf.mxu0 }
 0x55d   : > { %v3519_v16 = vadd.f32 %v3518_v13, %v3470_v47  ;;  %v3471_v26 = vpop.f32.mrf.mxu2  ;;  %v7174_v47 = vmov %v7161_v37 }
 0x55f   : > { %v6739_v57 = vadd.f32 %v4839_v57, %v3519_v16   ;;  %v7179_v16 = vmov %v7156_v9 }
 0x561   : > { %v7164_v19 = vmov %v6739_v57 }
 0x562   : > { %v3422_v20 = vpop.f32.mrf.mxu3 }
 0x563   : > { %v3472_v52 = vadd.f32 %v3471_v26, %v3422_v20  ;;  %v3530_v54 = vpop.f32.mrf.mxu0 }
 0x565   : > { %v3521_v30 = vadd.f32 %v3520_v6, %v3472_v52  ;;  %v7173_v6 = vmov %v7162_v14 }
 0x567   : > { %v3544_v38 = vadd.f32 %v4835_v63, %v3521_v30  }
 0x573   : > { %v3474_v22 = vpop.f32.mrf.mxu2 }
 0x57a   : > { %v3425_v31 = vpop.f32.mrf.mxu3 }
 0x57b   : > { %v3475_v5 = vadd.f32 %v3474_v22, %v3425_v31  ;;  %v3476_v41 = vpop.f32.mrf.mxu2  ;;  %v7178_v31 = vmov %v7157_v4 }
 0x57d   : > { %v3524_v10 = vadd.f32 %v3523_v46, %v3475_v5  ;;  %v3858_v5 = vld [vmem:[%s7143_s13 + $0x38] sm:$0xff] (%p6747_p0) }
 0x57f   : > { %v3545_v59 = vadd.f32 %v4831_v58, %v3524_v10   ;;  %v7172_v10 = vmov %v7163_v8 }
 0x580   :  { %v3954_v10 = vld [vmem:[%s7144_s14 + $0x38] sm:$0xff] (%p6747_p0) }
 0x581   : > { %v7169_v58 = vmov %v3545_v59 }
 0x582   : > { %v3427_v24 = vpop.f32.mrf.mxu3  ;;  %v3549_v58 = vld [vmem:[%s7137_s7] sm:$0xff] (%p6747_p0) }
 0x583   : > { %v3477_v12 = vadd.f32 %v3476_v41, %v3427_v24  ;;  %4527 = vmatpush.msra.mxu1 (%p6747_p0), %v3549_v58  ;;  %4528 = vmatpush.msra.mxu2 (%p6747_p0), %v3549_v58 }
 0x584   :  { %4426 = vmatmul.msk.f32.vlgmr.msra.gmra.mxu1 (%p6747_p0), %vm59_vm0, %v7161_v37  ;;  %4430 = vmatmul.msk.f32.vlgmr.msra.gmra.mxu2 (%p6747_p0), %vm59_vm0, %v3544_v38 }
 0x585   : > { %v3526_v45 = vadd.f32 %v3525_v36, %v3477_v12  ;;  %3620 = vmatpush.msra.mxu0 (%p6747_p0), %v3549_v58 }
 0x586   :  { %4419 = vmatmul.msk.f32.vlgmr.msra.gmra.mxu0 (%p6747_p0), %vm59_vm0, %v7154_v60 }
 0x587   : > { %v3546_v51 = vadd.f32 %v4827_v1, %v3526_v45  }
 0x589   : > { %v7168_v1 = vmov %v3546_v51 }
 0x58a   :  { %v4892_v1 = vmov (%p6747_p0), 2  }
 0x58b   :  { %4682 = vset.pattern.permute.xlu0 (%p6747_p0), %v4892_v1 }
 0x58c   :  { %4431 = vmatmul.msk.f32.gmra.mxu2 (%p6747_p0), %vm59_vm0, %v3545_v59  ;;  %4427 = vmatmul.msk.f32.gmra.mxu1 (%p6747_p0), %vm59_vm0, %v7162_v14 }
 0x58e   :  { %4420 = vmatmul.msk.f32.gmra.mxu0 (%p6747_p0), %vm59_vm0, %v7155_v55 }
 0x593   : > { %v3479_v57 = vpop.f32.mrf.mxu2 }
 0x594   :  { %4428 = vmatmul.msk.f32.gmra.mxu1 (%p6747_p0), %vm59_vm0, %v7163_v8  ;;  %4432 = vmatmul.msk.f32.gmra.mxu2 (%p6747_p0), %vm59_vm0, %v3546_v51  ;;  %v3862_v51 = vld [vmem:[%s7143_s13 + $0x58] sm:$0xff] (%p6747_p0) }
 0x596   :  { %4421 = vmatmul.msk.f32.gmra.mxu0 (%p6747_p0), %vm59_vm0, %v7156_v9 }
 0x59a   : > { %v3430_v56 = vpop.f32.mrf.mxu3 }
 0x59b   : > { %v3480_v33 = vadd.f32 %v3479_v57, %v3430_v56  ;;  %v3481_v63 = vpop.f32.mrf.mxu2  ;;  %v7171_v57 = vmov %v7164_v19  ;;  %v7181_v56 = vmov %v7154_v60  ;;  %v6843_v60 = vld [vmem:[%s7138_s8] ss:$0 sm:$0xff] (%p6747_p0) }
 0x59c   :  { %4429 = vmatmul.msk.f32.gmra.mxu1 (%p6747_p0), %vm59_vm0, %v7164_v19  ;;  %v3958_v57 = vld [vmem:[%s7144_s14 + $0x58] sm:$0xff] (%p6747_p0) }
 0x59d   : > { %v3529_v53 = vadd.f32 %v3528_v34, %v3480_v33 }
 0x59e   :  { %4422 = vmatmul.msk.f32.gmra.mxu0 (%p6747_p0), %vm59_vm0, %v7157_v4 }
 0x59f   : > { %v3547_v0 = vadd.f32 %v4823_v23, %v3529_v53  }
 0x5a1   : > { %v7167_v23 = vmov %v3547_v0  ;;  %4433 = vmatmul.msk.f32.gmra.mxu2 (%p6747_p0), %vm59_vm0, %v3547_v0 }
 0x5a2   : > { %v3432_v17 = vpop.f32.mrf.mxu3  ;;  %v4893_v23 = vmov (%p6747_p0), 0  }
 0x5a3   : > { %v3482_v35 = vadd.f32 %v3481_v63, %v3432_v17  ;;  %v7170_v63 = vmov %v3544_v38  ;;  %4680 = vset.pattern.permute.xlu2 (%p6747_p0), %v4893_v23 }
 0x5a5   : > { %v3531_v62 = vadd.f32 %v3530_v54, %v3482_v35  ;;  %v7180_v54 = vmov %v7155_v55  ;;  %1257 = sbr.rel (!%p6747_p0) target bundleno = 568 (0x238), region = 104 }
 0x5a6   :  { %4423 = vmatmul.msk.f32.gmra.mxu0 (%p6747_p0), %vm59_vm0, %v7158_v2 }
 0x5a7   : > { %v3548_v25 = vadd.f32 %v4819_v42, %v3531_v62  }
 0x5a9   : > { %v7166_v42 = vmov %v3548_v25  ;;  %4434 = vmatmul.msk.f32.gmra.mxu2 (%p6747_p0), %vm59_vm0, %v3548_v25 }
 0x5aa   :  { %v4894_v42 = vmov 1  }
 0x5ab   :  { %4684 = vset.pattern.permute.xlu1 %v4894_v42 }
 0x5ae   :  { %4424 = vmatmul.msk.f32.gmra.mxu0 %vm59_vm0, %v7159_v43 }
 0x5b6   :  { %4425 = vmatmul.msk.f32.gmra.mxu0 %vm59_vm0, %v7160_v49 }
 0x601   :  { %v3643_v55 = vpop.f32.mrf.mxu1 }
 0x602   :  { %v3644_v9 = vadd.f32 %v6843_v60, %v3643_v55 }
 0x603   :  { %v3622_v4 = vpop.f32.mrf.mxu0 }
 0x604   :  { %3992 = vperm.xlu0 %4682, %v3644_v9   ;;  %3734 = vperm.xlu2 %4680, %v3644_v9   ;;  %v6848_v49 = vadd.f32 %v6843_v60, %v3622_v4 }
 0x607   :  { %v3655_v2 = vpop.f32.mrf.mxu2 }
 0x608   :  { %v3656_v43 = vadd.f32 %v6843_v60, %v3655_v2  ;;  %v3694_v2 = vld [vmem:[%s7139_s9 + $0x68] sm:$0xff] }
 0x609   :  { %v3646_v50 = vpop.f32.mrf.mxu1 }
 0x60a   :  { %3912 = vperm.xlu1 %4684, %v3656_v43   ;;  %v3647_v61 = vadd.f32 %v6843_v60, %v3646_v50 }
 0x60b   :  { %v3625_v18 = vpop.f32.mrf.mxu0 }
 0x60c   :  { %3699 = vperm.xlu2 %4680, %v6848_v49   ;;  %v6873_v44 = vadd.f32 %v6843_v60, %v3625_v18  ;;  %v3691_v18 = vld [vmem:[%s7139_s9 + $0x50] sm:$0xff] }
 0x60f   :  { %v3658_v37 = vpop.f32.mrf.mxu2 }
 0x610   :  { %v3659_v3 = vadd.f32 %v6843_v60, %v3658_v37 }
 0x611   :  { %v3649_v27 = vpop.f32.mrf.mxu1 }
 0x612   :  { %4686 = vset.pattern.permute.xlu1 %v4893_v23  ;;  %4012 = vperm.xlu0 %4682, %v3659_v3   ;;  %v3650_v21 = vadd.f32 %v6843_v60, %v3649_v27 }
 0x613   :  { %3739 = vperm.xlu1 %4686, %v3647_v61   ;;  %v3628_v14 = vpop.f32.mrf.mxu0 }
 0x614   :  { %4681 = vset.pattern.permute.xlu2 %v4894_v42  ;;  %v6864_v32 = vadd.f32 %v6843_v60, %v3628_v14  ;;  %v3690_v14 = vld [vmem:[%s7139_s9 + $0x48] sm:$0xff] }
 0x615   :  { %3896 = vperm.xlu2 %4681, %v3644_v9  }
 0x617   :  { %v3661_v15 = vpop.f32.mrf.mxu2 }
 0x618   :  { %v3662_v39 = vadd.f32 %v6843_v60, %v3661_v15 }
 0x619   :  { %v3652_v26 = vpop.f32.mrf.mxu1 }
 0x61a   :  { %4691 = vset.pattern.permute.xlu0 %v4893_v23  ;;  %v3653_v20 = vadd.f32 %v6843_v60, %v3652_v26 }
 0x61b   :  { %4689 = vset.pattern.permute.xlu1 %v4892_v1  ;;  %3744 = vperm.xlu0 %4691, %v3650_v21   ;;  %v3631_v48 = vpop.f32.mrf.mxu0 }
 0x61c   :  { %3996 = vperm.xlu1 %4689, %v3647_v61   ;;  %v6867_v28 = vadd.f32 %v6843_v60, %v3631_v48  ;;  %v3689_v48 = vld [vmem:[%s7139_s9 + $0x40] sm:$0xff] }
 0x61d   :  { %4683 = vset.pattern.permute.xlu2 %v4893_v23 }
 0x61e   :  { %3754 = vperm.xlu2 %4683, %v3656_v43  }
 0x623   :  { %4694 = vset.pattern.permute.xlu0 %v4894_v42  ;;  %v3634_v7 = vpop.f32.mrf.mxu0 }
 0x624   :  { %4690 = vset.pattern.permute.xlu1 %v4893_v23  ;;  %3920 = vperm.xlu0 %4694, %v3662_v39   ;;  %v3664_v8 = vpop.f32.mrf.mxu2  ;;  %v3635_v30 = vadd.f32 %v6843_v60, %v3634_v7 }
 0x625   :  { %3759 = vperm.xlu1 %4690, %v3659_v3   ;;  %v3665_v13 = vadd.f32 %v6843_v60, %v3664_v8 }
 0x626   :  { %4685 = vset.pattern.permute.xlu2 %v4892_v1 }
 0x627   :  { %4008 = vperm.xlu2 %4685, %v3656_v43  }
 0x62b   :  { %v3637_v19 = vpop.f32.mrf.mxu0 }
 0x62c   :  { %4697 = vset.pattern.permute.xlu0 %v4893_v23  ;;  %v3667_v47 = vpop.f32.mrf.mxu2  ;;  %v3638_v46 = vadd.f32 %v6843_v60, %v3637_v19 }
 0x62d   :  { %3714 = vperm.xlu0 %4697, %v6867_v28   ;;  %3709 = vperm.xlu1 %4690, %v6864_v32   ;;  %v3668_v16 = vadd.f32 %v6843_v60, %v3667_v47 }
 0x62f   :  { %4687 = vset.pattern.permute.xlu2 %v4893_v23 }
 0x630   :  { %3704 = vperm.xlu2 %4687, %v6873_v44  }
 0x633   :  { %v3640_v52 = vpop.f32.mrf.mxu0 }
 0x634   :  { %v3641_v6 = vadd.f32 %v6843_v60, %v3640_v52  ;;  %v3696_v60 = vld [vmem:[%s7139_s9 + $0x78] sm:$0xff] }
 0x635   :  { %3769 = vperm.xlu0 %4697, %v3665_v13   ;;  %4692 = vset.pattern.permute.xlu1 %v4892_v1  ;;  %v3866_v52 = vld [vmem:[%s7143_s13 + $0x78] sm:$0xff] }
 0x636   :  { %4000 = vperm.xlu1 %4692, %v3650_v21  }
 0x638   :  { %4688 = vset.pattern.permute.xlu2 %v4894_v42 }
 0x639   :  { %3900 = vperm.xlu2 %4688, %v3647_v61   ;;  %v3692_v61 = vld [vmem:[%s7139_s9 + $0x58] sm:$0xff] }
 0x63d   :  { %3774 = vperm.xlu0 %4697, %v3668_v16  }
 0x63e   :  { %4693 = vset.pattern.permute.xlu1 %v4893_v23 }
 0x63f   :  { %3764 = vperm.xlu1 %4693, %v3662_v39  }
 0x641   :  { %3916 = vperm.xlu2 %4688, %v3659_v3  }
 0x645   :  { %4701 = vset.pattern.permute.xlu0 %v4894_v42 }
 0x646   :  { %3928 = vperm.xlu0 %4701, %v3668_v16  }
 0x647   :  { %4695 = vset.pattern.permute.xlu1 %v4892_v1 }
 0x648   :  { %4016 = vperm.xlu1 %4695, %v3662_v39  }
 0x649   :  { %4696 = vset.pattern.permute.xlu2 %v4893_v23 }
 0x64a   :  { %3749 = vperm.xlu2 %4696, %v3653_v20  }
 0x64e   :  { %4704 = vset.pattern.permute.xlu0 %v4893_v23 }
 0x64f   :  { %3729 = vperm.xlu0 %4704, %v3641_v6  }
 0x650   :  { %4698 = vset.pattern.permute.xlu1 %v4894_v42 }
 0x651   :  { %3908 = vperm.xlu1 %4698, %v3653_v20  }
 0x652   :  { %4699 = vset.pattern.permute.xlu2 %v4892_v1 }
 0x653   :  { %4004 = vperm.xlu2 %4699, %v3653_v20  }
 0x657   :  { %4705 = vset.pattern.permute.xlu0 %v4894_v42 }
 0x658   :  { %3904 = vperm.xlu0 %4705, %v3650_v21  }
 0x659   :  { %3924 = vperm.xlu1 %4698, %v3665_v13  }
 0x65b   :  { %4020 = vperm.xlu2 %4699, %v3665_v13   ;;  %v3687_v13 = vld [vmem:[%s7139_s9 + $0x30] sm:$0xff] }
 0x65e   :  { %v6892_v38 = vpop.permute.xlu2 %3734 }
 0x660   :  { %3884 = vperm.xlu0 %4705, %v3635_v30  }
 0x661   :  { %4702 = vset.pattern.permute.xlu1 %v4892_v1 }
 0x662   :  { %4024 = vperm.xlu1 %4702, %v3668_v16  }
 0x663   :  { %4700 = vset.pattern.permute.xlu2 %v4893_v23 }
 0x664   :  { %3719 = vperm.xlu2 %4700, %v3635_v30  }
 0x666   :  { %v6896_v22 = vpop.permute.xlu2 %3699 }
 0x668   :  { %4710 = vset.pattern.permute.xlu0 %v4892_v1 }
 0x669   :  { %3972 = vperm.xlu0 %4710, %v6864_v32  }
 0x66a   :  { %4703 = vset.pattern.permute.xlu1 %v4893_v23 }
 0x66b   :  { %3724 = vperm.xlu1 %4703, %v3638_v46  }
 0x66c   :  { %4707 = vset.pattern.permute.xlu2 %v4892_v1 }
 0x66d   :  { %3984 = vperm.xlu2 %4707, %v3638_v46  }
 0x66f   :  { %v3897_v31 = vpop.permute.xlu2 %3896 }
 0x670   :  { %v3938_v41 = vmul.f32 %v3897_v31, %v3858_v5  ;;  %v3961_v31 = vld [vmem:[%s7144_s14 + $0x70] sm:$0xff]  ;;  %v3960_v5 = vld [vmem:[%s7144_s14 + $0x68] sm:$0xff] }
 0x673   :  { %4706 = vset.pattern.permute.xlu1 %v4894_v42 }
 0x674   :  { %3888 = vperm.xlu1 %4706, %v3638_v46  }
 0x675   :  { %4709 = vset.pattern.permute.xlu2 %v4894_v42 }
 0x676   :  { %v3993_v59 = vpop.permute.xlu0 %3992  ;;  %3880 = vperm.xlu2 %4709, %v6867_v28  }
 0x677   :  { %v4034_v24 = vmul.f32 %v3993_v59, %v3954_v10 }
 0x678   :  { %v3755_v12 = vpop.permute.xlu2 %3754 }
 0x679   :  { %v6912_v36 = vadd.f32 %v4034_v24, %v3938_v41  ;;  %v3788_v27 = vmul.f32 %v3755_v12, %v3692_v61  ;;  %v3864_v24 = vld [vmem:[%s7143_s13 + $0x68] sm:$0xff]  ;;  %v3863_v12 = vld [vmem:[%s7143_s13 + $0x60] sm:$0xff] }
 0x67c   :  { %v3913_v45 = vpop.permute.xlu1 %3912  ;;  %4708 = vset.pattern.permute.xlu1 %v4892_v1 }
 0x67d   :  { %3980 = vperm.xlu1 %4708, %v3635_v30   ;;  %v3942_v56 = vmul.f32 %v3913_v45, %v3862_v51  ;;  %v3865_v30 = vld [vmem:[%s7143_s13 + $0x70] sm:$0xff] }
 0x67e   :  { %3876 = vperm.xlu2 %4709, %v6864_v32  }
 0x681   :  { %v4009_v34 = vpop.permute.xlu2 %4008 }
 0x682   :  { %v4038_v33 = vmul.f32 %v4009_v34, %v3958_v57  ;;  %v3959_v34 = vld [vmem:[%s7144_s14 + $0x60] sm:$0xff] }
 0x684   :  { %v6922_v53 = vpop.permute.xlu0 %4012  ;;  %v6924_v0 = vadd.f32 %v4038_v33, %v3942_v56 }
 0x685   :  { %v3740_v63 = vpop.permute.xlu1 %3739  ;;  %3976 = vperm.xlu1 %4708, %v6867_v28   ;;  %v3688_v28 = vld [vmem:[%s7139_s9 + $0x38] sm:$0xff] }
 0x686   :  { %4712 = vset.pattern.permute.xlu2 %v4892_v1  ;;  %v3785_v8 = vmul.f32 %v3740_v63, %v3689_v48  ;;  %v3784_v7 = vmul.f32 %v6892_v38, %v3688_v28  ;;  %v3962_v38 = vld [vmem:[%s7144_s14 + $0x78] sm:$0xff] }
 0x687   :  { %3988 = vperm.xlu2 %4712, %v3641_v6  }
 0x68a   :  { %v6936_v25 = vpop.permute.xlu2 %3704 }
 0x68d   :  { %4711 = vset.pattern.permute.xlu1 %v4894_v42  ;;  %v3745_v17 = vpop.permute.xlu0 %3744  ;;  %v3695_v42 = vld [vmem:[%s7139_s9 + $0x70] sm:$0xff] }
 0x68e   :  { %v6929_v35 = vpop.permute.xlu1 %3996  ;;  %3892 = vperm.xlu1 %4711, %v3641_v6   ;;  %v3786_v32 = vmul.f32 %v3745_v17, %v3690_v14  ;;  %v3861_v17 = vld [vmem:[%s7143_s13 + $0x50] sm:$0xff] }
 0x68f   :  { %3968 = vperm.xlu2 %4712, %v6873_v44   ;;  %v3683_v14 = vld [vmem:[%s7139_s9 + $0x10] sm:$0xff] }
 0x693   :  { %v6943_v40 = vpop.permute.xlu2 %3900 }
 0x696   :  { %3872 = vperm.xlu1 %4711, %v6873_v44   ;;  %v6933_v54 = vpop.permute.xlu0 %3920 }
 0x697   :  { %v3760_v62 = vpop.permute.xlu1 %3759  ;;  %3964 = vperm.xlu2 %4712, %v6848_v49   ;;  %v3944_v56 = vmul.f32 %v6933_v54, %v3864_v24 }
 0x69b   :  { %v3917_v23 = vpop.permute.xlu2 %3916 }
 0x69c   :  { %v3943_v33 = vmul.f32 %v3917_v23, %v3863_v12  ;;  %v3860_v23 = vld [vmem:[%s7143_s13 + $0x48] sm:$0xff]  ;;  %v3855_v12 = vld [vmem:[%s7143_s13 + $0x20] sm:$0xff] }
 0x69e   :  { %3868 = vperm.xlu1 %4711, %v6848_v49   ;;  %v3693_v49 = vld [vmem:[%s7139_s9 + $0x60] sm:$0xff] }
 0x69f   :  { %v6939_v29 = vpop.permute.xlu0 %3714  ;;  %v6941_v11 = vpop.permute.xlu1 %3709  ;;  %v3789_v3 = vmul.f32 %v3760_v62, %v3693_v49  ;;  %v4039_v62 = vmul.f32 %v6922_v53, %v3959_v34  ;;  %v3685_v53 = vld [vmem:[%s7139_s9 + $0x20] sm:$0xff]  ;;  %v3956_v49 = vld [vmem:[%s7144_s14 + $0x48] sm:$0xff] }
 0x6a4   :  { %v3750_v50 = vpop.permute.xlu2 %3749 }
 0x6a5   :  { %v3787_v15 = vmul.f32 %v3750_v50, %v3691_v18  ;;  %v3955_v18 = vld [vmem:[%s7144_s14 + $0x40] sm:$0xff] }
 0x6a6   :  { %v4035_v28 = vmul.f32 %v6929_v35, %v3955_v18  ;;  %v3670_v35 = vlaneseq }
 0x6a7   :  { %v3770_v58 = vpop.permute.xlu0 %3769 }
 0x6a8   :  { %v6945_v1 = vpop.permute.xlu1 %4000  ;;  %v3791_v9 = vmul.f32 %v3770_v58, %v3695_v42  ;;  %v3686_v58 = vld [vmem:[%s7139_s9 + $0x28] sm:$0xff] }
 0x6ad   :  { %v4005_v44 = vpop.permute.xlu2 %4004 }
 0x6af   :  { %v3775_v55 = vpop.permute.xlu0 %3774 }
 0x6b0   :  { %v3792_v4 = vmul.f32 %v3775_v55, %v3696_v60  ;;  %v3957_v60 = vld [vmem:[%s7144_s14 + $0x50] sm:$0xff] }
 0x6b1   :  { %v3765_v43 = vpop.permute.xlu1 %3764  ;;  %v4037_v61 = vmul.f32 %v4005_v44, %v3957_v60  ;;  %v3853_v60 = vld [vmem:[%s7143_s13 + $0x10] sm:$0xff] }
 0x6b2   :  { %3797 = vmatpush.msrb.mxu1 %v3792_v4  ;;  %v3790_v37 = vmul.f32 %v3765_v43, %v3694_v2  ;;  %v4055_v2 = vadd.f32 %v4039_v62, %v3943_v33  ;;  %v3859_v43 = vld [vmem:[%s7143_s13 + $0x40] sm:$0xff]  ;;  %v3949_v33 = vld [vmem:[%s7144_s14 + $0x10] sm:$0xff] }
 0x6b4   :  { %3798 = vmatpush.msrb.mxu1 %v3791_v9 }
 0x6b5   :  { %v4021_v26 = vpop.permute.xlu2 %4020 }
 0x6b6   :  { %3799 = vmatpush.msrb.mxu1 %v3790_v37  ;;  %v4041_v45 = vmul.f32 %v4021_v26, %v3961_v31  ;;  %v3684_v37 = vld [vmem:[%s7139_s9 + $0x18] sm:$0xff]  ;;  %v3674_v26 = vand.u32 127, %v3670_v35  ;;  %v3952_v31 = vld [vmem:[%s7144_s14 + $0x28] sm:$0xff] }
 0x6b7   :  { %v3780_v48 = vmul.f32 %v6939_v29, %v3684_v37 }
 0x6b8   :  { %3800 = vmatpush.msrb.mxu1 %v3789_v3  ;;  %v3929_v21 = vpop.permute.xlu0 %3928 }
 0x6b9   :  { %v3946_v46 = vmul.f32 %v3929_v21, %v3866_v52  ;;  %v3939_v21 = vmul.f32 %v6943_v40, %v3859_v43  ;;  %v4895_v52 = vmov 1.0  }
 0x6ba   :  { %v4017_v39 = vpop.permute.xlu1 %4016  ;;  %3801 = vmatpush.msrb.mxu1 %v3788_v27 }
 0x6bb   :  { %v4040_v51 = vmul.f32 %v4017_v39, %v3960_v5  ;;  %v3951_v5 = vld [vmem:[%s7144_s14 + $0x20] sm:$0xff] }
 0x6bc   :  { %3802 = vmatpush.msrb.mxu1 %v3787_v15  ;;  %v4036_v15 = vmul.f32 %v6945_v1, %v3956_v49  ;;  %v3681_v1 = vld [vmem:[%s7139_s9] sm:$0xff] }
 0x6bd   :  { %v4056_v42 = vadd.f32 %v4040_v51, %v3944_v56  ;;  %v3854_v56 = vld [vmem:[%s7143_s13 + $0x18] sm:$0xff] }
 0x6be   :  { %3803 = vmatpush.msrb.mxu1 %v3786_v32  ;;  %v3720_v6 = vpop.permute.xlu2 %3719  ;;  %v3682_v32 = vld [vmem:[%s7139_s9 + $0x8] sm:$0xff] }
 0x6bf   :  { %v3781_v27 = vmul.f32 %v3720_v6, %v3685_v53  ;;  %v3778_v29 = vmul.f32 %v6936_v25, %v3682_v32  ;;  %v3819_v32 = vld [vmem:[%s7141_s11 + $0x10] sm:$0xff] }
 0x6c0   :  { %3804 = vmatpush.msrb.mxu1 %v3785_v8  ;;  %v3779_v8 = vmul.f32 %v6941_v11, %v3683_v14  ;;  %v3671_v11 = vshrl.u32 %v3670_v35, 7 }
 0x6c1   :  { %v3730_v47 = vpop.permute.xlu0 %3729 }
 0x6c2   :  { %v3783_v16 = vmul.f32 %v3730_v47, %v3687_v13  ;;  %3805 = vmatpush.msrb.mxu1 %v3784_v7  ;;  %v3777_v7 = vmul.f32 %v6896_v22, %v3681_v1  ;;  %v3817_v1 = vld [vmem:[%s7141_s11] sm:$0xff] }
 0x6c3   :  { %v3909_v19 = vpop.permute.xlu1 %3908 }
 0x6c4   :  { %3806 = vmatpush.msrb.mxu1 %v3783_v16  ;;  %v3941_v9 = vmul.f32 %v3909_v19, %v3861_v17  ;;  %v3672_v19 = vmul.u32 64, %v3671_v11 }
 0x6c6   :  { %v4053_v39 = vadd.f32 %v4037_v61, %v3941_v9  ;;  %vm3675_vm5 = vcmp.ge.s32.totalorder %v3674_v26, %v3672_v19  ;;  %v3948_v9 = vld [vmem:[%s7144_s14 + $0x8] sm:$0xff] }
 0x6c7   :  { %v7013_v54 = vpop.permute.xlu2 %3984 }
 0x6c8   :  { %v4032_v51 = vmul.f32 %v7013_v54, %v3952_v31  ;;  %v3852_v54 = vld [vmem:[%s7143_s13 + $0x8] sm:$0xff] }
 0x6ca   :  { %v3905_v55 = vpop.permute.xlu0 %3904 }
 0x6cb   :  { %v3925_v20 = vpop.permute.xlu1 %3924  ;;  %v3940_v3 = vmul.f32 %v3905_v55, %v3860_v23 }
 0x6cc   :  { %v3945_v59 = vmul.f32 %v3925_v20, %v3865_v30  ;;  %v3676_v20 = vadd.s32 64, %v3672_v19  ;;  %v3953_v30 = vld [vmem:[%s7144_s14 + $0x30] sm:$0xff] }
 0x6cd   :  { %v4052_v40 = vadd.f32 %v4036_v15, %v3940_v3  ;;  %v3947_v3 = vld [vmem:[%s7144_s14] sm:$0xff] }
 0x6ce   :  { %v4057_v63 = vadd.f32 %v4041_v45, %v3945_v59  ;;  %vm3677_vm6 = vcmp.lt.s32.totalorder %v3674_v26, %v3676_v20  ;;  %v3950_v45 = vld [vmem:[%s7144_s14 + $0x18] sm:$0xff]  ;;  %v4716_v26 = vld [vmem:[#allocation4] ss:$0 sm:$0xff] }
 0x6cf   :  { %vm7051_vm7 = vmand %vm3675_vm5, %vm3677_vm6 }
 0x6d0   :  { %v3881_v44 = vpop.permute.xlu2 %3880 }
 0x6d1   :  { %v3934_v23 = vmul.f32 %v3881_v44, %v3854_v56 }
 0x6d4   :  { %v4025_v10 = vpop.permute.xlu1 %4024 }
 0x6d5   :  { %v4042_v41 = vmul.f32 %v4025_v10, %v3962_v38  ;;  %v3856_v38 = vld [vmem:[%s7143_s13 + $0x28] sm:$0xff] }
 0x6d7   :  { %v4058_v57 = vadd.f32 %v4042_v41, %v3946_v46  ;;  %v3857_v46 = vld [vmem:[%s7143_s13 + $0x30] sm:$0xff] }
 0x6d8   :  { %v3877_v16 = vpop.permute.xlu2 %3876 }
 0x6d9   :  { %4063 = vmatpush.msra.mxu3 %v4058_v57 }
 0x6db   :  { %4064 = vmatpush.msra.mxu3 %v4057_v63 }
 0x6dd   :  { %v3725_v4 = vpop.permute.xlu1 %3724  ;;  %4065 = vmatpush.msra.mxu3 %v4056_v42 }
 0x6de   :  { %v3782_v50 = vmul.f32 %v3725_v4, %v3686_v58 }
 0x6df   :  { %4066 = vmatpush.msra.mxu3 %v4055_v2  ;;  %v3933_v2 = vmul.f32 %v3877_v16, %v3853_v60 }
 0x6e0   :  { %3807 = vmatpush.msrb.mxu1 %v3782_v50 }
 0x6e1   :  { %4067 = vmatpush.msra.mxu3 %v6924_v0  ;;  %v4051_v0 = vadd.f32 %v4035_v28, %v3939_v21  ;;  %v3989_v6 = vpop.permute.xlu2 %3988  ;;  %v4715_v28 = vld [vmem:[%s7140_s10] ss:$0 sm:$0xff] }
 0x6e2   :  { %3808 = vmatpush.msrb.mxu1 %v3781_v27  ;;  %v4033_v59 = vmul.f32 %v3989_v6, %v3953_v30  ;;  %v3851_v27 = vld [vmem:[%s7143_s13] sm:$0xff] }
 0x6e3   :  { %4068 = vmatpush.msra.mxu3 %v4053_v39 }
 0x6e4   :  { %3809 = vmatpush.msrb.mxu1 %v3780_v48  ;;  %v3820_v48 = vld [vmem:[%s7141_s11 + $0x18] sm:$0xff] }
 0x6e5   :  { %4069 = vmatpush.msra.mxu3 %v4052_v40  ;;  %3840 = vmatpush.msrb.mxu2 %v3820_v48 }
 0x6e6   :  { %v3889_v13 = vpop.permute.xlu1 %3888  ;;  %3810 = vmatpush.msrb.mxu1 %v3779_v8  ;;  %v3818_v8 = vld [vmem:[%s7141_s11 + $0x8] sm:$0xff] }
 0x6e7   :  { %4070 = vmatpush.msra.mxu3 %v4051_v0  ;;  %v3936_v41 = vmul.f32 %v3889_v13, %v3856_v38  ;;  %3841 = vmatpush.msrb.mxu2 %v3819_v32 }
 0x6e8   :  { %3811 = vmatpush.msrb.mxu1 %v3778_v29  ;;  %v4714_v29 = vld [vmem:[%s7145_s15] ss:$0 sm:$0xff]  ;;  %s4896_s15 = smov [#allocation5]  }
 0x6e9   :  { %4071 = vmatpush.msra.mxu3 %v6912_v36  ;;  %v3885_v36 = vpop.permute.xlu0 %3884  ;;  %v3969_v17 = vpop.permute.xlu2 %3968  ;;  %v4048_v42 = vadd.f32 %v4032_v51, %v3936_v41  ;;  %3842 = vmatpush.msrb.mxu2 %v3818_v8  ;;  %s4102_s28 = sshll.u32 %s4896_s15, 4  ;;  %s4103_s28 = int_to_ptr.vmem [resolvable:$true] %s4102_s28 }
 0x6ea   :  { %3812 = vmatpush.msrb.mxu1 %v3777_v7  ;;  %v3935_v62 = vmul.f32 %v3885_v36, %v3855_v12  ;;  %v4028_v50 = vmul.f32 %v3969_v17, %v3948_v9 }
 0x6eb   :  { %4436 = vmatmul.msk.f32.vlgmr.msrb.gmra.mxu1 %vm7051_vm7, %v4895_v52  ;;  %3843 = vmatpush.msrb.mxu2 %v3817_v1 }
 0x6ef   :  { %v3981_v47 = vpop.permute.xlu1 %3980 }
 0x6f0   :  { %v4031_v57 = vmul.f32 %v3981_v47, %v3951_v5 }
 0x6f1   :  { %v3973_v63 = vpop.permute.xlu0 %3972  ;;  %v3965_v18 = vpop.permute.xlu2 %3964 }
 0x6f2   :  { %v4029_v55 = vmul.f32 %v3973_v63, %v3949_v33  ;;  %v4047_v53 = vadd.f32 %v4031_v57, %v3935_v62  ;;  %v4027_v14 = vmul.f32 %v3965_v18, %v3947_v3 }
 0x6f4   :  { %v4045_v37 = vadd.f32 %v4029_v55, %v3933_v2 }
 0x6f7   :  { %v3977_v22 = vpop.permute.xlu1 %3976 }
 0x6f8   :  { %v4030_v58 = vmul.f32 %v3977_v22, %v3950_v45 }
 0x6fa   :  { %v4046_v49 = vadd.f32 %v4030_v58, %v3934_v23 }
 0x700   :  { %v3893_v10 = vpop.permute.xlu1 %3892 }
 0x701   :  { %v3937_v24 = vmul.f32 %v3893_v10, %v3857_v46 }
 0x703   :  { %v4049_v34 = vadd.f32 %v4033_v59, %v3937_v24 }
 0x705   :  { %4072 = vmatpush.msra.mxu3 %v4049_v34 }
 0x707   :  { %4073 = vmatpush.msra.mxu3 %v4048_v42 }
 0x708   :  { %v3873_v4 = vpop.permute.xlu1 %3872 }
 0x709   :  { %v3932_v43 = vmul.f32 %v3873_v4, %v3852_v54  ;;  %4074 = vmatpush.msra.mxu3 %v4047_v53 }
 0x70b   :  { %4075 = vmatpush.msra.mxu3 %v4046_v49  ;;  %v4044_v61 = vadd.f32 %v4028_v50, %v3932_v43 }
 0x70d   :  { %4076 = vmatpush.msra.mxu3 %v4045_v37 }
 0x70f   :  { %4077 = vmatpush.msra.mxu3 %v4044_v61 }
 0x710   :  { %v3869_v21 = vpop.permute.xlu1 %3868 }
 0x711   :  { %v3931_v15 = vmul.f32 %v3869_v21, %v3851_v27 }
 0x713   :  { %v4043_v39 = vadd.f32 %v4027_v14, %v3931_v15 }
 0x715   :  { %4078 = vmatpush.msra.mxu3 %v4043_v39 }
 0x716   :  { %4438 = vmatmul.msk.f32.vlgmr.msra.gmra.mxu3 %vm7051_vm7, %v4895_v52 }
 0x768   :  { %v3814_v40 = vpop.f32.mrf.mxu1 }
 0x769   :  { %v3815_v0 = vadd.f32 %v4715_v28, %v3814_v40 }
 0x76b   :  { %4437 = vmatmul.msk.f32.vlgmr.msrb.gmra.mxu2 %vm59_vm0, %v3815_v0 }
 0x799   :  { %v4080_v44 = vpop.f32.mrf.mxu3 }
 0x79a   :  { %v4081_v13 = vadd.f32 %v4714_v29, %v4080_v44 }
 0x79c   :  { %v4084_v7 = vsel %vm4083_vm8, %v4081_v13, -inf }
 0x79d   :  { %4085 = vmax.xlane.f32.xlu0 %v4084_v7 }
 0x7ee   :  { %v3845_v20 = vpop.f32.mrf.mxu2 }
 0x7ef   :  { %v3846_v25 = vadd.f32 %v4716_v26, %v3845_v20 }
 0x810   :  { %v4086_v35 = vpop.xlane.xlu0 %4085 }
 0x811   :  { %v4087_v11 = vsub.f32 %v4081_v13, %v4086_v35 }
 0x813   :  { %v4088_v47 = vmul.f32 1.442695, %v4087_v11 }
 0x815   :  { %4717 = vpow2.f32 %v4088_v47 }
 0x816   :  { %4719 = vtanh.f32 %v3846_v25 }
 0x81b   :  { %v4718_v16 = vpop.eup %4717 }
 0x81c   :  { %v4090_v19 = vsel %vm4083_vm8, %v4718_v16, 0.0  ;;  %v4720_v52 = vpop.eup %4719 }
 0x81d   :  { %4091 = vadd.xlane.f32.xlu1 %v4090_v19  ;;  %3850 = vst.msk [vmem:[%s7147_s17] sm:$0x3] %vm3849_vm9, %v4720_v52 }
 0x890   :  { %v4092_v22 = vpop.xlane.xlu1 %4091 }
 0x891   :  { %4721 = vlog2.f32 %v4092_v22 }
 0x897   :  { %v4722_v36 = vpop.eup %4721 }
 0x898   :  { %v4094_v6 = vmul.f32 0.6931472, %v4722_v36 }
 0x89a   :  { %v4095_v30 = vsub.f32 %v4087_v11, %v4094_v6 }
 0x89c   :  { %4096 = vst.msk [vmem:[#allocation5] sm:$0x3] %vm4083_vm8, %v4095_v30 }
 0x89d   :  { %4107 = dma.vmem_to_hbm [thread:$0]  %s4103_s28, 32, %s4105_s3, [#allocation6]  }
 0x89e   :  { %4815 = dma.done.wait [#allocation6], 32  }
 0x89f   :  { %4816 = vsyncadd [#allocation6], 4294967264 }
 0x8a0   :  { %4116 = vsyncpa [#allocation6], 1 }

</bundles_post_ra>
